<compile_context>
chip_gen: v5e
topology: v5e:2x2
jax: 0.10.0
libtpu: 0.0.40
codegen_flags: <defaults>
</compile_context>

<pallas_src>
import jax
import jax.numpy as jnp
import numpy as np
from jax.experimental import pallas as pl
from jax.experimental.pallas import tpu as pltpu

Z = 128          # z_size (must be divisible by 4)
BATCH = 256      # batched evaluations per call (review: feed the MXU rows)
TILE_M = 128     # rows per grid step
N_STYLES = 18    # torch.split(styles, 2, dim=1) -> 9 chunks used


def _lrelu(v):
    # PyTorch forward uses F.leaky_relu(., 0.2) explicitly.
    return jnp.where(v > 0, v, 0.2 * v)


def latent_disc_kernel(s_ref, w1_ref, b1_ref, wx_ref, ws_ref, bm_ref,
                       w10_ref, b10_ref, w11_ref, b11_ref, w12_ref, b12_ref,
                       out_ref):
    z = w1_ref.shape[0]
    f32 = jnp.float32
    bf16 = jnp.bfloat16

    s_all = s_ref[...]                                   # (tile_m, 9z) bf16

    # --- fc1 on the first flattened style chunk -----------------------------
    x = _lrelu(jnp.dot(s_all[:, 0:z], w1_ref[...], preferred_element_type=f32)
               + b1_ref[...])
    # TODO(synk): nn.Dropout(0.3) is identity at inference; stochastic masking omitted.

    # --- fc2 .. fc9 ----------------------------------------------------------
    # leaky_relu(cat(x, s) @ W.T + b) == leaky_relu(x @ Wx + s @ Ws + b).
    # The s@Ws dot (independent of x) is placed next to its consumer: the two
    # dots still pipeline on the MXU, no 8x(tile_m, z) f32 partials are kept
    # live (would spill at tile_m=128), and MRF pop order stays aligned with
    # the dependent chain on v5e/v6e.
    for i in range(8):
        s_i = s_all[:, (i + 1) * z:(i + 2) * z]
        h = (jnp.dot(x.astype(bf16), wx_ref[i], preferred_element_type=f32)
             + jnp.dot(s_i, ws_ref[i], preferred_element_type=f32)
             + bm_ref[i])
        x = _lrelu(h)

    # --- fc10 / fc11 head, lane-padded to full 128-wide tiles ---------------
    x = _lrelu(jnp.dot(x.astype(bf16), w10_ref[...], preferred_element_type=f32)
               + b10_ref[...])
    x = _lrelu(jnp.dot(x.astype(bf16), w11_ref[...], preferred_element_type=f32)
               + b11_ref[...])

    # --- fc12 (z/4 -> 1) as VPU multiply + lane reduce (avoids N=1 MXU dot) --
    out_ref[...] = (jnp.sum(x * w12_ref[...], axis=-1, keepdims=True)
                    + b12_ref[...])


def make_params(key, z):
    """Deterministic params mimicking nn.Linear default init (uniform +-1/sqrt(fan_in)).

    Kernel-ready params: weights transposed to (in, out), cat-weights split
    into x/s halves, head zero-padded to full 128 lanes, weights in bfloat16
    (biases stay float32)."""
    def linear(k, fan_in, fan_out):
        kw, kb = jax.random.split(k)
        bound = 1.0 / np.sqrt(fan_in)
        w = jax.random.uniform(kw, (fan_in, fan_out), jnp.float32, -bound, bound)
        b = jax.random.uniform(kb, (1, fan_out), jnp.float32, -bound, bound)
        return w, b

    keys = jax.random.split(key, 12)
    w1, b1 = linear(keys[0], z, z)

    wx_list, ws_list, bm_list = [], [], []
    for i in range(8):
        w, b = linear(keys[1 + i], 2 * z, z)       # (2z, z) transposed weight
        wx_list.append(w[:z])                      # multiplies x  (first half of cat)
        ws_list.append(w[z:])                      # multiplies s  (second half of cat)
        bm_list.append(b)                          # (1, z)
    wx = jnp.stack(wx_list)                        # (8, z, z)
    ws = jnp.stack(ws_list)                        # (8, z, z)
    bm = jnp.stack(bm_list)                        # (8, 1, z)

    w10, b10 = linear(keys[9], z, z // 2)          # (z,   z/2)
    w11, b11 = linear(keys[10], z // 2, z // 4)    # (z/2, z/4)
    w12, b12 = linear(keys[11], z // 4, 1)         # (z/4, 1)

    # Zero-pad the head so every activation stays a full (tile_m, z) tile.
    w10p = jnp.zeros((z, z), jnp.float32).at[:, :z // 2].set(w10)
    b10p = jnp.zeros((1, z), jnp.float32).at[:, :z // 2].set(b10)
    w11p = jnp.zeros((z, z), jnp.float32).at[:z // 2, :z // 4].set(w11)
    b11p = jnp.zeros((1, z), jnp.float32).at[:, :z // 4].set(b11)
    w12row = jnp.zeros((1, z), jnp.float32).at[:, :z // 4].set(w12[:, 0])

    bf = jnp.bfloat16
    return (w1.astype(bf), b1,
            wx.astype(bf), ws.astype(bf), bm,
            w10p.astype(bf), b10p,
            w11p.astype(bf), b11p,
            w12row, b12)


def latent_discriminator(styles, params, *, tile_m=TILE_M):
    """styles: (B, 18, z/2) float32.  Returns (B, 1) float32."""
    b, n_styles, half_z = styles.shape
    z = 2 * half_z
    assert n_styles == 18 and z % 4 == 0

    # split(.,2,dim=1)+flatten == row-major reshape; cast to bf16 once here.
    s_flat = styles.reshape(b, 9 * z).astype(jnp.bfloat16)

    # Pad batch to a multiple of tile_m; pad rows are discarded at the end.
    num_tiles = pl.cdiv(b, tile_m)
    bp = num_tiles * tile_m
    if bp != b:
        s_flat = jnp.pad(s_flat, ((0, bp - b), (0, 0)))

    def const_spec(a):
        nd = a.ndim
        return pl.BlockSpec(a.shape, lambda i, _nd=nd: (0,) * _nd)

    weight_specs = [const_spec(p) for p in params]

    # Advisory cost hint so XLA can schedule/overlap this custom call.
    flops = 2 * bp * z * z * 19 + 2 * bp * z
    in_arrays = (s_flat,) + tuple(params)
    bytes_accessed = sum(int(np.prod(a.shape)) * a.dtype.itemsize
                         for a in in_arrays) + bp * 4

    out = pl.pallas_call(
        latent_disc_kernel,
        out_shape=jax.ShapeDtypeStruct((bp, 1), jnp.float32),
        grid_spec=pltpu.PrefetchScalarGridSpec(
            num_scalar_prefetch=0,
            grid=(num_tiles,),
            in_specs=[pl.BlockSpec((tile_m, 9 * z), lambda i: (i, 0))]
                     + weight_specs,
            out_specs=pl.BlockSpec((tile_m, 1), lambda i: (i, 0)),
        ),
        compiler_params=pltpu.CompilerParams(
            dimension_semantics=("parallel",)),   # batch tiles -> 2 TCs on v7x
        cost_estimate=pl.CostEstimate(flops=flops, transcendentals=0,
                                      bytes_accessed=bytes_accessed),
    )(s_flat, *params)
    return out[:b]


def reference(styles, params):
    """Pure-JAX replica of the PyTorch forward (eval mode), using the same
    bf16-quantized weights/input upcast to f32 and the original cat((x, s))
    form; activations stay f32."""
    (w1, b1, wx, ws, bm, w10p, b10p, w11p, b11p, w12row, b12) = params
    f32 = jnp.float32
    b, _, half_z = styles.shape
    z = 2 * half_z

    s = styles.astype(jnp.bfloat16).astype(f32)    # same input quantization as kernel
    w1f = w1.astype(f32)
    w_mid = [jnp.concatenate([wx[i].astype(f32), ws[i].astype(f32)], axis=0)
             for i in range(8)]                    # (2z, z) like the original fc2..fc9
    w10 = w10p.astype(f32)[:, :z // 2]
    b10 = b10p[:, :z // 2]
    w11 = w11p.astype(f32)[:z // 2, :z // 4]
    b11 = b11p[:, :z // 4]
    w12 = w12row[:, :z // 4].T                     # (z/4, 1)

    parts = [s[:, 2 * i:2 * i + 2].reshape(b, z) for i in range(9)]
    x = _lrelu(parts[0] @ w1f + b1)
    for i in range(8):
        x = jnp.concatenate([x, parts[i + 1]], axis=1)
        x = _lrelu(x @ w_mid[i] + bm[i])
    x = _lrelu(x @ w10 + b10)
    x = _lrelu(x @ w11 + b11)
    return x @ w12 + b12


if __name__ == "__main__":
    key = jax.random.PRNGKey(0)
    k_params, k_in = jax.random.split(key)

    params = make_params(k_params, Z)
    styles = jax.random.normal(k_in, (BATCH, N_STYLES, Z // 2), jnp.float32)

    out = latent_discriminator(styles, params)
    out = jax.block_until_ready(out)

    ref = reference(styles, params)
    # Kernel casts activations to bf16 at the MXU inputs; reference keeps f32
    # activations with the same bf16-quantized weights/input -> loose tolerance.
    np.testing.assert_allclose(np.asarray(out), np.asarray(ref),
                               rtol=2e-2, atol=2e-2)
    assert out.shape == (BATCH, 1)
    print("KERNEL_OK")
</pallas_src>

<mosaic_0001>
module attributes {stable_mosaic.version = 11 : i64} {
  func.func @latent_disc_kernel(%arg0: i32, %arg1: memref<128x1152xbf16, #tpu.memory_space<vmem>>, %arg2: memref<128x128xbf16, #tpu.memory_space<vmem>>, %arg3: memref<1x128xf32, #tpu.memory_space<vmem>>, %arg4: memref<8x128x128xbf16, #tpu.memory_space<vmem>>, %arg5: memref<8x128x128xbf16, #tpu.memory_space<vmem>>, %arg6: memref<8x1x128xf32, #tpu.memory_space<vmem>>, %arg7: memref<128x128xbf16, #tpu.memory_space<vmem>>, %arg8: memref<1x128xf32, #tpu.memory_space<vmem>>, %arg9: memref<128x128xbf16, #tpu.memory_space<vmem>>, %arg10: memref<1x128xf32, #tpu.memory_space<vmem>>, %arg11: memref<1x128xf32, #tpu.memory_space<vmem>>, %arg12: memref<1x1xf32, #tpu.memory_space<vmem>>, %arg13: memref<128x1xf32, #tpu.memory_space<vmem>>) attributes {dimension_semantics = [#tpu.dimension_semantics<parallel>], iteration_bounds = array<i64: 2>, scalar_prefetch = 0 : i64, scratch_operands = 0 : i64, tpu.core_type = #tpu.core_type<tc>, window_params = [{transform_indices = @transform_0, window_bounds = array<i64: 128, 1152>}, {pipeline_mode = #tpu.pipeline_mode<synchronous>, transform_indices = @transform_1, window_bounds = array<i64: 128, 128>}, {pipeline_mode = #tpu.pipeline_mode<synchronous>, transform_indices = @transform_2, window_bounds = array<i64: 1, 128>}, {pipeline_mode = #tpu.pipeline_mode<synchronous>, transform_indices = @transform_3, window_bounds = array<i64: 8, 128, 128>}, {pipeline_mode = #tpu.pipeline_mode<synchronous>, transform_indices = @transform_4, window_bounds = array<i64: 8, 128, 128>}, {pipeline_mode = #tpu.pipeline_mode<synchronous>, transform_indices = @transform_5, window_bounds = array<i64: 8, 1, 128>}, {pipeline_mode = #tpu.pipeline_mode<synchronous>, transform_indices = @transform_6, window_bounds = array<i64: 128, 128>}, {pipeline_mode = #tpu.pipeline_mode<synchronous>, transform_indices = @transform_7, window_bounds = array<i64: 1, 128>}, {pipeline_mode = #tpu.pipeline_mode<synchronous>, transform_indices = @transform_8, window_bounds = array<i64: 128, 128>}, {pipeline_mode = #tpu.pipeline_mode<synchronous>, transform_indices = @transform_9, window_bounds = array<i64: 1, 128>}, {pipeline_mode = #tpu.pipeline_mode<synchronous>, transform_indices = @transform_10, window_bounds = array<i64: 1, 128>}, {pipeline_mode = #tpu.pipeline_mode<synchronous>, transform_indices = @transform_11, window_bounds = array<i64: 1, 1>}, {transform_indices = @transform_12, window_bounds = array<i64: 128, 1>}]} {
    %c0 = arith.constant 0 : index
    %c0_0 = arith.constant 0 : index
    %0 = vector.load %arg1[%c0, %c0_0] : memref<128x1152xbf16, #tpu.memory_space<vmem>>, vector<128x1152xbf16>
    %1 = vector.extract_strided_slice %0 {offsets = [0, 0], sizes = [128, 128], strides = [1, 1]} : vector<128x1152xbf16> to vector<128x128xbf16>
    %c0_1 = arith.constant 0 : index
    %c0_2 = arith.constant 0 : index
    %2 = vector.load %arg2[%c0_1, %c0_2] : memref<128x128xbf16, #tpu.memory_space<vmem>>, vector<128x128xbf16>
    %cst = arith.constant dense<0.000000e+00> : vector<128x128xf32>
    %3 = tpu.matmul %1, %2, %cst {dimension_numbers = #tpu.dot_dimension_numbers<[1], [0], [0], [1], [0, 0, 1, 1], [], []>} : vector<128x128xbf16>, vector<128x128xbf16>, vector<128x128xf32> -> vector<128x128xf32>
    %c0_3 = arith.constant 0 : index
    %c0_4 = arith.constant 0 : index
    %4 = vector.load %arg3[%c0_3, %c0_4] : memref<1x128xf32, #tpu.memory_space<vmem>>, vector<1x128xf32>
    %5 = vector.broadcast %4 : vector<1x128xf32> to vector<128x128xf32>
    %6 = arith.addf %3, %5 : vector<128x128xf32>
    %cst_5 = arith.constant 0.000000e+00 : f32
    %7 = vector.broadcast %cst_5 : f32 to vector<128x128xf32>
    %8 = arith.cmpf ogt, %6, %7 : vector<128x128xf32>
    %cst_6 = arith.constant 2.000000e-01 : f32
    %9 = vector.broadcast %cst_6 : f32 to vector<128x128xf32>
    %10 = arith.mulf %9, %6 : vector<128x128xf32>
    %11 = arith.select %8, %6, %10 : vector<128x128xi1>, vector<128x128xf32>
    %12 = vector.extract_strided_slice %0 {offsets = [0, 128], sizes = [128, 128], strides = [1, 1]} : vector<128x1152xbf16> to vector<128x128xbf16>
    %13 = arith.truncf %11 : vector<128x128xf32> to vector<128x128xbf16>
    %c0_7 = arith.constant 0 : index
    %c0_8 = arith.constant 0 : index
    %c0_9 = arith.constant 0 : index
    %14 = vector.load %arg4[%c0_7, %c0_8, %c0_9] : memref<8x128x128xbf16, #tpu.memory_space<vmem>>, vector<1x128x128xbf16>
    %15 = vector.shape_cast %14 : vector<1x128x128xbf16> to vector<128x128xbf16>
    %cst_10 = arith.constant dense<0.000000e+00> : vector<128x128xf32>
    %16 = tpu.matmul %13, %15, %cst_10 {dimension_numbers = #tpu.dot_dimension_numbers<[1], [0], [0], [1], [0, 0, 1, 1], [], []>} : vector<128x128xbf16>, vector<128x128xbf16>, vector<128x128xf32> -> vector<128x128xf32>
    %c0_11 = arith.constant 0 : index
    %c0_12 = arith.constant 0 : index
    %c0_13 = arith.constant 0 : index
    %17 = vector.load %arg5[%c0_11, %c0_12, %c0_13] : memref<8x128x128xbf16, #tpu.memory_space<vmem>>, vector<1x128x128xbf16>
    %18 = vector.shape_cast %17 : vector<1x128x128xbf16> to vector<128x128xbf16>
    %cst_14 = arith.constant dense<0.000000e+00> : vector<128x128xf32>
    %19 = tpu.matmul %12, %18, %cst_14 {dimension_numbers = #tpu.dot_dimension_numbers<[1], [0], [0], [1], [0, 0, 1, 1], [], []>} : vector<128x128xbf16>, vector<128x128xbf16>, vector<128x128xf32> -> vector<128x128xf32>
    %20 = arith.addf %16, %19 : vector<128x128xf32>
    %c0_15 = arith.constant 0 : index
    %c0_16 = arith.constant 0 : index
    %c0_17 = arith.constant 0 : index
    %21 = vector.load %arg6[%c0_15, %c0_16, %c0_17] : memref<8x1x128xf32, #tpu.memory_space<vmem>>, vector<1x1x128xf32>
    %22 = vector.shape_cast %21 : vector<1x1x128xf32> to vector<1x128xf32>
    %23 = vector.broadcast %22 : vector<1x128xf32> to vector<128x128xf32>
    %24 = arith.addf %20, %23 : vector<128x128xf32>
    %cst_18 = arith.constant 0.000000e+00 : f32
    %25 = vector.broadcast %cst_18 : f32 to vector<128x128xf32>
    %26 = arith.cmpf ogt, %24, %25 : vector<128x128xf32>
    %cst_19 = arith.constant 2.000000e-01 : f32
    %27 = vector.broadcast %cst_19 : f32 to vector<128x128xf32>
    %28 = arith.mulf %27, %24 : vector<128x128xf32>
    %29 = arith.select %26, %24, %28 : vector<128x128xi1>, vector<128x128xf32>
    %30 = vector.extract_strided_slice %0 {offsets = [0, 256], sizes = [128, 128], strides = [1, 1]} : vector<128x1152xbf16> to vector<128x128xbf16>
    %31 = arith.truncf %29 : vector<128x128xf32> to vector<128x128xbf16>
    %c1 = arith.constant 1 : index
    %c0_20 = arith.constant 0 : index
    %c0_21 = arith.constant 0 : index
    %32 = vector.load %arg4[%c1, %c0_20, %c0_21] : memref<8x128x128xbf16, #tpu.memory_space<vmem>>, vector<1x128x128xbf16>
    %33 = vector.shape_cast %32 : vector<1x128x128xbf16> to vector<128x128xbf16>
    %cst_22 = arith.constant dense<0.000000e+00> : vector<128x128xf32>
    %34 = tpu.matmul %31, %33, %cst_22 {dimension_numbers = #tpu.dot_dimension_numbers<[1], [0], [0], [1], [0, 0, 1, 1], [], []>} : vector<128x128xbf16>, vector<128x128xbf16>, vector<128x128xf32> -> vector<128x128xf32>
    %c1_23 = arith.constant 1 : index
    %c0_24 = arith.constant 0 : index
    %c0_25 = arith.constant 0 : index
    %35 = vector.load %arg5[%c1_23, %c0_24, %c0_25] : memref<8x128x128xbf16, #tpu.memory_space<vmem>>, vector<1x128x128xbf16>
    %36 = vector.shape_cast %35 : vector<1x128x128xbf16> to vector<128x128xbf16>
    %cst_26 = arith.constant dense<0.000000e+00> : vector<128x128xf32>
    %37 = tpu.matmul %30, %36, %cst_26 {dimension_numbers = #tpu.dot_dimension_numbers<[1], [0], [0], [1], [0, 0, 1, 1], [], []>} : vector<128x128xbf16>, vector<128x128xbf16>, vector<128x128xf32> -> vector<128x128xf32>
    %38 = arith.addf %34, %37 : vector<128x128xf32>
    %c1_27 = arith.constant 1 : index
    %c0_28 = arith.constant 0 : index
    %c0_29 = arith.constant 0 : index
    %39 = vector.load %arg6[%c1_27, %c0_28, %c0_29] : memref<8x1x128xf32, #tpu.memory_space<vmem>>, vector<1x1x128xf32>
    %40 = vector.shape_cast %39 : vector<1x1x128xf32> to vector<1x128xf32>
    %41 = vector.broadcast %40 : vector<1x128xf32> to vector<128x128xf32>
    %42 = arith.addf %38, %41 : vector<128x128xf32>
    %cst_30 = arith.constant 0.000000e+00 : f32
    %43 = vector.broadcast %cst_30 : f32 to vector<128x128xf32>
    %44 = arith.cmpf ogt, %42, %43 : vector<128x128xf32>
    %cst_31 = arith.constant 2.000000e-01 : f32
    %45 = vector.broadcast %cst_31 : f32 to vector<128x128xf32>
    %46 = arith.mulf %45, %42 : vector<128x128xf32>
    %47 = arith.select %44, %42, %46 : vector<128x128xi1>, vector<128x128xf32>
    %48 = vector.extract_strided_slice %0 {offsets = [0, 384], sizes = [128, 128], strides = [1, 1]} : vector<128x1152xbf16> to vector<128x128xbf16>
    %49 = arith.truncf %47 : vector<128x128xf32> to vector<128x128xbf16>
    %c2 = arith.constant 2 : index
    %c0_32 = arith.constant 0 : index
    %c0_33 = arith.constant 0 : index
    %50 = vector.load %arg4[%c2, %c0_32, %c0_33] : memref<8x128x128xbf16, #tpu.memory_space<vmem>>, vector<1x128x128xbf16>
    %51 = vector.shape_cast %50 : vector<1x128x128xbf16> to vector<128x128xbf16>
    %cst_34 = arith.constant dense<0.000000e+00> : vector<128x128xf32>
    %52 = tpu.matmul %49, %51, %cst_34 {dimension_numbers = #tpu.dot_dimension_numbers<[1], [0], [0], [1], [0, 0, 1, 1], [], []>} : vector<128x128xbf16>, vector<128x128xbf16>, vector<128x128xf32> -> vector<128x128xf32>
    %c2_35 = arith.constant 2 : index
    %c0_36 = arith.constant 0 : index
    %c0_37 = arith.constant 0 : index
    %53 = vector.load %arg5[%c2_35, %c0_36, %c0_37] : memref<8x128x128xbf16, #tpu.memory_space<vmem>>, vector<1x128x128xbf16>
    %54 = vector.shape_cast %53 : vector<1x128x128xbf16> to vector<128x128xbf16>
    %cst_38 = arith.constant dense<0.000000e+00> : vector<128x128xf32>
    %55 = tpu.matmul %48, %54, %cst_38 {dimension_numbers = #tpu.dot_dimension_numbers<[1], [0], [0], [1], [0, 0, 1, 1], [], []>} : vector<128x128xbf16>, vector<128x128xbf16>, vector<128x128xf32> -> vector<128x128xf32>
    %56 = arith.addf %52, %55 : vector<128x128xf32>
    %c2_39 = arith.constant 2 : index
    %c0_40 = arith.constant 0 : index
    %c0_41 = arith.constant 0 : index
    %57 = vector.load %arg6[%c2_39, %c0_40, %c0_41] : memref<8x1x128xf32, #tpu.memory_space<vmem>>, vector<1x1x128xf32>
    %58 = vector.shape_cast %57 : vector<1x1x128xf32> to vector<1x128xf32>
    %59 = vector.broadcast %58 : vector<1x128xf32> to vector<128x128xf32>
    %60 = arith.addf %56, %59 : vector<128x128xf32>
    %cst_42 = arith.constant 0.000000e+00 : f32
    %61 = vector.broadcast %cst_42 : f32 to vector<128x128xf32>
    %62 = arith.cmpf ogt, %60, %61 : vector<128x128xf32>
    %cst_43 = arith.constant 2.000000e-01 : f32
    %63 = vector.broadcast %cst_43 : f32 to vector<128x128xf32>
    %64 = arith.mulf %63, %60 : vector<128x128xf32>
    %65 = arith.select %62, %60, %64 : vector<128x128xi1>, vector<128x128xf32>
    %66 = vector.extract_strided_slice %0 {offsets = [0, 512], sizes = [128, 128], strides = [1, 1]} : vector<128x1152xbf16> to vector<128x128xbf16>
    %67 = arith.truncf %65 : vector<128x128xf32> to vector<128x128xbf16>
    %c3 = arith.constant 3 : index
    %c0_44 = arith.constant 0 : index
    %c0_45 = arith.constant 0 : index
    %68 = vector.load %arg4[%c3, %c0_44, %c0_45] : memref<8x128x128xbf16, #tpu.memory_space<vmem>>, vector<1x128x128xbf16>
    %69 = vector.shape_cast %68 : vector<1x128x128xbf16> to vector<128x128xbf16>
    %cst_46 = arith.constant dense<0.000000e+00> : vector<128x128xf32>
    %70 = tpu.matmul %67, %69, %cst_46 {dimension_numbers = #tpu.dot_dimension_numbers<[1], [0], [0], [1], [0, 0, 1, 1], [], []>} : vector<128x128xbf16>, vector<128x128xbf16>, vector<128x128xf32> -> vector<128x128xf32>
    %c3_47 = arith.constant 3 : index
    %c0_48 = arith.constant 0 : index
    %c0_49 = arith.constant 0 : index
    %71 = vector.load %arg5[%c3_47, %c0_48, %c0_49] : memref<8x128x128xbf16, #tpu.memory_space<vmem>>, vector<1x128x128xbf16>
    %72 = vector.shape_cast %71 : vector<1x128x128xbf16> to vector<128x128xbf16>
    %cst_50 = arith.constant dense<0.000000e+00> : vector<128x128xf32>
    %73 = tpu.matmul %66, %72, %cst_50 {dimension_numbers = #tpu.dot_dimension_numbers<[1], [0], [0], [1], [0, 0, 1, 1], [], []>} : vector<128x128xbf16>, vector<128x128xbf16>, vector<128x128xf32> -> vector<128x128xf32>
    %74 = arith.addf %70, %73 : vector<128x128xf32>
    %c3_51 = arith.constant 3 : index
    %c0_52 = arith.constant 0 : index
    %c0_53 = arith.constant 0 : index
    %75 = vector.load %arg6[%c3_51, %c0_52, %c0_53] : memref<8x1x128xf32, #tpu.memory_space<vmem>>, vector<1x1x128xf32>
    %76 = vector.shape_cast %75 : vector<1x1x128xf32> to vector<1x128xf32>
    %77 = vector.broadcast %76 : vector<1x128xf32> to vector<128x128xf32>
    %78 = arith.addf %74, %77 : vector<128x128xf32>
    %cst_54 = arith.constant 0.000000e+00 : f32
    %79 = vector.broadcast %cst_54 : f32 to vector<128x128xf32>
    %80 = arith.cmpf ogt, %78, %79 : vector<128x128xf32>
    %cst_55 = arith.constant 2.000000e-01 : f32
    %81 = vector.broadcast %cst_55 : f32 to vector<128x128xf32>
    %82 = arith.mulf %81, %78 : vector<128x128xf32>
    %83 = arith.select %80, %78, %82 : vector<128x128xi1>, vector<128x128xf32>
    %84 = vector.extract_strided_slice %0 {offsets = [0, 640], sizes = [128, 128], strides = [1, 1]} : vector<128x1152xbf16> to vector<128x128xbf16>
    %85 = arith.truncf %83 : vector<128x128xf32> to vector<128x128xbf16>
    %c4 = arith.constant 4 : index
    %c0_56 = arith.constant 0 : index
    %c0_57 = arith.constant 0 : index
    %86 = vector.load %arg4[%c4, %c0_56, %c0_57] : memref<8x128x128xbf16, #tpu.memory_space<vmem>>, vector<1x128x128xbf16>
    %87 = vector.shape_cast %86 : vector<1x128x128xbf16> to vector<128x128xbf16>
    %cst_58 = arith.constant dense<0.000000e+00> : vector<128x128xf32>
    %88 = tpu.matmul %85, %87, %cst_58 {dimension_numbers = #tpu.dot_dimension_numbers<[1], [0], [0], [1], [0, 0, 1, 1], [], []>} : vector<128x128xbf16>, vector<128x128xbf16>, vector<128x128xf32> -> vector<128x128xf32>
    %c4_59 = arith.constant 4 : index
    %c0_60 = arith.constant 0 : index
    %c0_61 = arith.constant 0 : index
    %89 = vector.load %arg5[%c4_59, %c0_60, %c0_61] : memref<8x128x128xbf16, #tpu.memory_space<vmem>>, vector<1x128x128xbf16>
    %90 = vector.shape_cast %89 : vector<1x128x128xbf16> to vector<128x128xbf16>
    %cst_62 = arith.constant dense<0.000000e+00> : vector<128x128xf32>
    %91 = tpu.matmul %84, %90, %cst_62 {dimension_numbers = #tpu.dot_dimension_numbers<[1], [0], [0], [1], [0, 0, 1, 1], [], []>} : vector<128x128xbf16>, vector<128x128xbf16>, vector<128x128xf32> -> vector<128x128xf32>
    %92 = arith.addf %88, %91 : vector<128x128xf32>
    %c4_63 = arith.constant 4 : index
    %c0_64 = arith.constant 0 : index
    %c0_65 = arith.constant 0 : index
    %93 = vector.load %arg6[%c4_63, %c0_64, %c0_65] : memref<8x1x128xf32, #tpu.memory_space<vmem>>, vector<1x1x128xf32>
    %94 = vector.shape_cast %93 : vector<1x1x128xf32> to vector<1x128xf32>
    %95 = vector.broadcast %94 : vector<1x128xf32> to vector<128x128xf32>
    %96 = arith.addf %92, %95 : vector<128x128xf32>
    %cst_66 = arith.constant 0.000000e+00 : f32
    %97 = vector.broadcast %cst_66 : f32 to vector<128x128xf32>
    %98 = arith.cmpf ogt, %96, %97 : vector<128x128xf32>
    %cst_67 = arith.constant 2.000000e-01 : f32
    %99 = vector.broadcast %cst_67 : f32 to vector<128x128xf32>
    %100 = arith.mulf %99, %96 : vector<128x128xf32>
    %101 = arith.select %98, %96, %100 : vector<128x128xi1>, vector<128x128xf32>
    %102 = vector.extract_strided_slice %0 {offsets = [0, 768], sizes = [128, 128], strides = [1, 1]} : vector<128x1152xbf16> to vector<128x128xbf16>
    %103 = arith.truncf %101 : vector<128x128xf32> to vector<128x128xbf16>
    %c5 = arith.constant 5 : index
    %c0_68 = arith.constant 0 : index
    %c0_69 = arith.constant 0 : index
    %104 = vector.load %arg4[%c5, %c0_68, %c0_69] : memref<8x128x128xbf16, #tpu.memory_space<vmem>>, vector<1x128x128xbf16>
    %105 = vector.shape_cast %104 : vector<1x128x128xbf16> to vector<128x128xbf16>
    %cst_70 = arith.constant dense<0.000000e+00> : vector<128x128xf32>
    %106 = tpu.matmul %103, %105, %cst_70 {dimension_numbers = #tpu.dot_dimension_numbers<[1], [0], [0], [1], [0, 0, 1, 1], [], []>} : vector<128x128xbf16>, vector<128x128xbf16>, vector<128x128xf32> -> vector<128x128xf32>
    %c5_71 = arith.constant 5 : index
    %c0_72 = arith.constant 0 : index
    %c0_73 = arith.constant 0 : index
    %107 = vector.load %arg5[%c5_71, %c0_72, %c0_73] : memref<8x128x128xbf16, #tpu.memory_space<vmem>>, vector<1x128x128xbf16>
    %108 = vector.shape_cast %107 : vector<1x128x128xbf16> to vector<128x128xbf16>
    %cst_74 = arith.constant dense<0.000000e+00> : vector<128x128xf32>
    %109 = tpu.matmul %102, %108, %cst_74 {dimension_numbers = #tpu.dot_dimension_numbers<[1], [0], [0], [1], [0, 0, 1, 1], [], []>} : vector<128x128xbf16>, vector<128x128xbf16>, vector<128x128xf32> -> vector<128x128xf32>
    %110 = arith.addf %106, %109 : vector<128x128xf32>
    %c5_75 = arith.constant 5 : index
    %c0_76 = arith.constant 0 : index
    %c0_77 = arith.constant 0 : index
    %111 = vector.load %arg6[%c5_75, %c0_76, %c0_77] : memref<8x1x128xf32, #tpu.memory_space<vmem>>, vector<1x1x128xf32>
    %112 = vector.shape_cast %111 : vector<1x1x128xf32> to vector<1x128xf32>
    %113 = vector.broadcast %112 : vector<1x128xf32> to vector<128x128xf32>
    %114 = arith.addf %110, %113 : vector<128x128xf32>
    %cst_78 = arith.constant 0.000000e+00 : f32
    %115 = vector.broadcast %cst_78 : f32 to vector<128x128xf32>
    %116 = arith.cmpf ogt, %114, %115 : vector<128x128xf32>
    %cst_79 = arith.constant 2.000000e-01 : f32
    %117 = vector.broadcast %cst_79 : f32 to vector<128x128xf32>
    %118 = arith.mulf %117, %114 : vector<128x128xf32>
    %119 = arith.select %116, %114, %118 : vector<128x128xi1>, vector<128x128xf32>
    %120 = vector.extract_strided_slice %0 {offsets = [0, 896], sizes = [128, 128], strides = [1, 1]} : vector<128x1152xbf16> to vector<128x128xbf16>
    %121 = arith.truncf %119 : vector<128x128xf32> to vector<128x128xbf16>
    %c6 = arith.constant 6 : index
    %c0_80 = arith.constant 0 : index
    %c0_81 = arith.constant 0 : index
    %122 = vector.load %arg4[%c6, %c0_80, %c0_81] : memref<8x128x128xbf16, #tpu.memory_space<vmem>>, vector<1x128x128xbf16>
    %123 = vector.shape_cast %122 : vector<1x128x128xbf16> to vector<128x128xbf16>
    %cst_82 = arith.constant dense<0.000000e+00> : vector<128x128xf32>
    %124 = tpu.matmul %121, %123, %cst_82 {dimension_numbers = #tpu.dot_dimension_numbers<[1], [0], [0], [1], [0, 0, 1, 1], [], []>} : vector<128x128xbf16>, vector<128x128xbf16>, vector<128x128xf32> -> vector<128x128xf32>
    %c6_83 = arith.constant 6 : index
    %c0_84 = arith.constant 0 : index
    %c0_85 = arith.constant 0 : index
    %125 = vector.load %arg5[%c6_83, %c0_84, %c0_85] : memref<8x128x128xbf16, #tpu.memory_space<vmem>>, vector<1x128x128xbf16>
    %126 = vector.shape_cast %125 : vector<1x128x128xbf16> to vector<128x128xbf16>
    %cst_86 = arith.constant dense<0.000000e+00> : vector<128x128xf32>
    %127 = tpu.matmul %120, %126, %cst_86 {dimension_numbers = #tpu.dot_dimension_numbers<[1], [0], [0], [1], [0, 0, 1, 1], [], []>} : vector<128x128xbf16>, vector<128x128xbf16>, vector<128x128xf32> -> vector<128x128xf32>
    %128 = arith.addf %124, %127 : vector<128x128xf32>
    %c6_87 = arith.constant 6 : index
    %c0_88 = arith.constant 0 : index
    %c0_89 = arith.constant 0 : index
    %129 = vector.load %arg6[%c6_87, %c0_88, %c0_89] : memref<8x1x128xf32, #tpu.memory_space<vmem>>, vector<1x1x128xf32>
    %130 = vector.shape_cast %129 : vector<1x1x128xf32> to vector<1x128xf32>
    %131 = vector.broadcast %130 : vector<1x128xf32> to vector<128x128xf32>
    %132 = arith.addf %128, %131 : vector<128x128xf32>
    %cst_90 = arith.constant 0.000000e+00 : f32
    %133 = vector.broadcast %cst_90 : f32 to vector<128x128xf32>
    %134 = arith.cmpf ogt, %132, %133 : vector<128x128xf32>
    %cst_91 = arith.constant 2.000000e-01 : f32
    %135 = vector.broadcast %cst_91 : f32 to vector<128x128xf32>
    %136 = arith.mulf %135, %132 : vector<128x128xf32>
    %137 = arith.select %134, %132, %136 : vector<128x128xi1>, vector<128x128xf32>
    %138 = vector.extract_strided_slice %0 {offsets = [0, 1024], sizes = [128, 128], strides = [1, 1]} : vector<128x1152xbf16> to vector<128x128xbf16>
    %139 = arith.truncf %137 : vector<128x128xf32> to vector<128x128xbf16>
    %c7 = arith.constant 7 : index
    %c0_92 = arith.constant 0 : index
    %c0_93 = arith.constant 0 : index
    %140 = vector.load %arg4[%c7, %c0_92, %c0_93] : memref<8x128x128xbf16, #tpu.memory_space<vmem>>, vector<1x128x128xbf16>
    %141 = vector.shape_cast %140 : vector<1x128x128xbf16> to vector<128x128xbf16>
    %cst_94 = arith.constant dense<0.000000e+00> : vector<128x128xf32>
    %142 = tpu.matmul %139, %141, %cst_94 {dimension_numbers = #tpu.dot_dimension_numbers<[1], [0], [0], [1], [0, 0, 1, 1], [], []>} : vector<128x128xbf16>, vector<128x128xbf16>, vector<128x128xf32> -> vector<128x128xf32>
    %c7_95 = arith.constant 7 : index
    %c0_96 = arith.constant 0 : index
    %c0_97 = arith.constant 0 : index
    %143 = vector.load %arg5[%c7_95, %c0_96, %c0_97] : memref<8x128x128xbf16, #tpu.memory_space<vmem>>, vector<1x128x128xbf16>
    %144 = vector.shape_cast %143 : vector<1x128x128xbf16> to vector<128x128xbf16>
    %cst_98 = arith.constant dense<0.000000e+00> : vector<128x128xf32>
    %145 = tpu.matmul %138, %144, %cst_98 {dimension_numbers = #tpu.dot_dimension_numbers<[1], [0], [0], [1], [0, 0, 1, 1], [], []>} : vector<128x128xbf16>, vector<128x128xbf16>, vector<128x128xf32> -> vector<128x128xf32>
    %146 = arith.addf %142, %145 : vector<128x128xf32>
    %c7_99 = arith.constant 7 : index
    %c0_100 = arith.constant 0 : index
    %c0_101 = arith.constant 0 : index
    %147 = vector.load %arg6[%c7_99, %c0_100, %c0_101] : memref<8x1x128xf32, #tpu.memory_space<vmem>>, vector<1x1x128xf32>
    %148 = vector.shape_cast %147 : vector<1x1x128xf32> to vector<1x128xf32>
    %149 = vector.broadcast %148 : vector<1x128xf32> to vector<128x128xf32>
    %150 = arith.addf %146, %149 : vector<128x128xf32>
    %cst_102 = arith.constant 0.000000e+00 : f32
    %151 = vector.broadcast %cst_102 : f32 to vector<128x128xf32>
    %152 = arith.cmpf ogt, %150, %151 : vector<128x128xf32>
    %cst_103 = arith.constant 2.000000e-01 : f32
    %153 = vector.broadcast %cst_103 : f32 to vector<128x128xf32>
    %154 = arith.mulf %153, %150 : vector<128x128xf32>
    %155 = arith.select %152, %150, %154 : vector<128x128xi1>, vector<128x128xf32>
    %156 = arith.truncf %155 : vector<128x128xf32> to vector<128x128xbf16>
    %c0_104 = arith.constant 0 : index
    %c0_105 = arith.constant 0 : index
    %157 = vector.load %arg7[%c0_104, %c0_105] : memref<128x128xbf16, #tpu.memory_space<vmem>>, vector<128x128xbf16>
    %cst_106 = arith.constant dense<0.000000e+00> : vector<128x128xf32>
    %158 = tpu.matmul %156, %157, %cst_106 {dimension_numbers = #tpu.dot_dimension_numbers<[1], [0], [0], [1], [0, 0, 1, 1], [], []>} : vector<128x128xbf16>, vector<128x128xbf16>, vector<128x128xf32> -> vector<128x128xf32>
    %c0_107 = arith.constant 0 : index
    %c0_108 = arith.constant 0 : index
    %159 = vector.load %arg8[%c0_107, %c0_108] : memref<1x128xf32, #tpu.memory_space<vmem>>, vector<1x128xf32>
    %160 = vector.broadcast %159 : vector<1x128xf32> to vector<128x128xf32>
    %161 = arith.addf %158, %160 : vector<128x128xf32>
    %cst_109 = arith.constant 0.000000e+00 : f32
    %162 = vector.broadcast %cst_109 : f32 to vector<128x128xf32>
    %163 = arith.cmpf ogt, %161, %162 : vector<128x128xf32>
    %cst_110 = arith.constant 2.000000e-01 : f32
    %164 = vector.broadcast %cst_110 : f32 to vector<128x128xf32>
    %165 = arith.mulf %164, %161 : vector<128x128xf32>
    %166 = arith.select %163, %161, %165 : vector<128x128xi1>, vector<128x128xf32>
    %167 = arith.truncf %166 : vector<128x128xf32> to vector<128x128xbf16>
    %c0_111 = arith.constant 0 : index
    %c0_112 = arith.constant 0 : index
    %168 = vector.load %arg9[%c0_111, %c0_112] : memref<128x128xbf16, #tpu.memory_space<vmem>>, vector<128x128xbf16>
    %cst_113 = arith.constant dense<0.000000e+00> : vector<128x128xf32>
    %169 = tpu.matmul %167, %168, %cst_113 {dimension_numbers = #tpu.dot_dimension_numbers<[1], [0], [0], [1], [0, 0, 1, 1], [], []>} : vector<128x128xbf16>, vector<128x128xbf16>, vector<128x128xf32> -> vector<128x128xf32>
    %c0_114 = arith.constant 0 : index
    %c0_115 = arith.constant 0 : index
    %170 = vector.load %arg10[%c0_114, %c0_115] : memref<1x128xf32, #tpu.memory_space<vmem>>, vector<1x128xf32>
    %171 = vector.broadcast %170 : vector<1x128xf32> to vector<128x128xf32>
    %172 = arith.addf %169, %171 : vector<128x128xf32>
    %cst_116 = arith.constant 0.000000e+00 : f32
    %173 = vector.broadcast %cst_116 : f32 to vector<128x128xf32>
    %174 = arith.cmpf ogt, %172, %173 : vector<128x128xf32>
    %cst_117 = arith.constant 2.000000e-01 : f32
    %175 = vector.broadcast %cst_117 : f32 to vector<128x128xf32>
    %176 = arith.mulf %175, %172 : vector<128x128xf32>
    %177 = arith.select %174, %172, %176 : vector<128x128xi1>, vector<128x128xf32>
    %c0_118 = arith.constant 0 : index
    %c0_119 = arith.constant 0 : index
    %178 = vector.load %arg11[%c0_118, %c0_119] : memref<1x128xf32, #tpu.memory_space<vmem>>, vector<1x128xf32>
    %179 = vector.broadcast %178 : vector<1x128xf32> to vector<128x128xf32>
    %180 = arith.mulf %177, %179 : vector<128x128xf32>
    %cst_120 = arith.constant dense<0.000000e+00> : vector<128xf32>
    %181 = vector.multi_reduction <add>, %180, %cst_120 [1] : vector<128x128xf32> to vector<128xf32>
    %182 = vector.shape_cast %181 : vector<128xf32> to vector<128x1xf32>
    %c0_121 = arith.constant 0 : index
    %c0_122 = arith.constant 0 : index
    %183 = vector.load %arg12[%c0_121, %c0_122] : memref<1x1xf32, #tpu.memory_space<vmem>>, vector<1x1xf32>
    %184 = vector.broadcast %183 : vector<1x1xf32> to vector<128x1xf32>
    %185 = arith.addf %182, %184 : vector<128x1xf32>
    %c0_123 = arith.constant 0 : index
    %c0_124 = arith.constant 0 : index
    %186 = vector.load %arg13[%c0_123, %c0_124] : memref<128x1xf32, #tpu.memory_space<vmem>>, vector<128x1xf32>
    tpu.vector_store %arg13[%c0_123, %c0_124], %185 {strides = array<i32>} : memref<128x1xf32, #tpu.memory_space<vmem>>, vector<128x1xf32>,
    return
  }
  func.func @transform_0(%arg0: i32) -> (i32, i32) {
    %c0_i32 = arith.constant 0 : i32
    %c0_i32_0 = arith.constant 0 : i32
    return %arg0, %c0_i32 : i32, i32
  }
  func.func @transform_1(%arg0: i32) -> (i32, i32) {
    %c0_i32 = arith.constant 0 : i32
    %c0_i32_0 = arith.constant 0 : i32
    %c0_i32_1 = arith.constant 0 : i32
    return %c0_i32, %c0_i32_0 : i32, i32
  }
  func.func @transform_2(%arg0: i32) -> (i32, i32) {
    %c0_i32 = arith.constant 0 : i32
    %c0_i32_0 = arith.constant 0 : i32
    %c0_i32_1 = arith.constant 0 : i32
    return %c0_i32, %c0_i32_0 : i32, i32
  }
  func.func @transform_3(%arg0: i32) -> (i32, i32, i32) {
    %c0_i32 = arith.constant 0 : i32
    %c0_i32_0 = arith.constant 0 : i32
    %c0_i32_1 = arith.constant 0 : i32
    %c0_i32_2 = arith.constant 0 : i32
    return %c0_i32, %c0_i32_0, %c0_i32_1 : i32, i32, i32
  }
  func.func @transform_4(%arg0: i32) -> (i32, i32, i32) {
    %c0_i32 = arith.constant 0 : i32
    %c0_i32_0 = arith.constant 0 : i32
    %c0_i32_1 = arith.constant 0 : i32
    %c0_i32_2 = arith.constant 0 : i32
    return %c0_i32, %c0_i32_0, %c0_i32_1 : i32, i32, i32
  }
  func.func @transform_5(%arg0: i32) -> (i32, i32, i32) {
    %c0_i32 = arith.constant 0 : i32
    %c0_i32_0 = arith.constant 0 : i32
    %c0_i32_1 = arith.constant 0 : i32
    %c0_i32_2 = arith.constant 0 : i32
    return %c0_i32, %c0_i32_0, %c0_i32_1 : i32, i32, i32
  }
  func.func @transform_6(%arg0: i32) -> (i32, i32) {
    %c0_i32 = arith.constant 0 : i32
    %c0_i32_0 = arith.constant 0 : i32
    %c0_i32_1 = arith.constant 0 : i32
    return %c0_i32, %c0_i32_0 : i32, i32
  }
  func.func @transform_7(%arg0: i32) -> (i32, i32) {
    %c0_i32 = arith.constant 0 : i32
    %c0_i32_0 = arith.constant 0 : i32
    %c0_i32_1 = arith.constant 0 : i32
    return %c0_i32, %c0_i32_0 : i32, i32
  }
  func.func @transform_8(%arg0: i32) -> (i32, i32) {
    %c0_i32 = arith.constant 0 : i32
    %c0_i32_0 = arith.constant 0 : i32
    %c0_i32_1 = arith.constant 0 : i32
    return %c0_i32, %c0_i32_0 : i32, i32
  }
  func.func @transform_9(%arg0: i32) -> (i32, i32) {
    %c0_i32 = arith.constant 0 : i32
    %c0_i32_0 = arith.constant 0 : i32
    %c0_i32_1 = arith.constant 0 : i32
    return %c0_i32, %c0_i32_0 : i32, i32
  }
  func.func @transform_10(%arg0: i32) -> (i32, i32) {
    %c0_i32 = arith.constant 0 : i32
    %c0_i32_0 = arith.constant 0 : i32
    %c0_i32_1 = arith.constant 0 : i32
    return %c0_i32, %c0_i32_0 : i32, i32
  }
  func.func @transform_11(%arg0: i32) -> (i32, i32) {
    %c0_i32 = arith.constant 0 : i32
    %c0_i32_0 = arith.constant 0 : i32
    %c0_i32_1 = arith.constant 0 : i32
    return %c0_i32, %c0_i32_0 : i32, i32
  }
  func.func @transform_12(%arg0: i32) -> (i32, i32) {
    %c0_i32 = arith.constant 0 : i32
    %c0_i32_0 = arith.constant 0 : i32
    return %arg0, %c0_i32 : i32, i32
  }
}

</mosaic_0001>

<bundles_post_ra>
// kernel: tpu_custom_call.1
= control target key start
LH: loop header
LB: loop body
LE: loop exit
PB: predicated region body
PF: predicated region fallthrough
CT: control target
= control target key end

     0   :  { %s6348_s0 = inlined_call_operand.hbm [shape: bf16[256,1152], index: 0, kind: input, shape index: {}]   ;;  %s6349_s1 = inlined_call_operand.hbm [shape: bf16[128,128], index: 1, kind: input, shape index: {}]   ;;  %s6350_s2 = inlined_call_operand.vmem [shape: f32[1,128], index: 2, kind: input, shape index: {}]   ;;  %s6351_s3 = inlined_call_operand.hbm [shape: bf16[8,128,128], index: 3, kind: input, shape index: {}]   ;;  %s6352_s4 = inlined_call_operand.hbm [shape: bf16[8,128,128], index: 4, kind: input, shape index: {}]   ;;  %s6353_s5 = inlined_call_operand.hbm [shape: f32[8,1,128], index: 5, kind: input, shape index: {}]   ;;  %s6354_s6 = inlined_call_operand.hbm [shape: bf16[128,128], index: 6, kind: input, shape index: {}]   ;;  %s6355_s7 = inlined_call_operand.vmem [shape: f32[1,128], index: 7, kind: input, shape index: {}]   ;;  %s6356_s8 = inlined_call_operand.hbm [shape: bf16[128,128], index: 8, kind: input, shape index: {}]   ;;  %s6357_s9 = inlined_call_operand.vmem [shape: f32[1,128], index: 9, kind: input, shape index: {}]   ;;  %s6358_s10 = inlined_call_operand.vmem [shape: f32[1,128], index: 10, kind: input, shape index: {}]   ;;  %s6359_s11 = inlined_call_operand.<no memory space> [shape: f32[1,1], index: 11, kind: input, shape index: {}]   ;;  %s6360_s12 = inlined_call_operand.vmem [shape: f32[256,1], index: 12, kind: output, shape index: {}]  }
   0x1   :  { %6362 = sst [smem:[#allocation18_spill]] %s6349_s1  ;;  %v17_v0 = vstv %s6359_s11 }
   0x2   :  { %6363 = sst [smem:[#allocation19_spill]] %s6351_s3  ;;  %18 = vst [vmem:[#allocation2] sm:$0x1] %v17_v0 }
   0x3   :  { %6364 = sst [smem:[#allocation20_spill]] %s6352_s4 }
   0x4   :  { %6365 = sst [smem:[#allocation21_spill]] %s6353_s5 }
   0x5   :  { %19 = vsyncpa [#allocation4], 0 }
   0x6   :  { %21 = vsyncpa [#allocation4 + $0x1], 0 }
   0x7   :  { %22 = vsyncpa [#allocation6], 0 }
   0x8   :  { %23 = vsyncpa [#allocation9], 0 }
   0x9   :  { %24 = vsyncpa [#allocation12], 0  ;;  %s5777_s23 = smov 0   ;;  %s5779_s24 = smov 0  }
   0xa   :  { %s5781_s25 = smov 0   ;;  %s5783_s26 = smov 0  }
   0xb LB: > { %s6366_s1 = sld [smem:[#allocation18_spill]]  ;;  %s6361_s29 = sadd.s32 4294967295, %s5695_s26   ;;  %s5695_s26 = sphi %s5783_s26, %s6379_s26   ;;  %s5691_s25 = sphi %s5781_s25, %s6378_s25   ;;  %s5687_s24 = sphi %s5779_s24, %s6377_s24   ;;  %s5683_s23 = sphi %s5777_s23, %s6376_s23  }
   0xc   : > { %p4151_p0 = scmp.ge.s32.totalorder %s5695_s26, 1  ;;  %p5804_p1 = scmp.eq.s32.totalorder %s6361_s29, 0 }
   0xd   : > { %p318_p2 = scmp.lt.s32.totalorder %s5695_s26, 3  ;;  %s5697_s14 = smov [#allocation5]  }
   0xe   : > { %s331_s15 = sshll.u32 %s5697_s14, 4  ;;  %s6369_s4 = sld [smem:[#allocation20_spill]]  ;;  %s332_s15 = int_to_ptr.vmem [resolvable:$true] %s331_s15 }
   0xf   : > { %p5809_p3 = pnand %p4151_p0, %p318_p2  ;;  %s388_s22 = sshll.u32 %s6354_s6, 4  ;;  %s389_s22 = int_to_ptr.hbm [resolvable:$true] %s388_s22 }
  0x10   : > { %s5698_s11 = smov [#allocation8]   ;;  %s5699_s14 = smov 64  }
  0x11   : > { %s329_s28 = sshll.u32 %s6366_s1, 4  ;;  %p5346_p4 = pneg %p5809_p3  ;;  %s330_s28 = int_to_ptr.hbm [resolvable:$true] %s329_s28 }
  0x12   : > { %s362_s27 = sshll.u32 %s5698_s11, 4  ;;  %s5700_s29 = smov 4   ;;  %s363_s27 = int_to_ptr.vmem [resolvable:$true] %s362_s27 }
  0x13   : > { %p5820_p5 = pnand %p5346_p4, %p5804_p1  ;;  %s6371_s3 = sld [smem:[#allocation19_spill]] }
  0x14   : > { %s360_s18 = sshll.u32 %s6369_s4, 4  ;;  %s5701_s21 = smov [#allocation11]   ;;  %s361_s18 = int_to_ptr.hbm [resolvable:$true] %s360_s18 }
  0x15   : > { %5349 = dma.hbm_to_vmem [thread:$0]  (!%p5820_p5), %s330_s28, 1024, %s332_s15, [#allocation6], %s5699_s14, %s5699_s14, %s5700_s29  }
  0x16   : > { %5355 = dma.hbm_to_vmem [thread:$0]  (!%p5820_p5), %s361_s18, 8192, %s363_s27, [#allocation9], %s5699_s14, %s5699_s14, %s5700_s29  }
  0x17   : > { %s390_s11 = sshll.u32 %s5701_s21, 4  ;;  %s5702_s28 = smov [#allocation7]   ;;  %s391_s11 = int_to_ptr.vmem [resolvable:$true] %s390_s11 }
  0x18   : > { %5361 = dma.hbm_to_vmem [thread:$0]  (!%p5820_p5), %s389_s22, 1024, %s391_s11, [#allocation12], %s5699_s14, %s5699_s14, %s5700_s29  }
  0x19   : > { %s346_s20 = sshll.u32 %s6371_s3, 4  ;;  %s348_s15 = sshll.u32 %s5702_s28, 4  ;;  %s347_s20 = int_to_ptr.hbm [resolvable:$true] %s346_s20  ;;  %s349_s15 = int_to_ptr.vmem [resolvable:$true] %s348_s15 }
  0x1a   : > { %s6372_s5 = sld [smem:[#allocation21_spill]]  ;;  %s5703_s22 = smov [#allocation10]  }
  0x1b   : > { %5352 = dma.hbm_to_vmem [thread:$0]  (!%p5820_p5), %s347_s20, 8192, %s349_s15, [#allocation6], %s5699_s14, %s5699_s14, %s5700_s29  }
  0x1c   : > { %s376_s27 = sshll.u32 %s5703_s22, 4  ;;  %s405_s4 = sshll.u32 %s6356_s8, 4  ;;  %s377_s27 = int_to_ptr.vmem [resolvable:$true] %s376_s27  ;;  %s406_s4 = int_to_ptr.hbm [resolvable:$true] %s405_s4 }
  0x1d   : > { %s5704_s17 = smov 16   ;;  %s5705_s21 = smov 1  }
  0x1e   : > { %s5706_s20 = smov [#allocation13]   ;;  %s5864_s28 = sadd.s32 1, %s5695_s26  }
  0x1f   : > { %s407_s11 = sshll.u32 %s5706_s20, 4  ;;  %s37_s15 = sadd.s32 1, %s5691_s25  ;;  %s408_s11 = int_to_ptr.vmem [resolvable:$true] %s407_s11 }
  0x20   : > { %s374_s18 = sshll.u32 %s6372_s5, 4  ;;  %s34_s22 = ssub.s32 %s5695_s26, %s5864_s28  ;;  %s375_s18 = int_to_ptr.hbm [resolvable:$true] %s374_s18 }
  0x21   : > { %5358 = dma.hbm_to_vmem [thread:$0]  (!%p5820_p5), %s375_s18, 128, %s377_s27, [#allocation9], %s5704_s17, %s5704_s17, %s5705_s21  }
  0x22   : > { %5364 = dma.hbm_to_vmem [thread:$0]  (!%p5820_p5), %s406_s4, 1024, %s408_s11, [#allocation12], %s5699_s14, %s5699_s14, %s5700_s29  }
  0x23   : > { %p44_p6 = scmp.ne.s32.totalorder %s5691_s25, %s5687_s24  ;;  %p35_p7 = scmp.eq.s32.totalorder %s34_s22, 0 }
  0x24   : > { %p45_p8 = scmp.eq.s32.totalorder %s5695_s26, 0  ;;  %p50_p9 = scmp.ne.s32.totalorder %s5687_s24, %s5683_s23 }
  0x25   : > { %p5375_p10 = scmp.lt.s32.totalorder %s5695_s26, 2  ;;  %s430_s27 = sand.u32 1, %s5691_s25  }
  0x26   : > { %s5876_s18 = scalar_select %p35_p7, %s5691_s25, %s37_s15  }
  0x27   : > { %p46_p11 = por %p45_p8, %p44_p6  ;;  %p5880_p12 = por %p5804_p1, %p50_p9 }
  0x28   : > { %s5318_s29 = smul.u32 576, %s5695_s26  ;;  %s431_s11 = scalar_lea.sflag [#allocation4], %s430_s27 }
  0x29   : > { %s5317_s14 = smul.u32 576, %s430_s27  ;;  %p5889_p13 = pnand %p5375_p10, %p46_p11 }
  0x2a   : > { %s440_s4 = scalar_lea.hbm %s6348_s0, %s5318_s29  ;;  %s5626_s1 = scalar_lea.hbm %s6348_s0, 1152 }
  0x2b   : > { %s441_s23 = sshll.u32 %s440_s4, 4  ;;  %s434_s21 = scalar_lea.vmem [#allocation3], %s5317_s14  ;;  %s442_s23 = int_to_ptr.hbm [resolvable:$true] %s441_s23 }
  0x2c   : > { %s443_s20 = sshll.u32 %s434_s21, 4  ;;  %s5619_s15 = sshra.s32 %s442_s23, 4  ;;  %s444_s20 = int_to_ptr.vmem [resolvable:$true] %s443_s20  ;;  %s5620_s15 = int_to_ptr.hbm [resolvable:$true] %s5619_s15 }
  0x2d   : > { %s5621_s22 = scalar_lea.hbm %s5620_s15, 576  ;;  %p5623_p2 = pneg %p5889_p13 }
  0x2e   : > { %p5622_p0 = scmp.ne.s32.totalorder %s5620_s15, %s5621_s22  ;;  %p5627_p6 = scmp.lt.s32.totalorder %s5620_s15, %s6348_s0 }
  0x2f   : > { %p5628_p7 = scmp.lt.s32.totalorder %s5626_s1, %s5621_s22 }
  0x30   : > { %p5624_p4 = pnand %p5623_p2, %p5622_p0 }
  0x31   : > { %p5629_p8 = por %p5628_p7, %p5627_p6 }
  0x32   : > { %p5625_p5 = pneg %p5624_p4 }
  0x34   : > { %p5630_p9 = pnand %p5629_p8, %p5625_p5 }
  0x36   : > { %5633 = shalt.err (!%p5630_p9)
}
  0x37   : > { %s5707_s27 = smov 576   ;;  %s5708_s14 = smov 36  }
  0x38   : > { %5368 = dma.hbm_to_vmem [thread:$0]  (!%p5889_p13), %s442_s23, 9216, %s444_s20, %s431_s11, %s5707_s27, %s5707_s27, %s5708_s14  }
  0x39   : > { %455 = sbr.rel (%p5809_p3) target bundleno = 1923 (0x783), region = 68  ;;  %s457_s4 = sand.u32 (!%p5809_p3), 1, %s5687_s24  }
  0x3a   : > { %s5319_s21 = smul.u32 (!%p5809_p3), 576, %s457_s4  ;;  %s458_s29 = scalar_lea.sflag (!%p5809_p3), [#allocation4], %s457_s4 }
  0x3c   : > { %s5906_s16 = scalar_lea.vmem (!%p5809_p3), [#allocation3], %s5319_s21 }
  0x3e   : > { %5666 = dma.done.wait (%p5880_p12), %s458_s29, 9216  }
  0x3f   : > { %5668 = vsyncadd (%p5880_p12), %s458_s29, 4294958080 }
  0x40   : > { %5670 = dma.done.wait (%p5804_p1), [#allocation6], 9216  }
  0x41   : > { %5672 = vsyncadd (%p5804_p1), [#allocation6], 4294958080 }
  0x42   : > { %5674 = dma.done.wait (%p5804_p1), [#allocation9], 8320  }
  0x43   : > { %5676 = vsyncadd (%p5804_p1), [#allocation9], 4294958976 }
  0x44   : > { %5678 = dma.done.wait (%p5804_p1), [#allocation12], 2048  }
  0x45   : > { %5680 = vsyncadd (%p5804_p1), [#allocation12], 4294965248  ;;  %v5148_v1 = vld [vmem:[#allocation5 + $0x38] sm:$0xff]  ;;  %v5147_v2 = vld [vmem:[#allocation5 + $0x30] sm:$0xff]  ;;  %s6375_s11 = sadd.s32 4294967295, %s5695_s26  }
  0x46   : > { %736 = vmatpush.bf16.msra.mxu0 %v5148_v1  ;;  %5293 = vmatpush.bf16.msra.mxu3 %v5148_v1  ;;  %v5146_v3 = vld [vmem:[#allocation5 + $0x28] sm:$0xff]  ;;  %v5145_v4 = vld [vmem:[#allocation5 + $0x20] sm:$0xff]  ;;  %v5144_v5 = vld [vmem:[#allocation5 + $0x18] sm:$0xff]  ;;  %s4169_s15 = sshll.u32 %s6375_s11, 4 }
  0x47   : > { %v5143_v6 = vld [vmem:[#allocation5 + $0x10] sm:$0xff]  ;;  %v5142_v7 = vld [vmem:[#allocation5 + $0x8] sm:$0xff]  ;;  %v5141_v8 = vld [vmem:[#allocation5] sm:$0xff]  ;;  %p535_p1 = scmp.lt.s32.totalorder %s4169_s15, 31 }
  0x48   : > { %v4173_v9 = vld [vmem:[%s5906_s16] sm:$0xf]  ;;  %v5073_v10 = vld [vmem:[%s5906_s16 + $0x20] sm:$0xf0]  ;;  %v4181_v11 = vld [vmem:[%s5906_s16 + $0x90] sm:$0xf] }
  0x49   : > { %v5091_v12 = vld [vmem:[%s5906_s16 + $0xb0] sm:$0xf0]  ;;  %v4174_v13 = vor.u32 %v5073_v10, %v4173_v9  ;;  %v4177_v15 = vld [vmem:[%s5906_s16 + $0x48] sm:$0xf]  ;;  %v5082_v16 = vld [vmem:[%s5906_s16 + $0x68] sm:$0xf0] }
  0x4a   : > { %737 = vmatpush.bf16.msra.mxu0 %v5147_v2  ;;  %5294 = vmatpush.bf16.msra.mxu3 %v5147_v2  ;;  %v4182_v14 = vor.u32 %v5091_v12, %v4181_v11  ;;  %v4185_v17 = vld [vmem:[%s5906_s16 + $0xd8] sm:$0xf]  ;;  %v5100_v18 = vld [vmem:[%s5906_s16 + $0xf8] sm:$0xf0]  ;;  %v4178_v19 = vor.u32 %v5082_v16, %v4177_v15  ;;  %v4189_v21 = vld [vmem:[%s5906_s16 + $0x120] sm:$0xf] }
  0x4b   : > { %v4186_v20 = vor.u32 %v5100_v18, %v4185_v17  ;;  %v5109_v22 = vld [vmem:[%s5906_s16 + $0x140] sm:$0xf0]  ;;  %v5164_v24 = vld [vmem:[#allocation8 + $0x38] sm:$0xff]  ;;  %v5163_v25 = vld [vmem:[#allocation8 + $0x30] sm:$0xff]  ;;  %s6381_s15 = smov (!%p535_p1, %s4169_s15), 31 }
  0x4c   : > { %v4190_v23 = vor.u32 %v5109_v22, %v4189_v21  ;;  %5301 = vmatpush.bf16.msra.mxu1 %v5164_v24  ;;  %v5162_v26 = vld [vmem:[#allocation8 + $0x28] sm:$0xff]  ;;  %v5161_v30 = vld [vmem:[#allocation8 + $0x20] sm:$0xff]  ;;  %v5160_v31 = vld [vmem:[#allocation8 + $0x18] sm:$0xff]  ;;  %s4170_s22 = sshll.u32 %s6381_s15, 3 }
  0x4d   : > { %v4193_v27 = vld [vmem:[%s5906_s16 + $0x168] sm:$0xf]  ;;  %v5118_v28 = vld [vmem:[%s5906_s16 + $0x188] sm:$0xf0]  ;;  %v5156_v32 = vld [vmem:[#allocation7 + $0x38] sm:$0xff]  ;;  %s6300_s27 = scalar_lea.vmem %s6360_s12, %s4170_s22 }
  0x4e   : > { %738 = vmatpush.bf16.msra.mxu0 %v5146_v3  ;;  %5295 = vmatpush.bf16.msra.mxu3 %v5146_v3  ;;  %v4194_v29 = vor.u32 %v5118_v28, %v4193_v27  ;;  %v5159_v33 = vld [vmem:[#allocation8 + $0x10] sm:$0xff]  ;;  %v5158_v37 = vld [vmem:[#allocation8 + $0x8] sm:$0xff]  ;;  %v5157_v40 = vld [vmem:[#allocation8] sm:$0xff] }
  0x4f   : > { %5309 = vmatpush.bf16.msra.mxu2 %v5156_v32  ;;  %v5155_v34 = vld [vmem:[#allocation7 + $0x30] sm:$0xff]  ;;  %v5154_v38 = vld [vmem:[#allocation7 + $0x28] sm:$0xff]  ;;  %v5069_v41 = vld [vmem:[%s5906_s16 + $0x4] sm:$0xf] }
  0x50   : > { %5302 = vmatpush.bf16.msra.mxu1 %v5163_v25  ;;  %v4197_v35 = vld [vmem:[%s5906_s16 + $0x1b0] sm:$0xf]  ;;  %v5127_v36 = vld [vmem:[%s5906_s16 + $0x1d0] sm:$0xf0]  ;;  %v4235_v42 = vld [vmem:[%s5906_s16 + $0x24] sm:$0xf0] }
  0x51   : > { %v4198_v39 = vor.u32 %v5127_v36, %v4197_v35  ;;  %v5153_v43 = vld [vmem:[#allocation7 + $0x20] sm:$0xff]  ;;  %v4238_v44 = vor.u32 %v5069_v41, %v4235_v42  ;;  %v4201_v45 = vld [vmem:[%s5906_s16 + $0x1f8] sm:$0xf]  ;;  %v5136_v46 = vld [vmem:[%s5906_s16 + $0x218] sm:$0xf0] }
  0x52   : > { %739 = vmatpush.bf16.msra.mxu0 %v5145_v4  ;;  %5296 = vmatpush.bf16.msra.mxu3 %v5145_v4  ;;  %v4202_v47 = vor.u32 %v5136_v46, %v4201_v45  ;;  %v5078_v48 = vld [vmem:[%s5906_s16 + $0x4c] sm:$0xf]  ;;  %v4239_v49 = vld [vmem:[%s5906_s16 + $0x6c] sm:$0xf0]  ;;  %v5152_v51 = vld [vmem:[#allocation7 + $0x18] sm:$0xff] }
  0x53   : > { %5310 = vmatpush.bf16.msra.mxu2 %v5155_v34  ;;  %v4242_v50 = vor.u32 %v5078_v48, %v4239_v49  ;;  %v5151_v52 = vld [vmem:[#allocation7 + $0x10] sm:$0xff]  ;;  %v5150_v53 = vld [vmem:[#allocation7 + $0x8] sm:$0xff]  ;;  %v5149_v54 = vld [vmem:[#allocation7] sm:$0xff] }
  0x54   : > { %5303 = vmatpush.bf16.msra.mxu1 %v5162_v26  ;;  %v5087_v55 = vld [vmem:[%s5906_s16 + $0x94] sm:$0xf]  ;;  %v4243_v56 = vld [vmem:[%s5906_s16 + $0xb4] sm:$0xf0]  ;;  %v5949_v59 = vld [vmem:[%s6350_s2] ss:$0 sm:$0xff] }
  0x55   : > { %v4246_v57 = vor.u32 %v5087_v55, %v4243_v56  ;;  %v5096_v2 = vld [vmem:[%s5906_s16 + $0xdc] sm:$0xf]  ;;  %v4247_v3 = vld [vmem:[%s5906_s16 + $0xfc] sm:$0xf0]  ;;  %v5179_v36 = vld [vmem:[#allocation8 + $0x70] sm:$0xff] }
  0x56   : > { %740 = vmatpush.bf16.msra.mxu0 %v5144_v5  ;;  %5297 = vmatpush.bf16.msra.mxu3 %v5144_v5  ;;  %v4250_v5 = vor.u32 %v5096_v2, %v4247_v3  ;;  %v5114_v41 = vld [vmem:[%s5906_s16 + $0x16c] sm:$0xf]  ;;  %v4255_v42 = vld [vmem:[%s5906_s16 + $0x18c] sm:$0xf0]  ;;  %v5177_v55 = vld [vmem:[#allocation8 + $0x60] sm:$0xff] }
  0x57   : > { %5311 = vmatpush.bf16.msra.mxu2 %v5154_v38  ;;  %v5178_v49 = vld [vmem:[#allocation8 + $0x68] sm:$0xff]  ;;  %v4259_v56 = vld [vmem:[%s5906_s16 + $0x1d4] sm:$0xf0] }
  0x58   : > { %5304 = vmatpush.bf16.msra.mxu1 %v5161_v30  ;;  %v5176_v3 = vld [vmem:[#allocation8 + $0x58] sm:$0xff] }
  0x5a   : > { %741 = vmatpush.bf16.msra.mxu0 %v5143_v6  ;;  %5298 = vmatpush.bf16.msra.mxu3 %v5143_v6 }
  0x5b   : > { %5312 = vmatpush.bf16.msra.mxu2 %v5153_v43 }
  0x5c   : > { %5305 = vmatpush.bf16.msra.mxu1 %v5160_v31 }
  0x5e   : > { %742 = vmatpush.bf16.msra.mxu0 %v5142_v7  ;;  %5299 = vmatpush.bf16.msra.mxu3 %v5142_v7 }
  0x5f   : > { %5313 = vmatpush.bf16.msra.mxu2 %v5152_v51 }
  0x60   : > { %5306 = vmatpush.bf16.msra.mxu1 %v5159_v33 }
  0x62   : > { %743 = vmatpush.bf16.msra.mxu0 %v5141_v8  ;;  %5300 = vmatpush.bf16.msra.mxu3 %v5141_v8 }
  0x63   : > { %5314 = vmatpush.bf16.msra.mxu2 %v5151_v52 }
  0x64   : > { %5307 = vmatpush.bf16.msra.mxu1 %v5158_v37 }
  0x65   : > { %744 = vmatmul.bf16.vlgmr.msra.gmra.mxu0 %v4174_v13  ;;  %754 = vmatmul.bf16.vlgmr.msra.gmra.mxu3 %v4182_v14 }
  0x66   : > { %953 = vmatpush.bf16.msrb.mxu0 %v5164_v24  ;;  %v5105_v24 = vld [vmem:[%s5906_s16 + $0x124] sm:$0xf] }
  0x67   : > { %5315 = vmatpush.bf16.msra.mxu2 %v5150_v53 }
  0x68   : > { %5308 = vmatpush.bf16.msra.mxu1 %v5157_v40 }
  0x6a   : > { %954 = vmatpush.bf16.msrb.mxu0 %v5163_v25  ;;  %v4251_v25 = vld [vmem:[%s5906_s16 + $0x144] sm:$0xf0] }
  0x6b   : > { %5316 = vmatpush.bf16.msra.mxu2 %v5149_v54  ;;  %971 = vmatmul.bf16.vlgmr.msra.gmra.mxu1 %v4246_v57  ;;  %v4254_v27 = vor.u32 %v5105_v24, %v4251_v25 }
  0x6e   : > { %955 = vmatpush.bf16.msrb.mxu0 %v5162_v26 }
  0x72   : > { %956 = vmatpush.bf16.msrb.mxu0 %v5161_v30 }
  0x75   : > { %749 = vmatmul.bf16.gmra.mxu0 %v4178_v19  ;;  %759 = vmatmul.bf16.gmra.mxu3 %v4186_v20 }
  0x76   : > { %957 = vmatpush.bf16.msrb.mxu0 %v5160_v31 }
  0x7a   : > { %958 = vmatpush.bf16.msrb.mxu0 %v5159_v33 }
  0x7b   : > { %976 = vmatmul.bf16.gmra.mxu1 %v4250_v5  ;;  %v4263_v5 = vld [vmem:[%s5906_s16 + $0x21c] sm:$0xf0] }
  0x7e   : > { %959 = vmatpush.bf16.msrb.mxu0 %v5158_v37 }
  0x82   : > { %960 = vmatpush.bf16.msrb.mxu0 %v5157_v40 }
  0x85   : > { %764 = vmatmul.bf16.gmra.mxu3 %v4190_v23  ;;  %961 = vmatmul.bf16.vlgmr.msrb.gmra.mxu0 %v4238_v44  ;;  %v5180_v23 = vld [vmem:[#allocation8 + $0x78] sm:$0xff] }
  0x86   : > { %1050 = vmatpush.bf16.msra.mxu0 %v5156_v32  ;;  %1305 = vmatpush.bf16.msrb.mxu3 %v5180_v23 }
  0x8a   : > { %1051 = vmatpush.bf16.msra.mxu0 %v5155_v34  ;;  %1306 = vmatpush.bf16.msrb.mxu3 %v5179_v36 }
  0x8b   : > { %981 = vmatmul.bf16.gmra.mxu1 %v4254_v27 }
  0x8e   : > { %1052 = vmatpush.bf16.msra.mxu0 %v5154_v38  ;;  %1307 = vmatpush.bf16.msrb.mxu3 %v5178_v49 }
  0x92   : > { %1053 = vmatpush.bf16.msra.mxu0 %v5153_v43  ;;  %v4258_v43 = vor.u32 %v5114_v41, %v4255_v42  ;;  %1308 = vmatpush.bf16.msrb.mxu3 %v5177_v55  ;;  %v5083_v41 = vld [vmem:[%s5906_s16 + $0x70] sm:$0xf0] }
  0x95   : > { %769 = vmatmul.bf16.gmra.mxu3 %v4194_v29  ;;  %966 = vmatmul.bf16.gmra.mxu0 %v4242_v50 }
  0x96   : > { %1054 = vmatpush.bf16.msra.mxu0 %v5152_v51  ;;  %1309 = vmatpush.bf16.msrb.mxu3 %v5176_v3 }
  0x9a   : > { %1055 = vmatpush.bf16.msra.mxu0 %v5151_v52 }
  0x9b   : > { %986 = vmatmul.bf16.gmra.mxu1 %v4258_v43 }
  0x9e   : > { %1056 = vmatpush.bf16.msra.mxu0 %v5150_v53 }
  0xa2   : > { %1057 = vmatpush.bf16.msra.mxu0 %v5149_v54  ;;  %v5123_v54 = vld [vmem:[%s5906_s16 + $0x1b4] sm:$0xf] }
  0xa3   : > { %v4262_v57 = vor.u32 %v5123_v54, %v4259_v56 }
  0xa5   : > { %774 = vmatmul.bf16.gmra.mxu3 %v4198_v39 }
  0xab   : > { %991 = vmatmul.bf16.gmra.mxu1 %v4262_v57 }
  0xb5   : > { %779 = vmatmul.bf16.gmra.mxu3 %v4202_v47 }
  0xe2   : > { %v745_v58 = vpop.f32.mrf.mxu0 }
  0xe3   : > { %v746_v60 = vadd.f32 %v5949_v59, %v745_v58 }
  0xe5   : > { %v801_v63 = vmul.f32 0.2, %v746_v60  ;;  %vm785_vm0 = vcmp.gt.f32.partialorder %v746_v60, 0.0 }
  0xe7   : > { %v817_v6 = vsel %vm785_vm0, %v746_v60, %v801_v63 }
  0xe8   : > { %v755_v61 = vpop.f32.mrf.mxu3 }
  0xe9   : > { %v756_v0 = vadd.f32 %v5949_v59, %v755_v61 }
  0xea   : > { %v747_v62 = vpop.f32.mrf.mxu0 }
  0xeb   : > { %v748_v1 = vadd.f32 %v5949_v59, %v747_v62  ;;  %v805_v7 = vmul.f32 0.2, %v756_v0  ;;  %vm789_vm2 = vcmp.gt.f32.partialorder %v756_v0, 0.0 }
  0xed   : > { %vm786_vm1 = vcmp.gt.f32.partialorder %v748_v1, 0.0  ;;  %v802_v4 = vmul.f32 0.2, %v748_v1  ;;  %v821_v14 = vsel %vm789_vm2, %v756_v0, %v805_v7  ;;  %v5175_v7 = vld [vmem:[#allocation8 + $0x50] sm:$0xff] }
  0xee   : > { %1310 = vmatpush.bf16.msrb.mxu3 %v5175_v7 }
  0xef   : > { %v818_v8 = vsel %vm786_vm1, %v748_v1, %v802_v4  ;;  %v5132_v4 = vld [vmem:[%s5906_s16 + $0x1fc] sm:$0xf] }
  0xf0   : > { %v833_v9 = vpack.c.bf16 %v818_v8, %v817_v6  ;;  %v757_v10 = vpop.f32.mrf.mxu3  ;;  %v5172_v6 = vld [vmem:[#allocation7 + $0x78] sm:$0xff] }
  0xf1   : > { %v758_v11 = vadd.f32 %v5949_v59, %v757_v10  ;;  %1402 = vmatpush.bf16.msrb.mxu0 %v5172_v6  ;;  %v5171_v10 = vld [vmem:[#allocation7 + $0x70] sm:$0xff] }
  0xf2   : > { %v750_v12 = vpop.f32.mrf.mxu0  ;;  %1058 = vmatmul.bf16.vlgmr.msra.gmra.mxu0 %v833_v9  ;;  %v4266_v9 = vor.u32 %v5132_v4, %v4263_v5 }
  0xf3   : > { %v806_v13 = vmul.f32 0.2, %v758_v11  ;;  %vm790_vm3 = vcmp.gt.f32.partialorder %v758_v11, 0.0  ;;  %v751_v17 = vadd.f32 %v5949_v59, %v750_v12 }
  0xf4   : > { %996 = vmatmul.bf16.gmra.mxu1 %v4266_v9 }
  0xf5   : > { %v822_v15 = vsel %vm790_vm3, %v758_v11, %v806_v13  ;;  %v803_v20 = vmul.f32 0.2, %v751_v17  ;;  %vm787_vm4 = vcmp.gt.f32.partialorder %v751_v17, 0.0  ;;  %v5174_v11 = vld [vmem:[#allocation8 + $0x48] sm:$0xff]  ;;  %1403 = vmatpush.bf16.msrb.mxu0 %v5171_v10 }
  0xf6   : > { %v835_v16 = vpack.c.bf16 %v822_v15, %v821_v14  ;;  %v5170_v13 = vld [vmem:[#allocation7 + $0x68] sm:$0xff]  ;;  %1311 = vmatpush.bf16.msrb.mxu3 %v5174_v11 }
  0xf7   : > { %v819_v29 = vsel %vm787_vm4, %v751_v17, %v803_v20 }
  0xf8   : > { %v760_v18 = vpop.f32.mrf.mxu3  ;;  %1068 = vmatmul.bf16.vlgmr.msra.gmra.mxu2 %v835_v16 }
  0xf9   : > { %v761_v21 = vadd.f32 %v5949_v59, %v760_v18  ;;  %1404 = vmatpush.bf16.msrb.mxu0 %v5170_v13  ;;  %v5169_v18 = vld [vmem:[#allocation7 + $0x60] sm:$0xff] }
  0xfa   : > { %v752_v19 = vpop.f32.mrf.mxu0 }
  0xfb   : > { %v753_v22 = vadd.f32 %v5949_v59, %v752_v19  ;;  %v807_v28 = vmul.f32 0.2, %v761_v21  ;;  %vm791_vm6 = vcmp.gt.f32.partialorder %v761_v21, 0.0 }
  0xfd   : > { %v804_v26 = vmul.f32 0.2, %v753_v22  ;;  %vm788_vm5 = vcmp.gt.f32.partialorder %v753_v22, 0.0  ;;  %v823_v35 = vsel %vm791_vm6, %v761_v21, %v807_v28  ;;  %1405 = vmatpush.bf16.msrb.mxu0 %v5169_v18 }
  0xff   : > { %v820_v30 = vsel %vm788_vm5, %v753_v22, %v804_v26 }
 0x100   : > { %v762_v31 = vpop.f32.mrf.mxu3  ;;  %v834_v32 = vpack.c.bf16 %v820_v30, %v819_v29 }
 0x101   : > { %v763_v33 = vadd.f32 %v5949_v59, %v762_v31  ;;  %v5173_v31 = vld [vmem:[#allocation8 + $0x40] sm:$0xff] }
 0x102   : > { %1063 = vmatmul.bf16.gmra.mxu0 %v834_v32  ;;  %v962_v30 = vpop.f32.mrf.mxu0  ;;  %1312 = vmatpush.bf16.msrb.mxu3 %v5173_v31  ;;  %v5168_v32 = vld [vmem:[#allocation7 + $0x58] sm:$0xff] }
 0x103   : > { %v808_v34 = vmul.f32 0.2, %v763_v33  ;;  %vm792_vm7 = vcmp.gt.f32.partialorder %v763_v33, 0.0  ;;  %1406 = vmatpush.bf16.msrb.mxu0 %v5168_v32 }
 0x105   : > { %v824_v37 = vsel %vm792_vm7, %v763_v33, %v808_v34  ;;  %v4333_v33 = vld [vmem:[%s5906_s16 + $0x8] sm:$0xf]  ;;  %v5074_v34 = vld [vmem:[%s5906_s16 + $0x28] sm:$0xf0] }
 0x106   : > { %v836_v38 = vpack.c.bf16 %v824_v37, %v823_v35  ;;  %v4334_v35 = vor.u32 %v5074_v34, %v4333_v33  ;;  %v5166_v37 = vld [vmem:[#allocation7 + $0x48] sm:$0xff] }
 0x108   : > { %v765_v39 = vpop.f32.mrf.mxu3  ;;  %1073 = vmatmul.bf16.gmra.mxu2 %v836_v38  ;;  %1313 = vmatmul.bf16.vlgmr.msrb.gmra.mxu3 %v4334_v35  ;;  %v5165_v38 = vld [vmem:[#allocation7 + $0x40] sm:$0xff] }
 0x109   : > { %v766_v40 = vadd.f32 %v5949_v59, %v765_v39 }
 0x10a   : > { %v964_v36 = vpop.f32.mrf.mxu0 }
 0x10b   : > { %v809_v44 = vmul.f32 0.2, %v766_v40  ;;  %vm793_vm8 = vcmp.gt.f32.partialorder %v766_v40, 0.0 }
 0x10d   : > { %v825_v48 = vsel %vm793_vm8, %v766_v40, %v809_v44  ;;  %v4337_v40 = vld [vmem:[%s5906_s16 + $0x50] sm:$0xf] }
 0x10e   : > { %v4338_v42 = vor.u32 %v5083_v41, %v4337_v40 }
 0x110   : > { %v767_v45 = vpop.f32.mrf.mxu3 }
 0x111   : > { %v768_v46 = vadd.f32 %v5949_v59, %v767_v45  ;;  %v972_v45 = vpop.f32.mrf.mxu1 }
 0x112   : > { %v967_v39 = vpop.f32.mrf.mxu0 }
 0x113   : > { %v810_v47 = vmul.f32 0.2, %v768_v46  ;;  %vm794_vm9 = vcmp.gt.f32.partialorder %v768_v46, 0.0 }
 0x115   : > { %v826_v50 = vsel %vm794_vm9, %v768_v46, %v810_v47  ;;  %v4341_v46 = vld [vmem:[%s5906_s16 + $0x98] sm:$0xf]  ;;  %v5092_v47 = vld [vmem:[%s5906_s16 + $0xb8] sm:$0xf0] }
 0x116   : > { %v837_v51 = vpack.c.bf16 %v826_v50, %v825_v48  ;;  %v4342_v48 = vor.u32 %v5092_v47, %v4341_v46  ;;  %v5983_v50 = vld [vmem:[#allocation10] ss:$0 sm:$0xff]  ;;  %v5186_v46 = vld [vmem:[#allocation7 + $0xa8] sm:$0xff] }
 0x118   : > { %v770_v52 = vpop.f32.mrf.mxu3  ;;  %1078 = vmatmul.bf16.gmra.mxu2 %v837_v51  ;;  %1318 = vmatmul.bf16.gmra.mxu3 %v4338_v42 }
 0x119   : > { %v771_v53 = vadd.f32 %v5949_v59, %v770_v52  ;;  %v974_v54 = vpop.f32.mrf.mxu1 }
 0x11a   : > { %v969_v43 = vpop.f32.mrf.mxu0 }
 0x11b   : > { %v811_v58 = vmul.f32 0.2, %v771_v53  ;;  %vm795_vm10 = vcmp.gt.f32.partialorder %v771_v53, 0.0 }
 0x11d   : > { %v827_v63 = vsel %vm795_vm10, %v771_v53, %v811_v58 }
 0x120   : > { %v772_v60 = vpop.f32.mrf.mxu3 }
 0x121   : > { %v773_v61 = vadd.f32 %v5949_v59, %v772_v60  ;;  %v977_v5 = vpop.f32.mrf.mxu1 }
 0x123   : > { %v812_v62 = vmul.f32 0.2, %v773_v61  ;;  %vm796_vm11 = vcmp.gt.f32.partialorder %v773_v61, 0.0 }
 0x125   : > { %v828_v0 = vsel %vm796_vm11, %v773_v61, %v812_v62 }
 0x126   : > { %v838_v1 = vpack.c.bf16 %v828_v0, %v827_v63  ;;  %v4345_v0 = vld [vmem:[%s5906_s16 + $0xe0] sm:$0xf] }
 0x128   : > { %v775_v2 = vpop.f32.mrf.mxu3  ;;  %1083 = vmatmul.bf16.gmra.mxu2 %v838_v1  ;;  %1323 = vmatmul.bf16.gmra.mxu3 %v4342_v48  ;;  %v5101_v1 = vld [vmem:[%s5906_s16 + $0x100] sm:$0xf0] }
 0x129   : > { %v776_v8 = vadd.f32 %v5949_v59, %v775_v2  ;;  %v4346_v3 = vor.u32 %v5101_v1, %v4345_v0  ;;  %v979_v13 = vpop.f32.mrf.mxu1 }
 0x12b   : > { %v813_v12 = vmul.f32 0.2, %v776_v8  ;;  %vm797_vm12 = vcmp.gt.f32.partialorder %v776_v8, 0.0 }
 0x12d   : > { %v829_v17 = vsel %vm797_vm12, %v776_v8, %v813_v12 }
 0x130   : > { %v777_v14 = vpop.f32.mrf.mxu3 }
 0x131   : > { %v778_v15 = vadd.f32 %v5949_v59, %v777_v14 }
 0x133   : > { %v814_v16 = vmul.f32 0.2, %v778_v15  ;;  %vm798_vm13 = vcmp.gt.f32.partialorder %v778_v15, 0.0 }
 0x135   : > { %v830_v19 = vsel %vm798_vm13, %v778_v15, %v814_v16  ;;  %v5188_v16 = vld [vmem:[#allocation7 + $0xb8] sm:$0xff] }
 0x136   : > { %v839_v20 = vpack.c.bf16 %v830_v19, %v829_v17  ;;  %1739 = vmatpush.bf16.msrb.mxu2 %v5188_v16 }
 0x138   : > { %v780_v21 = vpop.f32.mrf.mxu3  ;;  %1088 = vmatmul.bf16.gmra.mxu2 %v839_v20  ;;  %1328 = vmatmul.bf16.gmra.mxu3 %v4346_v3  ;;  %v4349_v20 = vld [vmem:[%s5906_s16 + $0x128] sm:$0xf]  ;;  %v5193_v3 = vld [vmem:[#allocation8 + $0xa0] sm:$0xff] }
 0x139   : > { %v781_v22 = vadd.f32 %v5949_v59, %v780_v21  ;;  %v5110_v21 = vld [vmem:[%s5906_s16 + $0x148] sm:$0xf0] }
 0x13b   : > { %v815_v23 = vmul.f32 0.2, %v781_v22  ;;  %vm799_vm14 = vcmp.gt.f32.partialorder %v781_v22, 0.0 }
 0x13d   : > { %v831_v27 = vsel %vm799_vm14, %v781_v22, %v815_v23  ;;  %v4350_v22 = vor.u32 %v5110_v21, %v4349_v20 }
 0x140   : > { %v782_v24 = vpop.f32.mrf.mxu3 }
 0x141   : > { %v783_v25 = vadd.f32 %v5949_v59, %v782_v24  ;;  %v5167_v59 = vld [vmem:[#allocation7 + $0x50] sm:$0xff] }
 0x142   : > { %1407 = vmatpush.bf16.msrb.mxu0 %v5167_v59  ;;  %v4353_v59 = vld [vmem:[%s5906_s16 + $0x170] sm:$0xf] }
 0x143   : > { %v816_v26 = vmul.f32 0.2, %v783_v25  ;;  %vm800_vm15 = vcmp.gt.f32.partialorder %v783_v25, 0.0 }
 0x145   : > { %v832_v28 = vsel %vm800_vm15, %v783_v25, %v816_v26  ;;  %v5196_v26 = vld [vmem:[#allocation8 + $0xb8] sm:$0xff] }
 0x146   : > { %v840_v29 = vpack.c.bf16 %v832_v28, %v831_v27  ;;  %1408 = vmatpush.bf16.msrb.mxu0 %v5166_v37  ;;  %v982_v27 = vpop.f32.mrf.mxu1  ;;  %1642 = vmatpush.bf16.msrb.mxu1 %v5196_v26 }
 0x148   : > { %1093 = vmatmul.bf16.gmra.mxu2 %v840_v29  ;;  %1333 = vmatmul.bf16.gmra.mxu3 %v4350_v22 }
 0x14a   : > { %1409 = vmatpush.bf16.msrb.mxu0 %v5165_v38  ;;  %v5195_v38 = vld [vmem:[#allocation8 + $0xb0] sm:$0xff] }
 0x14b   : > { %1643 = vmatpush.bf16.msrb.mxu1 %v5195_v38 }
 0x14e   : > { %v984_v37 = vpop.f32.mrf.mxu1 }
 0x156   : > { %v987_v47 = vpop.f32.mrf.mxu1 }
 0x16f   : > { %v1059_v44 = vpop.f32.mrf.mxu0 }
 0x170   : > { %v1060_v49 = vadd.f32 %v1059_v44, %v962_v30 }
 0x172   : > { %v1103_v51 = vadd.f32 %v5983_v50, %v1060_v49 }
 0x174   : > { %v1135_v55 = vmul.f32 0.2, %v1103_v51  ;;  %vm1119_vm0 = vcmp.gt.f32.partialorder %v1103_v51, 0.0 }
 0x176   : > { %v1151_v60 = vsel %vm1119_vm0, %v1103_v51, %v1135_v55  ;;  %v5194_v55 = vld [vmem:[#allocation8 + $0xa8] sm:$0xff] }
 0x177   : > { %v1061_v52 = vpop.f32.mrf.mxu0  ;;  %1644 = vmatpush.bf16.msrb.mxu1 %v5194_v55 }
 0x178   : > { %v1062_v53 = vadd.f32 %v1061_v52, %v964_v36  ;;  %v5187_v36 = vld [vmem:[#allocation7 + $0xb0] sm:$0xff] }
 0x179   : > { %1740 = vmatpush.bf16.msrb.mxu2 %v5187_v36 }
 0x17a   : > { %v1104_v56 = vadd.f32 %v5983_v50, %v1062_v53 }
 0x17b   : > { %v1069_v57 = vpop.f32.mrf.mxu2  ;;  %1645 = vmatpush.bf16.msrb.mxu1 %v5193_v3  ;;  %v5204_v3 = vld [vmem:[#allocation7 + $0xf8] sm:$0xff] }
 0x17c   : > { %vm1120_vm1 = vcmp.gt.f32.partialorder %v1104_v56, 0.0  ;;  %v1136_v58 = vmul.f32 0.2, %v1104_v56  ;;  %v1070_v18 = vadd.f32 %v1069_v57, %v972_v45  ;;  %v5128_v57 = vld [vmem:[%s5906_s16 + $0x1d8] sm:$0xf0]  ;;  %2092 = vmatpush.bf16.msra.mxu0 %v5204_v3 }
 0x17d   : > { %1741 = vmatpush.bf16.msrb.mxu2 %v5186_v46 }
 0x17e   : > { %v1152_v61 = vsel %vm1120_vm1, %v1104_v56, %v1136_v58  ;;  %v1107_v24 = vadd.f32 %v5983_v50, %v1070_v18  ;;  %v4357_v56 = vld [vmem:[%s5906_s16 + $0x1b8] sm:$0xf] }
 0x17f   : > { %v1064_v62 = vpop.f32.mrf.mxu0  ;;  %v1167_v63 = vpack.c.bf16 %v1152_v61, %v1151_v60  ;;  %v4358_v58 = vor.u32 %v5128_v57, %v4357_v56 }
 0x180   : > { %v1065_v2 = vadd.f32 %v1064_v62, %v967_v39  ;;  %v1139_v28 = vmul.f32 0.2, %v1107_v24  ;;  %vm1123_vm4 = vcmp.gt.f32.partialorder %v1107_v24, 0.0  ;;  %v5119_v39 = vld [vmem:[%s5906_s16 + $0x190] sm:$0xf0]  ;;  %v989_v62 = vpop.f32.mrf.mxu1 }
 0x181   : > { %1410 = vmatmul.bf16.vlgmr.msrb.gmra.mxu0 %v1167_v63  ;;  %v4354_v40 = vor.u32 %v5119_v39, %v4353_v59 }
 0x182   : > { %v1105_v6 = vadd.f32 %v5983_v50, %v1065_v2  ;;  %v1155_v31 = vsel %vm1123_vm4, %v1107_v24, %v1139_v28  ;;  %v5185_v2 = vld [vmem:[#allocation7 + $0xa0] sm:$0xff]  ;;  %v5191_v28 = vld [vmem:[#allocation8 + $0x90] sm:$0xff] }
 0x183   : > { %v1071_v4 = vpop.f32.mrf.mxu2  ;;  %1338 = vmatmul.bf16.gmra.mxu3 %v4354_v40  ;;  %1742 = vmatpush.bf16.msrb.mxu2 %v5185_v2  ;;  %v5212_v2 = vld [vmem:[#allocation8 + $0xf8] sm:$0xff] }
 0x184   : > { %v1137_v10 = vmul.f32 0.2, %v1105_v6  ;;  %vm1121_vm2 = vcmp.gt.f32.partialorder %v1105_v6, 0.0  ;;  %v1072_v19 = vadd.f32 %v1071_v4, %v974_v54  ;;  %v5184_v4 = vld [vmem:[#allocation7 + $0x98] sm:$0xff]  ;;  %1995 = vmatpush.bf16.msra.mxu3 %v5212_v2 }
 0x185   : > { %v4447_v2 = vld [vmem:[%s5906_s16 + $0x194] sm:$0xf0] }
 0x186   : > { %v1153_v14 = vsel %vm1121_vm2, %v1105_v6, %v1137_v10  ;;  %v1108_v25 = vadd.f32 %v5983_v50, %v1072_v19 }
 0x187   : > { %v1066_v7 = vpop.f32.mrf.mxu0  ;;  %1743 = vmatpush.bf16.msrb.mxu2 %v5184_v4 }
 0x188   : > { %v1067_v8 = vadd.f32 %v1066_v7, %v969_v43  ;;  %v1140_v29 = vmul.f32 0.2, %v1108_v25  ;;  %vm1124_vm5 = vcmp.gt.f32.partialorder %v1108_v25, 0.0  ;;  %v992_v7 = vpop.f32.mrf.mxu1 }
 0x18a   : > { %v1106_v9 = vadd.f32 %v5983_v50, %v1067_v8  ;;  %v1156_v32 = vsel %vm1124_vm5, %v1108_v25, %v1140_v29  ;;  %v5182_v29 = vld [vmem:[#allocation7 + $0x88] sm:$0xff] }
 0x18b   : > { %v1074_v11 = vpop.f32.mrf.mxu2  ;;  %v1169_v33 = vpack.c.bf16 %v1156_v32, %v1155_v31 }
 0x18c   : > { %vm1122_vm3 = vcmp.gt.f32.partialorder %v1106_v9, 0.0  ;;  %v1138_v12 = vmul.f32 0.2, %v1106_v9  ;;  %v1075_v34 = vadd.f32 %v1074_v11, %v977_v5 }
 0x18e   : > { %v1154_v15 = vsel %vm1122_vm3, %v1106_v9, %v1138_v12  ;;  %v1109_v42 = vadd.f32 %v5983_v50, %v1075_v34  ;;  %v4361_v12 = vld [vmem:[%s5906_s16 + $0x200] sm:$0xf] }
 0x18f   : > { %v1168_v17 = vpack.c.bf16 %v1154_v15, %v1153_v14  ;;  %v5192_v14 = vld [vmem:[#allocation8 + $0x98] sm:$0xff]  ;;  %v5183_v15 = vld [vmem:[#allocation7 + $0x90] sm:$0xff] }
 0x190   : > { %v1141_v44 = vmul.f32 0.2, %v1109_v42  ;;  %vm1125_vm6 = vcmp.gt.f32.partialorder %v1109_v42, 0.0  ;;  %1646 = vmatpush.bf16.msrb.mxu1 %v5192_v14  ;;  %1744 = vmatpush.bf16.msrb.mxu2 %v5183_v15  ;;  %v994_v21 = vpop.f32.mrf.mxu1 }
 0x191   : > { %1415 = vmatmul.bf16.gmra.mxu0 %v1168_v17 }
 0x192   : > { %v1157_v49 = vsel %vm1125_vm6, %v1109_v42, %v1141_v44  ;;  %v1314_v42 = vpop.f32.mrf.mxu3  ;;  %v5181_v44 = vld [vmem:[#allocation7 + $0x80] sm:$0xff] }
 0x193   : > { %v1076_v23 = vpop.f32.mrf.mxu2  ;;  %1343 = vmatmul.bf16.gmra.mxu3 %v4358_v58  ;;  %v5079_v58 = vld [vmem:[%s5906_s16 + $0x54] sm:$0xf] }
 0x194   : > { %v1077_v35 = vadd.f32 %v1076_v23, %v979_v13  ;;  %v5137_v13 = vld [vmem:[%s5906_s16 + $0x220] sm:$0xf0]  ;;  %1647 = vmatpush.bf16.msrb.mxu1 %v5191_v28  ;;  %1745 = vmatpush.bf16.msrb.mxu2 %v5182_v29 }
 0x195   : > { %v4362_v16 = vor.u32 %v5137_v13, %v4361_v12  ;;  %v4435_v12 = vld [vmem:[%s5906_s16 + $0xbc] sm:$0xf0]  ;;  %v5097_v28 = vld [vmem:[%s5906_s16 + $0xe4] sm:$0xf] }
 0x196   : > { %v1110_v43 = vadd.f32 %v5983_v50, %v1077_v35 }
 0x198   : > { %v1142_v45 = vmul.f32 0.2, %v1110_v43  ;;  %vm1126_vm7 = vcmp.gt.f32.partialorder %v1110_v43, 0.0  ;;  %1746 = vmatpush.bf16.msrb.mxu2 %v5181_v44 }
 0x19a   : > { %v1158_v51 = vsel %vm1126_vm7, %v1110_v43, %v1142_v45  ;;  %v5190_v43 = vld [vmem:[#allocation8 + $0x88] sm:$0xff] }
 0x19b   : > { %v1079_v30 = vpop.f32.mrf.mxu2  ;;  %v1170_v52 = vpack.c.bf16 %v1158_v51, %v1157_v49  ;;  %1648 = vmatpush.bf16.msrb.mxu1 %v5190_v43  ;;  %v5189_v49 = vld [vmem:[#allocation8 + $0x80] sm:$0xff]  ;;  %v1316_v51 = vpop.f32.mrf.mxu3 }
 0x19c   : > { %v1080_v53 = vadd.f32 %v1079_v30, %v982_v27  ;;  %v997_v30 = vpop.f32.mrf.mxu1 }
 0x19e   : > { %v1111_v60 = vadd.f32 %v5983_v50, %v1080_v53  ;;  %v4427_v53 = vld [vmem:[%s5906_s16 + $0x2c] sm:$0xf0] }
 0x19f   : > { %1649 = vmatpush.bf16.msrb.mxu1 %v5189_v49 }
 0x1a0   : > { %v1143_v0 = vmul.f32 0.2, %v1111_v60  ;;  %vm1127_vm8 = vcmp.gt.f32.partialorder %v1111_v60, 0.0 }
 0x1a1   : > { %1420 = vmatmul.bf16.gmra.mxu0 %v1169_v33 }
 0x1a2   : > { %v1159_v5 = vsel %vm1127_vm8, %v1111_v60, %v1143_v0  ;;  %v4431_v60 = vld [vmem:[%s5906_s16 + $0x74] sm:$0xf0] }
 0x1a3   : > { %v1081_v41 = vpop.f32.mrf.mxu2  ;;  %1348 = vmatmul.bf16.gmra.mxu3 %v4362_v16 }
 0x1a4   : > { %v1082_v54 = vadd.f32 %v1081_v41, %v984_v37  ;;  %v999_v37 = vpop.f32.mrf.mxu1 }
 0x1a6   : > { %v1112_v61 = vadd.f32 %v5983_v50, %v1082_v54 }
 0x1a8   : > { %v1144_v1 = vmul.f32 0.2, %v1112_v61  ;;  %vm1128_vm9 = vcmp.gt.f32.partialorder %v1112_v61, 0.0 }
 0x1aa   : > { %v1160_v6 = vsel %vm1128_vm9, %v1112_v61, %v1144_v1  ;;  %v4434_v61 = vor.u32 %v5079_v58, %v4431_v60  ;;  %v6015_v1 = vld [vmem:[#allocation10 + $0x1] ss:$0 sm:$0xff] }
 0x1ab   : > { %v1084_v48 = vpop.f32.mrf.mxu2  ;;  %v1171_v9 = vpack.c.bf16 %v1160_v6, %v1159_v5 }
 0x1ac   : > { %v1085_v10 = vadd.f32 %v1084_v48, %v987_v47 }
 0x1ae   : > { %v1113_v17 = vadd.f32 %v5983_v50, %v1085_v10 }
 0x1b0   : > { %v1145_v19 = vmul.f32 0.2, %v1113_v17  ;;  %vm1129_vm10 = vcmp.gt.f32.partialorder %v1113_v17, 0.0 }
 0x1b1   : > { %1425 = vmatmul.bf16.gmra.mxu0 %v1170_v52  ;;  %v5070_v52 = vld [vmem:[%s5906_s16 + $0xc] sm:$0xf] }
 0x1b2   : > { %v1161_v23 = vsel %vm1129_vm10, %v1113_v17, %v1145_v19  ;;  %v4430_v56 = vor.u32 %v5070_v52, %v4427_v53  ;;  %v5211_v19 = vld [vmem:[#allocation8 + $0xf0] sm:$0xff] }
 0x1b3   : > { %v1086_v63 = vpop.f32.mrf.mxu2  ;;  %1996 = vmatpush.bf16.msra.mxu3 %v5211_v19  ;;  %v4451_v19 = vld [vmem:[%s5906_s16 + $0x1dc] sm:$0xf0] }
 0x1b4   : > { %v1087_v11 = vadd.f32 %v1086_v63, %v989_v62  ;;  %1650 = vmatmul.bf16.vlgmr.msrb.gmra.mxu1 %v4430_v56  ;;  %v5201_v56 = vld [vmem:[#allocation7 + $0xe0] sm:$0xff] }
 0x1b6   : > { %v1114_v18 = vadd.f32 %v5983_v50, %v1087_v11  ;;  %v5088_v11 = vld [vmem:[%s5906_s16 + $0x9c] sm:$0xf] }
 0x1b7   : > { %v4438_v15 = vor.u32 %v5088_v11, %v4435_v12 }
 0x1b8   : > { %v1146_v20 = vmul.f32 0.2, %v1114_v18  ;;  %vm1130_vm11 = vcmp.gt.f32.partialorder %v1114_v18, 0.0 }
 0x1ba   : > { %v1162_v24 = vsel %vm1130_vm11, %v1114_v18, %v1146_v20  ;;  %v5203_v20 = vld [vmem:[#allocation7 + $0xf0] sm:$0xff] }
 0x1bb   : > { %v1089_v8 = vpop.f32.mrf.mxu2  ;;  %v1172_v25 = vpack.c.bf16 %v1162_v24, %v1161_v23  ;;  %2093 = vmatpush.bf16.msra.mxu0 %v5203_v20 }
 0x1bc   : > { %v1090_v26 = vadd.f32 %v1089_v8, %v992_v7 }
 0x1be   : > { %v1115_v32 = vadd.f32 %v5983_v50, %v1090_v26 }
 0x1c0   : > { %v1147_v34 = vmul.f32 0.2, %v1115_v32  ;;  %vm1131_vm12 = vcmp.gt.f32.partialorder %v1115_v32, 0.0 }
 0x1c1   : > { %1430 = vmatmul.bf16.gmra.mxu0 %v1171_v9 }
 0x1c2   : > { %v1163_v36 = vsel %vm1131_vm12, %v1115_v32, %v1147_v34 }
 0x1c3   : > { %v1091_v22 = vpop.f32.mrf.mxu2 }
 0x1c4   : > { %v1092_v27 = vadd.f32 %v1091_v22, %v994_v21  ;;  %1655 = vmatmul.bf16.gmra.mxu1 %v4434_v61 }
 0x1c6   : > { %v1116_v33 = vadd.f32 %v5983_v50, %v1092_v27 }
 0x1c8   : > { %v1148_v35 = vmul.f32 0.2, %v1116_v33  ;;  %vm1132_vm13 = vcmp.gt.f32.partialorder %v1116_v33, 0.0 }
 0x1ca   : > { %v1164_v59 = vsel %vm1132_vm13, %v1116_v33, %v1148_v35 }
 0x1cb   : > { %v1094_v31 = vpop.f32.mrf.mxu2  ;;  %v1173_v39 = vpack.c.bf16 %v1164_v59, %v1163_v36  ;;  %v5210_v59 = vld [vmem:[#allocation8 + $0xe8] sm:$0xff] }
 0x1cc   : > { %v1095_v40 = vadd.f32 %v1094_v31, %v997_v30  ;;  %v4439_v30 = vld [vmem:[%s5906_s16 + $0x104] sm:$0xf0]  ;;  %1997 = vmatpush.bf16.msra.mxu3 %v5210_v59 }
 0x1cd   : > { %v4442_v33 = vor.u32 %v5097_v28, %v4439_v30  ;;  %v5199_v28 = vld [vmem:[#allocation7 + $0xd0] sm:$0xff]  ;;  %v5206_v59 = vld [vmem:[#allocation8 + $0xc8] sm:$0xff] }
 0x1ce   : > { %v1117_v45 = vadd.f32 %v5983_v50, %v1095_v40 }
 0x1d0   : > { %v1149_v47 = vmul.f32 0.2, %v1117_v45  ;;  %vm1133_vm14 = vcmp.gt.f32.partialorder %v1117_v45, 0.0 }
 0x1d1   : > { %1435 = vmatmul.bf16.gmra.mxu0 %v1172_v25 }
 0x1d2   : > { %v1165_v54 = vsel %vm1133_vm14, %v1117_v45, %v1149_v47  ;;  %v5106_v45 = vld [vmem:[%s5906_s16 + $0x12c] sm:$0xf] }
 0x1d3   : > { %v1096_v38 = vpop.f32.mrf.mxu2 }
 0x1d4   : > { %v1097_v41 = vadd.f32 %v1096_v38, %v999_v37  ;;  %1660 = vmatmul.bf16.gmra.mxu1 %v4438_v15  ;;  %v5202_v37 = vld [vmem:[#allocation7 + $0xe8] sm:$0xff] }
 0x1d5   : > { %2094 = vmatpush.bf16.msra.mxu0 %v5202_v37  ;;  %v4455_v37 = vld [vmem:[%s5906_s16 + $0x224] sm:$0xf0] }
 0x1d6   : > { %v1118_v46 = vadd.f32 %v5983_v50, %v1097_v41  ;;  %v1319_v50 = vpop.f32.mrf.mxu3 }
 0x1d8   : > { %v1150_v48 = vmul.f32 0.2, %v1118_v46  ;;  %vm1134_vm15 = vcmp.gt.f32.partialorder %v1118_v46, 0.0 }
 0x1d9   : > { %2095 = vmatpush.bf16.msra.mxu0 %v5201_v56 }
 0x1da   : > { %v1166_v55 = vsel %vm1134_vm15, %v1118_v46, %v1150_v48  ;;  %v4443_v46 = vld [vmem:[%s5906_s16 + $0x14c] sm:$0xf0] }
 0x1db   : > { %v1174_v57 = vpack.c.bf16 %v1166_v55, %v1165_v54  ;;  %v4446_v49 = vor.u32 %v5106_v45, %v4443_v46  ;;  %v5209_v55 = vld [vmem:[#allocation8 + $0xe0] sm:$0xff] }
 0x1dc   : > { %1998 = vmatpush.bf16.msra.mxu3 %v5209_v55 }
 0x1de   : > { %v1321_v63 = vpop.f32.mrf.mxu3 }
 0x1e1   : > { %1440 = vmatmul.bf16.gmra.mxu0 %v1173_v39 }
 0x1e4   : > { %1665 = vmatmul.bf16.gmra.mxu1 %v4442_v33 }
 0x1e6   : > { %v1324_v7 = vpop.f32.mrf.mxu3 }
 0x1ee   : > { %v1326_v21 = vpop.f32.mrf.mxu3 }
 0x1f1   : > { %1445 = vmatmul.bf16.gmra.mxu0 %v1174_v57 }
 0x1f4   : > { %1670 = vmatmul.bf16.gmra.mxu1 %v4446_v49 }
 0x1f6   : > { %v1329_v29 = vpop.f32.mrf.mxu3 }
 0x1fe   : > { %v1411_v62 = vpop.f32.mrf.mxu0  ;;  %v1331_v40 = vpop.f32.mrf.mxu3 }
 0x1ff   : > { %v1412_v0 = vadd.f32 %v1411_v62, %v1314_v42 }
 0x201   : > { %v1456_v4 = vadd.f32 %v6015_v1, %v1412_v0  ;;  %v5115_v0 = vld [vmem:[%s5906_s16 + $0x174] sm:$0xf] }
 0x203   : > { %v1488_v8 = vmul.f32 0.2, %v1456_v4  ;;  %vm1472_vm0 = vcmp.gt.f32.partialorder %v1456_v4, 0.0 }
 0x205   : > { %v1504_v13 = vsel %vm1472_vm0, %v1456_v4, %v1488_v8 }
 0x206   : > { %v1413_v5 = vpop.f32.mrf.mxu0  ;;  %v1334_v53 = vpop.f32.mrf.mxu3 }
 0x207   : > { %v1414_v6 = vadd.f32 %v1413_v5, %v1316_v51  ;;  %v4450_v5 = vor.u32 %v5115_v0, %v4447_v2 }
 0x209   : > { %v1457_v9 = vadd.f32 %v6015_v1, %v1414_v6  ;;  %1675 = vmatmul.bf16.gmra.mxu1 %v4450_v5 }
 0x20b   : > { %v1489_v10 = vmul.f32 0.2, %v1457_v9  ;;  %vm1473_vm1 = vcmp.gt.f32.partialorder %v1457_v9, 0.0 }
 0x20d   : > { %v1505_v14 = vsel %vm1473_vm1, %v1457_v9, %v1489_v10  ;;  %v5208_v9 = vld [vmem:[#allocation8 + $0xd8] sm:$0xff] }
 0x20e   : > { %v1416_v16 = vpop.f32.mrf.mxu0  ;;  %v1520_v17 = vpack.c.bf16 %v1505_v14, %v1504_v13  ;;  %v1336_v62 = vpop.f32.mrf.mxu3  ;;  %v5200_v10 = vld [vmem:[#allocation7 + $0xd8] sm:$0xff]  ;;  %1999 = vmatpush.bf16.msra.mxu3 %v5208_v9 }
 0x20f   : > { %v1417_v18 = vadd.f32 %v1416_v16, %v1319_v50  ;;  %2096 = vmatpush.bf16.msra.mxu0 %v5200_v10 }
 0x210   : > { %1747 = vmatmul.bf16.vlgmr.msrb.gmra.mxu2 %v1520_v17 }
 0x211   : > { %v1458_v22 = vadd.f32 %v6015_v1, %v1417_v18  ;;  %v5124_v18 = vld [vmem:[%s5906_s16 + $0x1bc] sm:$0xf] }
 0x213   : > { %v1490_v26 = vmul.f32 0.2, %v1458_v22  ;;  %vm1474_vm2 = vcmp.gt.f32.partialorder %v1458_v22, 0.0  ;;  %2097 = vmatpush.bf16.msra.mxu0 %v5199_v28 }
 0x215   : > { %v1506_v31 = vsel %vm1474_vm2, %v1458_v22, %v1490_v26  ;;  %v4454_v22 = vor.u32 %v5124_v18, %v4451_v19  ;;  %v5093_v19 = vld [vmem:[%s5906_s16 + $0xc0] sm:$0xf0] }
 0x216   : > { %v1418_v23 = vpop.f32.mrf.mxu0  ;;  %v1339_v11 = vpop.f32.mrf.mxu3 }
 0x217   : > { %v1419_v24 = vadd.f32 %v1418_v23, %v1321_v63 }
 0x219   : > { %v1459_v25 = vadd.f32 %v6015_v1, %v1419_v24  ;;  %1680 = vmatmul.bf16.gmra.mxu1 %v4454_v22  ;;  %v6051_v22 = vld [vmem:[#allocation10 + $0x2] ss:$0 sm:$0xff] }
 0x21b   : > { %vm1475_vm3 = vcmp.gt.f32.partialorder %v1459_v25, 0.0  ;;  %v1491_v27 = vmul.f32 0.2, %v1459_v25 }
 0x21d   : > { %v1507_v32 = vsel %vm1475_vm3, %v1459_v25, %v1491_v27  ;;  %v5207_v27 = vld [vmem:[#allocation8 + $0xd0] sm:$0xff] }
 0x21e   : > { %v1421_v34 = vpop.f32.mrf.mxu0  ;;  %v1521_v35 = vpack.c.bf16 %v1507_v32, %v1506_v31  ;;  %v1341_v23 = vpop.f32.mrf.mxu3  ;;  %2000 = vmatpush.bf16.msra.mxu3 %v5207_v27 }
 0x21f   : > { %v1422_v36 = vadd.f32 %v1421_v34, %v1324_v7 }
 0x220   : > { %1752 = vmatmul.bf16.gmra.mxu2 %v1521_v35 }
 0x221   : > { %v1460_v38 = vadd.f32 %v6015_v1, %v1422_v36  ;;  %v5133_v36 = vld [vmem:[%s5906_s16 + $0x204] sm:$0xf] }
 0x222   : > { %2001 = vmatpush.bf16.msra.mxu3 %v5206_v59  ;;  %v5102_v59 = vld [vmem:[%s5906_s16 + $0x108] sm:$0xf0] }
 0x223   : > { %v1492_v43 = vmul.f32 0.2, %v1460_v38  ;;  %vm1476_vm4 = vcmp.gt.f32.partialorder %v1460_v38, 0.0 }
 0x225   : > { %v1508_v47 = vsel %vm1476_vm4, %v1460_v38, %v1492_v43  ;;  %v5198_v43 = vld [vmem:[#allocation7 + $0xc8] sm:$0xff] }
 0x226   : > { %v1423_v39 = vpop.f32.mrf.mxu0  ;;  %v1344_v32 = vpop.f32.mrf.mxu3  ;;  %2098 = vmatpush.bf16.msra.mxu0 %v5198_v43 }
 0x227   : > { %v1424_v41 = vadd.f32 %v1423_v39, %v1326_v21 }
 0x229   : > { %v1461_v42 = vadd.f32 %v6015_v1, %v1424_v41 }
 0x22b   : > { %vm1477_vm5 = vcmp.gt.f32.partialorder %v1461_v42, 0.0  ;;  %v1493_v44 = vmul.f32 0.2, %v1461_v42 }
 0x22d   : > { %v1509_v48 = vsel %vm1477_vm5, %v1461_v42, %v1493_v44  ;;  %v5205_v44 = vld [vmem:[#allocation8 + $0xc0] sm:$0xff] }
 0x22e   : > { %v1426_v51 = vpop.f32.mrf.mxu0  ;;  %v1522_v52 = vpack.c.bf16 %v1509_v48, %v1508_v47  ;;  %v1346_v46 = vpop.f32.mrf.mxu3  ;;  %2002 = vmatpush.bf16.msra.mxu3 %v5205_v44 }
 0x22f   : > { %v1427_v54 = vadd.f32 %v1426_v51, %v1329_v29 }
 0x230   : > { %1757 = vmatmul.bf16.gmra.mxu2 %v1522_v52 }
 0x231   : > { %v1462_v57 = vadd.f32 %v6015_v1, %v1427_v54 }
 0x233   : > { %v1494_v61 = vmul.f32 0.2, %v1462_v57  ;;  %vm1478_vm6 = vcmp.gt.f32.partialorder %v1462_v57, 0.0 }
 0x235   : > { %v1510_v3 = vsel %vm1478_vm6, %v1462_v57, %v1494_v61  ;;  %v5075_v61 = vld [vmem:[%s5906_s16 + $0x30] sm:$0xf0] }
 0x236   : > { %v1428_v50 = vpop.f32.mrf.mxu0  ;;  %v1349_v54 = vpop.f32.mrf.mxu3 }
 0x237   : > { %v1429_v58 = vadd.f32 %v1428_v50, %v1331_v40  ;;  %v4458_v40 = vor.u32 %v5133_v36, %v4455_v37  ;;  %v4537_v36 = vld [vmem:[%s5906_s16 + $0xe8] sm:$0xf] }
 0x238   : > { %v4538_v37 = vor.u32 %v5102_v59, %v4537_v36 }
 0x239   : > { %v1463_v60 = vadd.f32 %v6015_v1, %v1429_v58  ;;  %1685 = vmatmul.bf16.gmra.mxu1 %v4458_v40  ;;  %v5219_v40 = vld [vmem:[#allocation7 + $0x130] sm:$0xff] }
 0x23b   : > { %vm1479_vm7 = vcmp.gt.f32.partialorder %v1463_v60, 0.0  ;;  %v1495_v63 = vmul.f32 0.2, %v1463_v60 }
 0x23d   : > { %v1511_v4 = vsel %vm1479_vm7, %v1463_v60, %v1495_v63  ;;  %v4525_v60 = vld [vmem:[%s5906_s16 + $0x10] sm:$0xf]  ;;  %v1651_v63 = vpop.f32.mrf.mxu1 }
 0x23e   : > { %v1431_v6 = vpop.f32.mrf.mxu0  ;;  %v1523_v7 = vpack.c.bf16 %v1511_v4, %v1510_v3  ;;  %v4526_v0 = vor.u32 %v5075_v61, %v4525_v60  ;;  %v1351_v2 = vpop.f32.mrf.mxu3 }
 0x23f   : > { %v1432_v8 = vadd.f32 %v1431_v6, %v1334_v53 }
 0x240   : > { %1762 = vmatmul.bf16.gmra.mxu2 %v1523_v7  ;;  %2003 = vmatmul.bf16.vlgmr.msra.gmra.mxu3 %v4526_v0  ;;  %v5197_v7 = vld [vmem:[#allocation7 + $0xc0] sm:$0xff] }
 0x241   : > { %v1464_v12 = vadd.f32 %v6015_v1, %v1432_v8  ;;  %2099 = vmatpush.bf16.msra.mxu0 %v5197_v7 }
 0x243   : > { %v1496_v16 = vmul.f32 0.2, %v1464_v12  ;;  %vm1480_vm8 = vcmp.gt.f32.partialorder %v1464_v12, 0.0 }
 0x245   : > { %v1512_v20 = vsel %vm1480_vm8, %v1464_v12, %v1496_v16  ;;  %v1653_v12 = vpop.f32.mrf.mxu1 }
 0x246   : > { %v1433_v13 = vpop.f32.mrf.mxu0 }
 0x247   : > { %v1434_v14 = vadd.f32 %v1433_v13, %v1336_v62  ;;  %v4529_v13 = vld [vmem:[%s5906_s16 + $0x58] sm:$0xf] }
 0x249   : > { %v1465_v15 = vadd.f32 %v6015_v1, %v1434_v14  ;;  %v5084_v14 = vld [vmem:[%s5906_s16 + $0x78] sm:$0xf0] }
 0x24b   : > { %vm1481_vm9 = vcmp.gt.f32.partialorder %v1465_v15, 0.0  ;;  %v1497_v17 = vmul.f32 0.2, %v1465_v15 }
 0x24d   : > { %v1513_v21 = vsel %vm1481_vm9, %v1465_v15, %v1497_v17  ;;  %v4530_v15 = vor.u32 %v5084_v14, %v4529_v13  ;;  %v1656_v16 = vpop.f32.mrf.mxu1  ;;  %v5217_v13 = vld [vmem:[#allocation7 + $0x120] sm:$0xff] }
 0x24e   : > { %v1436_v24 = vpop.f32.mrf.mxu0  ;;  %v1524_v25 = vpack.c.bf16 %v1513_v21, %v1512_v20  ;;  %v5225_v14 = vld [vmem:[#allocation8 + $0x120] sm:$0xff] }
 0x24f   : > { %v1437_v26 = vadd.f32 %v1436_v24, %v1339_v11  ;;  %v5228_v24 = vld [vmem:[#allocation8 + $0x138] sm:$0xff] }
 0x250   : > { %1767 = vmatmul.bf16.gmra.mxu2 %v1524_v25  ;;  %2008 = vmatmul.bf16.gmra.mxu3 %v4530_v15 }
 0x251   : > { %v1466_v29 = vadd.f32 %v6015_v1, %v1437_v26  ;;  %2332 = vmatpush.bf16.msra.mxu1 %v5228_v24 }
 0x253   : > { %v1498_v34 = vmul.f32 0.2, %v1466_v29  ;;  %vm1482_vm10 = vcmp.gt.f32.partialorder %v1466_v29, 0.0 }
 0x255   : > { %v1514_v38 = vsel %vm1482_vm10, %v1466_v29, %v1498_v34  ;;  %v1658_v18 = vpop.f32.mrf.mxu1 }
 0x256   : > { %v1438_v30 = vpop.f32.mrf.mxu0 }
 0x257   : > { %v1439_v31 = vadd.f32 %v1438_v30, %v1341_v23  ;;  %v5220_v23 = vld [vmem:[#allocation7 + $0x138] sm:$0xff] }
 0x258   : > { %2429 = vmatpush.bf16.msra.mxu2 %v5220_v23 }
 0x259   : > { %v1467_v33 = vadd.f32 %v6015_v1, %v1439_v31 }
 0x25b   : > { %vm1483_vm11 = vcmp.gt.f32.partialorder %v1467_v33, 0.0  ;;  %v1499_v35 = vmul.f32 0.2, %v1467_v33 }
 0x25c   : > { %2430 = vmatpush.bf16.msra.mxu2 %v5219_v40 }
 0x25d   : > { %v1515_v39 = vsel %vm1483_vm11, %v1467_v33, %v1499_v35  ;;  %v1661_v28 = vpop.f32.mrf.mxu1 }
 0x25e   : > { %v1441_v41 = vpop.f32.mrf.mxu0  ;;  %v1525_v42 = vpack.c.bf16 %v1515_v39, %v1514_v38 }
 0x25f   : > { %v1442_v45 = vadd.f32 %v1441_v41, %v1344_v32  ;;  %v5227_v41 = vld [vmem:[#allocation8 + $0x130] sm:$0xff] }
 0x260   : > { %1772 = vmatmul.bf16.gmra.mxu2 %v1525_v42  ;;  %2333 = vmatpush.bf16.msra.mxu1 %v5227_v41 }
 0x261   : > { %v1468_v47 = vadd.f32 %v6015_v1, %v1442_v45 }
 0x263   : > { %v1500_v51 = vmul.f32 0.2, %v1468_v47  ;;  %vm1484_vm12 = vcmp.gt.f32.partialorder %v1468_v47, 0.0 }
 0x265   : > { %v1516_v55 = vsel %vm1484_vm12, %v1468_v47, %v1500_v51  ;;  %v1663_v39 = vpop.f32.mrf.mxu1 }
 0x266   : > { %v1443_v48 = vpop.f32.mrf.mxu0 }
 0x267   : > { %v1444_v49 = vadd.f32 %v1443_v48, %v1346_v46 }
 0x269   : > { %v1469_v52 = vadd.f32 %v6015_v1, %v1444_v49 }
 0x26b   : > { %v1501_v53 = vmul.f32 0.2, %v1469_v52  ;;  %vm1485_vm13 = vcmp.gt.f32.partialorder %v1469_v52, 0.0 }
 0x26d   : > { %v1517_v56 = vsel %vm1485_vm13, %v1469_v52, %v1501_v53  ;;  %v1666_v48 = vpop.f32.mrf.mxu1 }
 0x26e   : > { %v1446_v57 = vpop.f32.mrf.mxu0  ;;  %v1526_v50 = vpack.c.bf16 %v1517_v56, %v1516_v55  ;;  %v5111_v55 = vld [vmem:[%s5906_s16 + $0x150] sm:$0xf0] }
 0x26f   : > { %v1447_v58 = vadd.f32 %v1446_v57, %v1349_v54  ;;  %v4541_v54 = vld [vmem:[%s5906_s16 + $0x130] sm:$0xf] }
 0x270   : > { %1777 = vmatmul.bf16.gmra.mxu2 %v1526_v50  ;;  %v4542_v56 = vor.u32 %v5111_v55, %v4541_v54  ;;  %v5218_v50 = vld [vmem:[#allocation7 + $0x128] sm:$0xff] }
 0x271   : > { %v1470_v62 = vadd.f32 %v6015_v1, %v1447_v58  ;;  %v5226_v58 = vld [vmem:[#allocation8 + $0x128] sm:$0xff]  ;;  %2431 = vmatpush.bf16.msra.mxu2 %v5218_v50 }
 0x272   : > { %2334 = vmatpush.bf16.msra.mxu1 %v5226_v58 }
 0x273   : > { %v1502_v5 = vmul.f32 0.2, %v1470_v62  ;;  %vm1486_vm14 = vcmp.gt.f32.partialorder %v1470_v62, 0.0 }
 0x275   : > { %v1518_v9 = vsel %vm1486_vm14, %v1470_v62, %v1502_v5  ;;  %v1668_v62 = vpop.f32.mrf.mxu1  ;;  %2432 = vmatpush.bf16.msra.mxu2 %v5217_v13 }
 0x276   : > { %v1448_v3 = vpop.f32.mrf.mxu0  ;;  %2335 = vmatpush.bf16.msra.mxu1 %v5225_v14 }
 0x277   : > { %v1449_v4 = vadd.f32 %v1448_v3, %v1351_v2 }
 0x279   : > { %v1471_v6 = vadd.f32 %v6015_v1, %v1449_v4  ;;  %v4533_v1 = vld [vmem:[%s5906_s16 + $0xa0] sm:$0xf] }
 0x27a   : > { %v4534_v20 = vor.u32 %v5093_v19, %v4533_v1 }
 0x27b   : > { %v1503_v8 = vmul.f32 0.2, %v1471_v6  ;;  %vm1487_vm15 = vcmp.gt.f32.partialorder %v1471_v6, 0.0 }
 0x27c   : > { %2013 = vmatmul.bf16.gmra.mxu3 %v4534_v20 }
 0x27d   : > { %v1519_v10 = vsel %vm1487_vm15, %v1471_v6, %v1503_v8  ;;  %v4545_v8 = vld [vmem:[%s5906_s16 + $0x178] sm:$0xf] }
 0x27e   : > { %v1527_v11 = vpack.c.bf16 %v1519_v10, %v1518_v9  ;;  %v5120_v9 = vld [vmem:[%s5906_s16 + $0x198] sm:$0xf0]  ;;  %v1671_v10 = vpop.f32.mrf.mxu1 }
 0x280   : > { %1782 = vmatmul.bf16.gmra.mxu2 %v1527_v11  ;;  %v4546_v11 = vor.u32 %v5120_v9, %v4545_v8 }
 0x286   : > { %v1673_v19 = vpop.f32.mrf.mxu1 }
 0x28c   : > { %2018 = vmatmul.bf16.gmra.mxu3 %v4538_v37 }
 0x293   : > { %v1748_v17 = vpop.f32.mrf.mxu2 }
 0x294   : > { %v1749_v21 = vadd.f32 %v1748_v17, %v1651_v63 }
 0x296   : > { %v1793_v25 = vadd.f32 %v6051_v22, %v1749_v21 }
 0x298   : > { %v1825_v29 = vmul.f32 0.2, %v1793_v25  ;;  %vm1809_vm0 = vcmp.gt.f32.partialorder %v1793_v25, 0.0 }
 0x29a   : > { %v1841_v32 = vsel %vm1809_vm0, %v1793_v25, %v1825_v29 }
 0x29b   : > { %v1750_v26 = vpop.f32.mrf.mxu2 }
 0x29c   : > { %v1751_v27 = vadd.f32 %v1750_v26, %v1653_v12  ;;  %2023 = vmatmul.bf16.gmra.mxu3 %v4542_v56  ;;  %v4549_v26 = vld [vmem:[%s5906_s16 + $0x1c0] sm:$0xf] }
 0x29e   : > { %v1794_v30 = vadd.f32 %v6051_v22, %v1751_v27  ;;  %v5129_v27 = vld [vmem:[%s5906_s16 + $0x1e0] sm:$0xf0] }
 0x2a0   : > { %vm1810_vm1 = vcmp.gt.f32.partialorder %v1794_v30, 0.0  ;;  %v1826_v31 = vmul.f32 0.2, %v1794_v30 }
 0x2a2   : > { %v1842_v33 = vsel %vm1810_vm1, %v1794_v30, %v1826_v31  ;;  %v5216_v30 = vld [vmem:[#allocation7 + $0x118] sm:$0xff] }
 0x2a3   : > { %v1857_v34 = vpack.c.bf16 %v1842_v33, %v1841_v32  ;;  %v1753_v35 = vpop.f32.mrf.mxu2  ;;  %v5224_v31 = vld [vmem:[#allocation8 + $0x118] sm:$0xff]  ;;  %v1676_v32 = vpop.f32.mrf.mxu1  ;;  %2433 = vmatpush.bf16.msra.mxu2 %v5216_v30 }
 0x2a4   : > { %v1754_v38 = vadd.f32 %v1753_v35, %v1656_v16  ;;  %2336 = vmatpush.bf16.msra.mxu1 %v5224_v31 }
 0x2a5   : > { %2100 = vmatmul.bf16.vlgmr.msra.gmra.mxu0 %v1857_v34 }
 0x2a6   : > { %v1795_v42 = vadd.f32 %v6051_v22, %v1754_v38 }
 0x2a8   : > { %v1827_v45 = vmul.f32 0.2, %v1795_v42  ;;  %vm1811_vm2 = vcmp.gt.f32.partialorder %v1795_v42, 0.0 }
 0x2aa   : > { %v1843_v49 = vsel %vm1811_vm2, %v1795_v42, %v1827_v45 }
 0x2ab   : > { %v1755_v43 = vpop.f32.mrf.mxu2  ;;  %v1678_v40 = vpop.f32.mrf.mxu1 }
 0x2ac   : > { %v1756_v44 = vadd.f32 %v1755_v43, %v1658_v18  ;;  %2028 = vmatmul.bf16.gmra.mxu3 %v4546_v11  ;;  %v4553_v43 = vld [vmem:[%s5906_s16 + $0x208] sm:$0xf] }
 0x2ae   : > { %v1796_v46 = vadd.f32 %v6051_v22, %v1756_v44  ;;  %v5138_v44 = vld [vmem:[%s5906_s16 + $0x228] sm:$0xf0] }
 0x2af   : > { %v4554_v45 = vor.u32 %v5138_v44, %v4553_v43 }
 0x2b0   : > { %v1828_v47 = vmul.f32 0.2, %v1796_v46  ;;  %vm1812_vm3 = vcmp.gt.f32.partialorder %v1796_v46, 0.0 }
 0x2b2   : > { %v1844_v51 = vsel %vm1812_vm3, %v1796_v46, %v1828_v47  ;;  %v5215_v47 = vld [vmem:[#allocation7 + $0x110] sm:$0xff] }
 0x2b3   : > { %v1758_v52 = vpop.f32.mrf.mxu2  ;;  %v1858_v53 = vpack.c.bf16 %v1844_v51, %v1843_v49  ;;  %2434 = vmatpush.bf16.msra.mxu2 %v5215_v47  ;;  %v4627_v47 = vld [vmem:[%s5906_s16 + $0xc4] sm:$0xf0] }
 0x2b4   : > { %v1759_v57 = vadd.f32 %v1758_v52, %v1661_v28  ;;  %v4550_v28 = vor.u32 %v5129_v27, %v4549_v26 }
 0x2b5   : > { %2105 = vmatmul.bf16.gmra.mxu0 %v1858_v53  ;;  %v1681_v53 = vpop.f32.mrf.mxu1 }
 0x2b6   : > { %v1797_v60 = vadd.f32 %v6051_v22, %v1759_v57  ;;  %v5214_v57 = vld [vmem:[#allocation7 + $0x108] sm:$0xff] }
 0x2b7   : > { %2435 = vmatpush.bf16.msra.mxu2 %v5214_v57  ;;  %v5235_v57 = vld [vmem:[#allocation7 + $0x170] sm:$0xff] }
 0x2b8   : > { %v1829_v0 = vmul.f32 0.2, %v1797_v60  ;;  %vm1813_vm4 = vcmp.gt.f32.partialorder %v1797_v60, 0.0 }
 0x2ba   : > { %v1845_v4 = vsel %vm1813_vm4, %v1797_v60, %v1829_v0 }
 0x2bb   : > { %v1760_v61 = vpop.f32.mrf.mxu2 }
 0x2bc   : > { %v1761_v63 = vadd.f32 %v1760_v61, %v1663_v39  ;;  %2033 = vmatmul.bf16.gmra.mxu3 %v4550_v28 }
 0x2bd   : > { %v1683_v0 = vpop.f32.mrf.mxu1 }
 0x2be   : > { %v1798_v2 = vadd.f32 %v6051_v22, %v1761_v63 }
 0x2c0   : > { %v1830_v3 = vmul.f32 0.2, %v1798_v2  ;;  %vm1814_vm5 = vcmp.gt.f32.partialorder %v1798_v2, 0.0 }
 0x2c2   : > { %v1846_v5 = vsel %vm1814_vm5, %v1798_v2, %v1830_v3 }
 0x2c3   : > { %v1763_v6 = vpop.f32.mrf.mxu2  ;;  %v1859_v7 = vpack.c.bf16 %v1846_v5, %v1845_v4  ;;  %v2004_v13 = vpop.f32.mrf.mxu3 }
 0x2c4   : > { %v1764_v12 = vadd.f32 %v1763_v6, %v1666_v48  ;;  %v5223_v48 = vld [vmem:[#allocation8 + $0x110] sm:$0xff] }
 0x2c5   : > { %2110 = vmatmul.bf16.gmra.mxu0 %v1859_v7  ;;  %2337 = vmatpush.bf16.msra.mxu1 %v5223_v48  ;;  %v1686_v8 = vpop.f32.mrf.mxu1 }
 0x2c6   : > { %v1799_v15 = vadd.f32 %v6051_v22, %v1764_v12 }
 0x2c8   : > { %v1831_v18 = vmul.f32 0.2, %v1799_v15  ;;  %vm1815_vm6 = vcmp.gt.f32.partialorder %v1799_v15, 0.0 }
 0x2ca   : > { %v1847_v21 = vsel %vm1815_vm6, %v1799_v15, %v1831_v18  ;;  %v5213_v15 = vld [vmem:[#allocation7 + $0x100] sm:$0xff] }
 0x2cb   : > { %v1765_v16 = vpop.f32.mrf.mxu2  ;;  %2436 = vmatpush.bf16.msra.mxu2 %v5213_v15 }
 0x2cc   : > { %v1766_v17 = vadd.f32 %v1765_v16, %v1668_v62  ;;  %2038 = vmatmul.bf16.gmra.mxu3 %v4554_v45  ;;  %v5222_v62 = vld [vmem:[#allocation8 + $0x108] sm:$0xff] }
 0x2cd   : > { %2338 = vmatpush.bf16.msra.mxu1 %v5222_v62 }
 0x2ce   : > { %v1800_v1 = vadd.f32 %v6051_v22, %v1766_v17  ;;  %v1688_v17 = vpop.f32.mrf.mxu1 }
 0x2d0   : > { %v1832_v20 = vmul.f32 0.2, %v1800_v1  ;;  %vm1816_vm7 = vcmp.gt.f32.partialorder %v1800_v1, 0.0 }
 0x2d2   : > { %v1848_v23 = vsel %vm1816_vm7, %v1800_v1, %v1832_v20 }
 0x2d3   : > { %v1768_v24 = vpop.f32.mrf.mxu2  ;;  %v1860_v25 = vpack.c.bf16 %v1848_v23, %v1847_v21  ;;  %v2006_v23 = vpop.f32.mrf.mxu3 }
 0x2d4   : > { %v1769_v29 = vadd.f32 %v1768_v24, %v1671_v10  ;;  %v5071_v24 = vld [vmem:[%s5906_s16 + $0x14] sm:$0xf] }
 0x2d5   : > { %2115 = vmatmul.bf16.gmra.mxu0 %v1860_v25  ;;  %v4619_v25 = vld [vmem:[%s5906_s16 + $0x34] sm:$0xf0] }
 0x2d6   : > { %v1801_v33 = vadd.f32 %v6051_v22, %v1769_v29  ;;  %v4622_v27 = vor.u32 %v5071_v24, %v4619_v25 }
 0x2d8   : > { %v1833_v36 = vmul.f32 0.2, %v1801_v33  ;;  %vm1817_vm8 = vcmp.gt.f32.partialorder %v1801_v33, 0.0 }
 0x2da   : > { %v1849_v38 = vsel %vm1817_vm8, %v1801_v33, %v1833_v36  ;;  %v4623_v33 = vld [vmem:[%s5906_s16 + $0x7c] sm:$0xf0] }
 0x2db   : > { %v1770_v34 = vpop.f32.mrf.mxu2  ;;  %v2009_v31 = vpop.f32.mrf.mxu3 }
 0x2dc   : > { %v1771_v35 = vadd.f32 %v1770_v34, %v1673_v19  ;;  %v5221_v19 = vld [vmem:[#allocation8 + $0x100] sm:$0xff] }
 0x2dd   : > { %2339 = vmatpush.bf16.msra.mxu1 %v5221_v19  ;;  %v4635_v19 = vld [vmem:[%s5906_s16 + $0x154] sm:$0xf0] }
 0x2de   : > { %v1802_v59 = vadd.f32 %v6051_v22, %v1771_v35 }
 0x2e0   : > { %v1834_v37 = vmul.f32 0.2, %v1802_v59  ;;  %vm1818_vm9 = vcmp.gt.f32.partialorder %v1802_v59, 0.0  ;;  %2340 = vmatmul.bf16.vlgmr.msra.gmra.mxu1 %v4622_v27 }
 0x2e2   : > { %v1850_v39 = vsel %vm1818_vm9, %v1802_v59, %v1834_v37  ;;  %v6083_v59 = vld [vmem:[#allocation10 + $0x3] ss:$0 sm:$0xff]  ;;  %v5244_v37 = vld [vmem:[#allocation8 + $0x178] sm:$0xff] }
 0x2e3   : > { %v1773_v41 = vpop.f32.mrf.mxu2  ;;  %v1861_v42 = vpack.c.bf16 %v1850_v39, %v1849_v38  ;;  %v5236_v38 = vld [vmem:[#allocation7 + $0x178] sm:$0xff]  ;;  %2685 = vmatpush.bf16.msrb.mxu3 %v5244_v37  ;;  %v4639_v37 = vld [vmem:[%s5906_s16 + $0x19c] sm:$0xf0] }
 0x2e4   : > { %v1774_v46 = vadd.f32 %v1773_v41, %v1676_v32  ;;  %v5080_v32 = vld [vmem:[%s5906_s16 + $0x5c] sm:$0xf]  ;;  %2782 = vmatpush.bf16.msrb.mxu0 %v5236_v38 }
 0x2e5   : > { %2120 = vmatmul.bf16.gmra.mxu0 %v1861_v42  ;;  %v4626_v34 = vor.u32 %v5080_v32, %v4623_v33 }
 0x2e6   : > { %v1803_v49 = vadd.f32 %v6051_v22, %v1774_v46  ;;  %v5089_v46 = vld [vmem:[%s5906_s16 + $0xa4] sm:$0xf] }
 0x2e8   : > { %v1835_v54 = vmul.f32 0.2, %v1803_v49  ;;  %vm1819_vm10 = vcmp.gt.f32.partialorder %v1803_v49, 0.0  ;;  %2783 = vmatpush.bf16.msrb.mxu0 %v5235_v57 }
 0x2ea   : > { %v1851_v50 = vsel %vm1819_vm10, %v1803_v49, %v1835_v54 }
 0x2eb   : > { %v1775_v51 = vpop.f32.mrf.mxu2 }
 0x2ec   : > { %v1776_v52 = vadd.f32 %v1775_v51, %v1678_v40  ;;  %v4630_v51 = vor.u32 %v5089_v46, %v4627_v47 }
 0x2ee   : > { %v1804_v55 = vadd.f32 %v6051_v22, %v1776_v52 }
 0x2f0   : > { %v1836_v56 = vmul.f32 0.2, %v1804_v55  ;;  %vm1820_vm11 = vcmp.gt.f32.partialorder %v1804_v55, 0.0  ;;  %2345 = vmatmul.bf16.gmra.mxu1 %v4626_v34 }
 0x2f2   : > { %v1852_v58 = vsel %vm1820_vm11, %v1804_v55, %v1836_v56  ;;  %v5243_v56 = vld [vmem:[#allocation8 + $0x170] sm:$0xff] }
 0x2f3   : > { %v1778_v60 = vpop.f32.mrf.mxu2  ;;  %v1862_v61 = vpack.c.bf16 %v1852_v58, %v1851_v50  ;;  %2686 = vmatpush.bf16.msrb.mxu3 %v5243_v56 }
 0x2f4   : > { %v1779_v63 = vadd.f32 %v1778_v60, %v1681_v53 }
 0x2f5   : > { %2125 = vmatmul.bf16.gmra.mxu0 %v1862_v61 }
 0x2f6   : > { %v1805_v2 = vadd.f32 %v6051_v22, %v1779_v63 }
 0x2f8   : > { %v1837_v5 = vmul.f32 0.2, %v1805_v2  ;;  %vm1821_vm12 = vcmp.gt.f32.partialorder %v1805_v2, 0.0 }
 0x2fa   : > { %v1853_v9 = vsel %vm1821_vm12, %v1805_v2, %v1837_v5 }
 0x2fb   : > { %v1780_v3 = vpop.f32.mrf.mxu2 }
 0x2fc   : > { %v1781_v4 = vadd.f32 %v1780_v3, %v1683_v0  ;;  %v5098_v0 = vld [vmem:[%s5906_s16 + $0xec] sm:$0xf]  ;;  %v4631_v3 = vld [vmem:[%s5906_s16 + $0x10c] sm:$0xf0] }
 0x2fe   : > { %v1806_v6 = vadd.f32 %v6051_v22, %v1781_v4 }
 0x300   : > { %v1838_v7 = vmul.f32 0.2, %v1806_v6  ;;  %vm1822_vm13 = vcmp.gt.f32.partialorder %v1806_v6, 0.0  ;;  %2350 = vmatmul.bf16.gmra.mxu1 %v4630_v51 }
 0x302   : > { %v1854_v10 = vsel %vm1822_vm13, %v1806_v6, %v1838_v7  ;;  %v4634_v6 = vor.u32 %v5098_v0, %v4631_v3  ;;  %v5231_v0 = vld [vmem:[#allocation7 + $0x150] sm:$0xff] }
 0x303   : > { %v1783_v11 = vpop.f32.mrf.mxu2  ;;  %v1863_v12 = vpack.c.bf16 %v1854_v10, %v1853_v9  ;;  %v5242_v10 = vld [vmem:[#allocation8 + $0x168] sm:$0xff] }
 0x304   : > { %v1784_v14 = vadd.f32 %v1783_v11, %v1686_v8  ;;  %v5234_v11 = vld [vmem:[#allocation7 + $0x168] sm:$0xff]  ;;  %2687 = vmatpush.bf16.msrb.mxu3 %v5242_v10 }
 0x305   : > { %2130 = vmatmul.bf16.gmra.mxu0 %v1863_v12  ;;  %v5238_v10 = vld [vmem:[#allocation8 + $0x148] sm:$0xff] }
 0x306   : > { %v1807_v16 = vadd.f32 %v6051_v22, %v1784_v14  ;;  %2784 = vmatpush.bf16.msrb.mxu0 %v5234_v11  ;;  %v4647_v11 = vld [vmem:[%s5906_s16 + $0x22c] sm:$0xf0] }
 0x308   : > { %v1839_v20 = vmul.f32 0.2, %v1807_v16  ;;  %vm1823_vm14 = vcmp.gt.f32.partialorder %v1807_v16, 0.0 }
 0x30a   : > { %v1855_v28 = vsel %vm1823_vm14, %v1807_v16, %v1839_v20 }
 0x30b   : > { %v1785_v18 = vpop.f32.mrf.mxu2 }
 0x30c   : > { %v1786_v1 = vadd.f32 %v1785_v18, %v1688_v17 }
 0x30e   : > { %v1808_v21 = vadd.f32 %v6051_v22, %v1786_v1  ;;  %v2011_v22 = vpop.f32.mrf.mxu3  ;;  %v5107_v1 = vld [vmem:[%s5906_s16 + $0x134] sm:$0xf] }
 0x310   : > { %v1840_v26 = vmul.f32 0.2, %v1808_v21  ;;  %vm1824_vm15 = vcmp.gt.f32.partialorder %v1808_v21, 0.0  ;;  %2355 = vmatmul.bf16.gmra.mxu1 %v4634_v6 }
 0x312   : > { %v1856_v29 = vsel %vm1824_vm15, %v1808_v21, %v1840_v26 }
 0x313   : > { %v1864_v30 = vpack.c.bf16 %v1856_v29, %v1855_v28  ;;  %v5241_v28 = vld [vmem:[#allocation8 + $0x160] sm:$0xff] }
 0x314   : > { %v5233_v29 = vld [vmem:[#allocation7 + $0x160] sm:$0xff]  ;;  %2688 = vmatpush.bf16.msrb.mxu3 %v5241_v28 }
 0x315   : > { %2135 = vmatmul.bf16.gmra.mxu0 %v1864_v30 }
 0x316   : > { %v2014_v42 = vpop.f32.mrf.mxu3  ;;  %2785 = vmatpush.bf16.msrb.mxu0 %v5233_v29 }
 0x31e   : > { %v2016_v55 = vpop.f32.mrf.mxu3 }
 0x322   : > { %v2101_v35 = vpop.f32.mrf.mxu0 }
 0x323   : > { %v2102_v36 = vadd.f32 %v2101_v35, %v2004_v13 }
 0x325   : > { %v2146_v39 = vadd.f32 %v6083_v59, %v2102_v36  ;;  %v5116_v36 = vld [vmem:[%s5906_s16 + $0x17c] sm:$0xf] }
 0x326   : > { %v2019_v2 = vpop.f32.mrf.mxu3 }
 0x327   : > { %v2178_v43 = vmul.f32 0.2, %v2146_v39  ;;  %vm2162_vm0 = vcmp.gt.f32.partialorder %v2146_v39, 0.0 }
 0x329   : > { %v2194_v48 = vsel %vm2162_vm0, %v2146_v39, %v2178_v43 }
 0x32a   : > { %v2103_v40 = vpop.f32.mrf.mxu0 }
 0x32b   : > { %v2104_v41 = vadd.f32 %v2103_v40, %v2006_v23  ;;  %v4638_v23 = vor.u32 %v5107_v1, %v4635_v19  ;;  %v4642_v40 = vor.u32 %v5116_v36, %v4639_v37 }
 0x32d   : > { %v2147_v44 = vadd.f32 %v6083_v59, %v2104_v41  ;;  %2360 = vmatmul.bf16.gmra.mxu1 %v4638_v23 }
 0x32e   : > { %v2021_v14 = vpop.f32.mrf.mxu3 }
 0x32f   : > { %vm2163_vm1 = vcmp.gt.f32.partialorder %v2147_v44, 0.0  ;;  %v2179_v45 = vmul.f32 0.2, %v2147_v44 }
 0x331   : > { %v2195_v49 = vsel %vm2163_vm1, %v2147_v44, %v2179_v45  ;;  %v5240_v44 = vld [vmem:[#allocation8 + $0x158] sm:$0xff] }
 0x332   : > { %v2210_v52 = vpack.c.bf16 %v2195_v49, %v2194_v48  ;;  %v2106_v53 = vpop.f32.mrf.mxu0  ;;  %v5232_v45 = vld [vmem:[#allocation7 + $0x158] sm:$0xff]  ;;  %2689 = vmatpush.bf16.msrb.mxu3 %v5240_v44 }
 0x333   : > { %v2107_v54 = vadd.f32 %v2106_v53, %v2009_v31  ;;  %2786 = vmatpush.bf16.msrb.mxu0 %v5232_v45 }
 0x334   : > { %2437 = vmatmul.bf16.vlgmr.msra.gmra.mxu2 %v2210_v52 }
 0x335   : > { %v2148_v50 = vadd.f32 %v6083_v59, %v2107_v54  ;;  %v5125_v54 = vld [vmem:[%s5906_s16 + $0x1c4] sm:$0xf] }
 0x336   : > { %v2024_v26 = vpop.f32.mrf.mxu3 }
 0x337   : > { %v2180_v61 = vmul.f32 0.2, %v2148_v50  ;;  %vm2164_vm2 = vcmp.gt.f32.partialorder %v2148_v50, 0.0  ;;  %2787 = vmatpush.bf16.msrb.mxu0 %v5231_v0 }
 0x339   : > { %v2196_v4 = vsel %vm2164_vm2, %v2148_v50, %v2180_v61 }
 0x33a   : > { %v2108_v58 = vpop.f32.mrf.mxu0 }
 0x33b   : > { %v2109_v60 = vadd.f32 %v2108_v58, %v2011_v22 }
 0x33d   : > { %v2149_v62 = vadd.f32 %v6083_v59, %v2109_v60  ;;  %2365 = vmatmul.bf16.gmra.mxu1 %v4642_v40 }
 0x33e   : > { %v2026_v35 = vpop.f32.mrf.mxu3 }
 0x33f   : > { %v2181_v63 = vmul.f32 0.2, %v2149_v62  ;;  %vm2165_vm3 = vcmp.gt.f32.partialorder %v2149_v62, 0.0 }
 0x341   : > { %v2197_v5 = vsel %vm2165_vm3, %v2149_v62, %v2181_v63  ;;  %v5239_v63 = vld [vmem:[#allocation8 + $0x150] sm:$0xff] }
 0x342   : > { %v2111_v7 = vpop.f32.mrf.mxu0  ;;  %v2211_v8 = vpack.c.bf16 %v2197_v5, %v2196_v4  ;;  %2690 = vmatpush.bf16.msrb.mxu3 %v5239_v63 }
 0x343   : > { %v2112_v9 = vadd.f32 %v2111_v7, %v2014_v42 }
 0x344   : > { %2442 = vmatmul.bf16.gmra.mxu2 %v2211_v8 }
 0x345   : > { %v2150_v12 = vadd.f32 %v6083_v59, %v2112_v9  ;;  %v5134_v9 = vld [vmem:[%s5906_s16 + $0x20c] sm:$0xf] }
 0x346   : > { %v2029_v46 = vpop.f32.mrf.mxu3  ;;  %2691 = vmatpush.bf16.msrb.mxu3 %v5238_v10  ;;  %v5103_v10 = vld [vmem:[%s5906_s16 + $0x110] sm:$0xf0] }
 0x347   : > { %v2182_v16 = vmul.f32 0.2, %v2150_v12  ;;  %vm2166_vm4 = vcmp.gt.f32.partialorder %v2150_v12, 0.0 }
 0x349   : > { %v2198_v20 = vsel %vm2166_vm4, %v2150_v12, %v2182_v16 }
 0x34a   : > { %v2113_v13 = vpop.f32.mrf.mxu0 }
 0x34b   : > { %v2114_v15 = vadd.f32 %v2113_v13, %v2016_v55  ;;  %v4643_v55 = vld [vmem:[%s5906_s16 + $0x1e4] sm:$0xf0] }
 0x34c   : > { %v4646_v50 = vor.u32 %v5125_v54, %v4643_v55  ;;  %v5094_v55 = vld [vmem:[%s5906_s16 + $0xc8] sm:$0xf0] }
 0x34d   : > { %v2151_v17 = vadd.f32 %v6083_v59, %v2114_v15 }
 0x34e   : > { %v2031_v58 = vpop.f32.mrf.mxu3  ;;  %2370 = vmatmul.bf16.gmra.mxu1 %v4646_v50  ;;  %v6119_v50 = vld [vmem:[#allocation10 + $0x4] ss:$0 sm:$0xff] }
 0x34f   : > { %v2183_v18 = vmul.f32 0.2, %v2151_v17  ;;  %vm2167_vm5 = vcmp.gt.f32.partialorder %v2151_v17, 0.0 }
 0x351   : > { %v2199_v21 = vsel %vm2167_vm5, %v2151_v17, %v2183_v18  ;;  %v5230_v17 = vld [vmem:[#allocation7 + $0x148] sm:$0xff]  ;;  %v5237_v18 = vld [vmem:[#allocation8 + $0x140] sm:$0xff] }
 0x352   : > { %v2116_v24 = vpop.f32.mrf.mxu0  ;;  %v2212_v25 = vpack.c.bf16 %v2199_v21, %v2198_v20  ;;  %2788 = vmatpush.bf16.msrb.mxu0 %v5230_v17  ;;  %2692 = vmatpush.bf16.msrb.mxu3 %v5237_v18 }
 0x353   : > { %v2117_v27 = vadd.f32 %v2116_v24, %v2019_v2 }
 0x354   : > { %2447 = vmatmul.bf16.gmra.mxu2 %v2212_v25 }
 0x355   : > { %v2152_v30 = vadd.f32 %v6083_v59, %v2117_v27 }
 0x356   : > { %v2034_v5 = vpop.f32.mrf.mxu3 }
 0x357   : > { %v2184_v33 = vmul.f32 0.2, %v2152_v30  ;;  %vm2168_vm6 = vcmp.gt.f32.partialorder %v2152_v30, 0.0 }
 0x359   : > { %v2200_v38 = vsel %vm2168_vm6, %v2152_v30, %v2184_v33  ;;  %v4717_v33 = vld [vmem:[%s5906_s16 + $0x18] sm:$0xf] }
 0x35a   : > { %v2118_v31 = vpop.f32.mrf.mxu0 }
 0x35b   : > { %v2119_v32 = vadd.f32 %v2118_v31, %v2021_v14  ;;  %v4650_v14 = vor.u32 %v5134_v9, %v4647_v11  ;;  %v4729_v9 = vld [vmem:[%s5906_s16 + $0xf0] sm:$0xf] }
 0x35c   : > { %v4730_v11 = vor.u32 %v5103_v10, %v4729_v9 }
 0x35d   : > { %v2153_v34 = vadd.f32 %v6083_v59, %v2119_v32 }
 0x35e   : > { %2375 = vmatmul.bf16.gmra.mxu1 %v4650_v14  ;;  %v2036_v19 = vpop.f32.mrf.mxu3  ;;  %v5251_v14 = vld [vmem:[#allocation7 + $0x1b0] sm:$0xff] }
 0x35f   : > { %v2185_v22 = vmul.f32 0.2, %v2153_v34  ;;  %vm2169_vm7 = vcmp.gt.f32.partialorder %v2153_v34, 0.0 }
 0x361   : > { %v2201_v39 = vsel %vm2169_vm7, %v2153_v34, %v2185_v22  ;;  %v5076_v34 = vld [vmem:[%s5906_s16 + $0x38] sm:$0xf0]  ;;  %v2341_v22 = vpop.f32.mrf.mxu1 }
 0x362   : > { %v2121_v41 = vpop.f32.mrf.mxu0  ;;  %v2213_v42 = vpack.c.bf16 %v2201_v39, %v2200_v38  ;;  %v4718_v36 = vor.u32 %v5076_v34, %v4717_v33 }
 0x363   : > { %v2122_v43 = vadd.f32 %v2121_v41, %v2024_v26 }
 0x364   : > { %2452 = vmatmul.bf16.gmra.mxu2 %v2213_v42  ;;  %2693 = vmatmul.bf16.vlgmr.msrb.gmra.mxu3 %v4718_v36  ;;  %v5229_v42 = vld [vmem:[#allocation7 + $0x140] sm:$0xff] }
 0x365   : > { %v2154_v47 = vadd.f32 %v6083_v59, %v2122_v43  ;;  %2789 = vmatpush.bf16.msrb.mxu0 %v5229_v42 }
 0x366   : > { %v2039_v27 = vpop.f32.mrf.mxu3 }
 0x367   : > { %v2186_v51 = vmul.f32 0.2, %v2154_v47  ;;  %vm2170_vm8 = vcmp.gt.f32.partialorder %v2154_v47, 0.0 }
 0x369   : > { %v2202_v56 = vsel %vm2170_vm8, %v2154_v47, %v2186_v51  ;;  %v2343_v47 = vpop.f32.mrf.mxu1 }
 0x36a   : > { %v2123_v48 = vpop.f32.mrf.mxu0 }
 0x36b   : > { %v2124_v49 = vadd.f32 %v2123_v48, %v2026_v35  ;;  %v4721_v48 = vld [vmem:[%s5906_s16 + $0x60] sm:$0xf] }
 0x36d   : > { %v2155_v52 = vadd.f32 %v6083_v59, %v2124_v49  ;;  %v5085_v49 = vld [vmem:[%s5906_s16 + $0x80] sm:$0xf0] }
 0x36e   : > { %v2041_v37 = vpop.f32.mrf.mxu3  ;;  %v4722_v51 = vor.u32 %v5085_v49, %v4721_v48  ;;  %v5249_v48 = vld [vmem:[#allocation7 + $0x1a0] sm:$0xff] }
 0x36f   : > { %v2187_v53 = vmul.f32 0.2, %v2155_v52  ;;  %vm2171_vm9 = vcmp.gt.f32.partialorder %v2155_v52, 0.0  ;;  %v5257_v49 = vld [vmem:[#allocation8 + $0x1a0] sm:$0xff] }
 0x371   : > { %v2203_v57 = vsel %vm2171_vm9, %v2155_v52, %v2187_v53  ;;  %v2346_v52 = vpop.f32.mrf.mxu1 }
 0x372   : > { %v2126_v60 = vpop.f32.mrf.mxu0  ;;  %v2214_v61 = vpack.c.bf16 %v2203_v57, %v2202_v56 }
 0x373   : > { %v2127_v62 = vadd.f32 %v2126_v60, %v2029_v46  ;;  %v5260_v60 = vld [vmem:[#allocation8 + $0x1b8] sm:$0xff] }
 0x374   : > { %2457 = vmatmul.bf16.gmra.mxu2 %v2214_v61  ;;  %2698 = vmatmul.bf16.gmra.mxu3 %v4722_v51 }
 0x375   : > { %v2156_v2 = vadd.f32 %v6083_v59, %v2127_v62  ;;  %3022 = vmatpush.bf16.msrb.mxu1 %v5260_v60 }
 0x377   : > { %v2188_v6 = vmul.f32 0.2, %v2156_v2  ;;  %vm2172_vm10 = vcmp.gt.f32.partialorder %v2156_v2, 0.0 }
 0x379   : > { %v2204_v12 = vsel %vm2172_vm10, %v2156_v2, %v2188_v6  ;;  %v2348_v54 = vpop.f32.mrf.mxu1 }
 0x37a   : > { %v2128_v3 = vpop.f32.mrf.mxu0 }
 0x37b   : > { %v2129_v4 = vadd.f32 %v2128_v3, %v2031_v58  ;;  %v5252_v58 = vld [vmem:[#allocation7 + $0x1b8] sm:$0xff] }
 0x37c   : > { %3119 = vmatpush.bf16.msrb.mxu2 %v5252_v58 }
 0x37d   : > { %v2157_v7 = vadd.f32 %v6083_v59, %v2129_v4 }
 0x37f   : > { %v2189_v8 = vmul.f32 0.2, %v2157_v7  ;;  %vm2173_vm11 = vcmp.gt.f32.partialorder %v2157_v7, 0.0 }
 0x380   : > { %3120 = vmatpush.bf16.msrb.mxu2 %v5251_v14 }
 0x381   : > { %v2205_v13 = vsel %vm2173_vm11, %v2157_v7, %v2189_v8  ;;  %v2351_v0 = vpop.f32.mrf.mxu1 }
 0x382   : > { %v2131_v15 = vpop.f32.mrf.mxu0  ;;  %v2215_v16 = vpack.c.bf16 %v2205_v13, %v2204_v12 }
 0x383   : > { %v2132_v1 = vadd.f32 %v2131_v15, %v2034_v5  ;;  %v5259_v15 = vld [vmem:[#allocation8 + $0x1b0] sm:$0xff] }
 0x384   : > { %2462 = vmatmul.bf16.gmra.mxu2 %v2215_v16  ;;  %3023 = vmatpush.bf16.msrb.mxu1 %v5259_v15 }
 0x385   : > { %v2158_v20 = vadd.f32 %v6083_v59, %v2132_v1 }
 0x387   : > { %v2190_v24 = vmul.f32 0.2, %v2158_v20  ;;  %vm2174_vm12 = vcmp.gt.f32.partialorder %v2158_v20, 0.0 }
 0x389   : > { %v2206_v28 = vsel %vm2174_vm12, %v2158_v20, %v2190_v24  ;;  %v2353_v13 = vpop.f32.mrf.mxu1 }
 0x38a   : > { %v2133_v21 = vpop.f32.mrf.mxu0 }
 0x38b   : > { %v2134_v23 = vadd.f32 %v2133_v21, %v2036_v19 }
 0x38d   : > { %v2159_v25 = vadd.f32 %v6083_v59, %v2134_v23 }
 0x38f   : > { %v2191_v26 = vmul.f32 0.2, %v2159_v25  ;;  %vm2175_vm13 = vcmp.gt.f32.partialorder %v2159_v25, 0.0 }
 0x391   : > { %v2207_v29 = vsel %vm2175_vm13, %v2159_v25, %v2191_v26  ;;  %v2356_v21 = vpop.f32.mrf.mxu1 }
 0x392   : > { %v2136_v30 = vpop.f32.mrf.mxu0  ;;  %v2216_v31 = vpack.c.bf16 %v2207_v29, %v2206_v28  ;;  %v5112_v28 = vld [vmem:[%s5906_s16 + $0x158] sm:$0xf0] }
 0x393   : > { %v2137_v32 = vadd.f32 %v2136_v30, %v2039_v27  ;;  %v4733_v27 = vld [vmem:[%s5906_s16 + $0x138] sm:$0xf] }
 0x394   : > { %2467 = vmatmul.bf16.gmra.mxu2 %v2216_v31  ;;  %v4734_v29 = vor.u32 %v5112_v28, %v4733_v27  ;;  %v5250_v31 = vld [vmem:[#allocation7 + $0x1a8] sm:$0xff] }
 0x395   : > { %v2160_v35 = vadd.f32 %v6083_v59, %v2137_v32  ;;  %v5258_v32 = vld [vmem:[#allocation8 + $0x1a8] sm:$0xff]  ;;  %3121 = vmatpush.bf16.msrb.mxu2 %v5250_v31 }
 0x396   : > { %3024 = vmatpush.bf16.msrb.mxu1 %v5258_v32 }
 0x397   : > { %v2192_v40 = vmul.f32 0.2, %v2160_v35  ;;  %vm2176_vm14 = vcmp.gt.f32.partialorder %v2160_v35, 0.0 }
 0x399   : > { %v2208_v44 = vsel %vm2176_vm14, %v2160_v35, %v2192_v40  ;;  %v2358_v35 = vpop.f32.mrf.mxu1  ;;  %3122 = vmatpush.bf16.msrb.mxu2 %v5249_v48 }
 0x39a   : > { %v2138_v38 = vpop.f32.mrf.mxu0  ;;  %3025 = vmatpush.bf16.msrb.mxu1 %v5257_v49 }
 0x39b   : > { %v2139_v39 = vadd.f32 %v2138_v38, %v2041_v37 }
 0x39d   : > { %v2161_v41 = vadd.f32 %v6083_v59, %v2139_v39  ;;  %v4725_v59 = vld [vmem:[%s5906_s16 + $0xa8] sm:$0xf] }
 0x39e   : > { %v4726_v56 = vor.u32 %v5094_v55, %v4725_v59 }
 0x39f   : > { %v2193_v43 = vmul.f32 0.2, %v2161_v41  ;;  %vm2177_vm15 = vcmp.gt.f32.partialorder %v2161_v41, 0.0 }
 0x3a0   : > { %2703 = vmatmul.bf16.gmra.mxu3 %v4726_v56 }
 0x3a1   : > { %v2209_v45 = vsel %vm2177_vm15, %v2161_v41, %v2193_v43  ;;  %v4737_v43 = vld [vmem:[%s5906_s16 + $0x180] sm:$0xf] }
 0x3a2   : > { %v2217_v46 = vpack.c.bf16 %v2209_v45, %v2208_v44  ;;  %v5121_v44 = vld [vmem:[%s5906_s16 + $0x1a0] sm:$0xf0] }
 0x3a4   : > { %2472 = vmatmul.bf16.gmra.mxu2 %v2217_v46  ;;  %v4738_v46 = vor.u32 %v5121_v44, %v4737_v43 }
 0x3aa   : > { %v2361_v45 = vpop.f32.mrf.mxu1 }
 0x3b0   : > { %2708 = vmatmul.bf16.gmra.mxu3 %v4730_v11 }
 0x3b2   : > { %v2363_v55 = vpop.f32.mrf.mxu1 }
 0x3b7   : > { %v2438_v53 = vpop.f32.mrf.mxu2 }
 0x3b8   : > { %v2439_v57 = vadd.f32 %v2438_v53, %v2341_v22 }
 0x3ba   : > { %v2483_v61 = vadd.f32 %v6119_v50, %v2439_v57 }
 0x3bc   : > { %v2515_v2 = vmul.f32 0.2, %v2483_v61  ;;  %vm2499_vm0 = vcmp.gt.f32.partialorder %v2483_v61, 0.0 }
 0x3be   : > { %v2531_v5 = vsel %vm2499_vm0, %v2483_v61, %v2515_v2 }
 0x3bf   : > { %v2440_v62 = vpop.f32.mrf.mxu2 }
 0x3c0   : > { %v2441_v63 = vadd.f32 %v2440_v62, %v2343_v47  ;;  %2713 = vmatmul.bf16.gmra.mxu3 %v4734_v29  ;;  %v4741_v62 = vld [vmem:[%s5906_s16 + $0x1c8] sm:$0xf] }
 0x3c2   : > { %v2484_v3 = vadd.f32 %v6119_v50, %v2441_v63  ;;  %v5130_v63 = vld [vmem:[%s5906_s16 + $0x1e8] sm:$0xf0] }
 0x3c4   : > { %vm2500_vm1 = vcmp.gt.f32.partialorder %v2484_v3, 0.0  ;;  %v2516_v4 = vmul.f32 0.2, %v2484_v3 }
 0x3c6   : > { %v2532_v6 = vsel %vm2500_vm1, %v2484_v3, %v2516_v4  ;;  %v5248_v3 = vld [vmem:[#allocation7 + $0x198] sm:$0xff] }
 0x3c7   : > { %v2547_v7 = vpack.c.bf16 %v2532_v6, %v2531_v5  ;;  %v2443_v8 = vpop.f32.mrf.mxu2  ;;  %v5256_v4 = vld [vmem:[#allocation8 + $0x198] sm:$0xff]  ;;  %v2366_v5 = vpop.f32.mrf.mxu1  ;;  %3123 = vmatpush.bf16.msrb.mxu2 %v5248_v3 }
 0x3c8   : > { %v2444_v12 = vadd.f32 %v2443_v8, %v2346_v52  ;;  %3026 = vmatpush.bf16.msrb.mxu1 %v5256_v4 }
 0x3c9   : > { %2790 = vmatmul.bf16.vlgmr.msrb.gmra.mxu0 %v2547_v7 }
 0x3ca   : > { %v2485_v16 = vadd.f32 %v6119_v50, %v2444_v12 }
 0x3cc   : > { %v2517_v1 = vmul.f32 0.2, %v2485_v16  ;;  %vm2501_vm2 = vcmp.gt.f32.partialorder %v2485_v16, 0.0 }
 0x3ce   : > { %v2533_v23 = vsel %vm2501_vm2, %v2485_v16, %v2517_v1 }
 0x3cf   : > { %v2445_v17 = vpop.f32.mrf.mxu2  ;;  %v2368_v14 = vpop.f32.mrf.mxu1 }
 0x3d0   : > { %v2446_v18 = vadd.f32 %v2445_v17, %v2348_v54  ;;  %2718 = vmatmul.bf16.gmra.mxu3 %v4738_v46  ;;  %v4745_v17 = vld [vmem:[%s5906_s16 + $0x210] sm:$0xf] }
 0x3d2   : > { %v2486_v19 = vadd.f32 %v6119_v50, %v2446_v18  ;;  %v5139_v18 = vld [vmem:[%s5906_s16 + $0x230] sm:$0xf0] }
 0x3d3   : > { %v4746_v1 = vor.u32 %v5139_v18, %v4745_v17 }
 0x3d4   : > { %v2518_v20 = vmul.f32 0.2, %v2486_v19  ;;  %vm2502_vm3 = vcmp.gt.f32.partialorder %v2486_v19, 0.0 }
 0x3d6   : > { %v2534_v24 = vsel %vm2502_vm3, %v2486_v19, %v2518_v20  ;;  %v5247_v20 = vld [vmem:[#allocation7 + $0x190] sm:$0xff] }
 0x3d7   : > { %v2448_v25 = vpop.f32.mrf.mxu2  ;;  %v2548_v26 = vpack.c.bf16 %v2534_v24, %v2533_v23  ;;  %3124 = vmatpush.bf16.msrb.mxu2 %v5247_v20  ;;  %v4819_v20 = vld [vmem:[%s5906_s16 + $0xcc] sm:$0xf0] }
 0x3d8   : > { %v2449_v30 = vadd.f32 %v2448_v25, %v2351_v0  ;;  %v4742_v0 = vor.u32 %v5130_v63, %v4741_v62 }
 0x3d9   : > { %2795 = vmatmul.bf16.gmra.mxu0 %v2548_v26  ;;  %v2371_v26 = vpop.f32.mrf.mxu1 }
 0x3da   : > { %v2487_v33 = vadd.f32 %v6119_v50, %v2449_v30  ;;  %v5246_v30 = vld [vmem:[#allocation7 + $0x188] sm:$0xff] }
 0x3db   : > { %3125 = vmatpush.bf16.msrb.mxu2 %v5246_v30  ;;  %v5267_v30 = vld [vmem:[#allocation7 + $0x1f0] sm:$0xff] }
 0x3dc   : > { %v2519_v36 = vmul.f32 0.2, %v2487_v33  ;;  %vm2503_vm4 = vcmp.gt.f32.partialorder %v2487_v33, 0.0 }
 0x3de   : > { %v2535_v39 = vsel %vm2503_vm4, %v2487_v33, %v2519_v36 }
 0x3df   : > { %v2450_v34 = vpop.f32.mrf.mxu2 }
 0x3e0   : > { %v2451_v22 = vadd.f32 %v2450_v34, %v2353_v13  ;;  %2723 = vmatmul.bf16.gmra.mxu3 %v4742_v0 }
 0x3e1   : > { %v2373_v36 = vpop.f32.mrf.mxu1 }
 0x3e2   : > { %v2488_v37 = vadd.f32 %v6119_v50, %v2451_v22 }
 0x3e4   : > { %v2520_v38 = vmul.f32 0.2, %v2488_v37  ;;  %vm2504_vm5 = vcmp.gt.f32.partialorder %v2488_v37, 0.0 }
 0x3e6   : > { %v2536_v40 = vsel %vm2504_vm5, %v2488_v37, %v2520_v38 }
 0x3e7   : > { %v2453_v41 = vpop.f32.mrf.mxu2  ;;  %v2549_v42 = vpack.c.bf16 %v2536_v40, %v2535_v39  ;;  %v2694_v48 = vpop.f32.mrf.mxu3 }
 0x3e8   : > { %v2454_v47 = vadd.f32 %v2453_v41, %v2356_v21  ;;  %v5255_v21 = vld [vmem:[#allocation8 + $0x190] sm:$0xff] }
 0x3e9   : > { %2800 = vmatmul.bf16.gmra.mxu0 %v2549_v42  ;;  %3027 = vmatpush.bf16.msrb.mxu1 %v5255_v21  ;;  %v2376_v43 = vpop.f32.mrf.mxu1 }
 0x3ea   : > { %v2489_v51 = vadd.f32 %v6119_v50, %v2454_v47 }
 0x3ec   : > { %v2521_v54 = vmul.f32 0.2, %v2489_v51  ;;  %vm2505_vm6 = vcmp.gt.f32.partialorder %v2489_v51, 0.0 }
 0x3ee   : > { %v2537_v57 = vsel %vm2505_vm6, %v2489_v51, %v2521_v54  ;;  %v5245_v51 = vld [vmem:[#allocation7 + $0x180] sm:$0xff] }
 0x3ef   : > { %v2455_v52 = vpop.f32.mrf.mxu2  ;;  %3126 = vmatpush.bf16.msrb.mxu2 %v5245_v51 }
 0x3f0   : > { %v2456_v53 = vadd.f32 %v2455_v52, %v2358_v35  ;;  %2728 = vmatmul.bf16.gmra.mxu3 %v4746_v1  ;;  %v5254_v35 = vld [vmem:[#allocation8 + $0x188] sm:$0xff] }
 0x3f1   : > { %3028 = vmatpush.bf16.msrb.mxu1 %v5254_v35 }
 0x3f2   : > { %v2490_v59 = vadd.f32 %v6119_v50, %v2456_v53  ;;  %v2378_v53 = vpop.f32.mrf.mxu1 }
 0x3f4   : > { %v2522_v56 = vmul.f32 0.2, %v2490_v59  ;;  %vm2506_vm7 = vcmp.gt.f32.partialorder %v2490_v59, 0.0 }
 0x3f6   : > { %v2538_v58 = vsel %vm2506_vm7, %v2490_v59, %v2522_v56 }
 0x3f7   : > { %v2458_v60 = vpop.f32.mrf.mxu2  ;;  %v2550_v61 = vpack.c.bf16 %v2538_v58, %v2537_v57  ;;  %v2696_v58 = vpop.f32.mrf.mxu3 }
 0x3f8   : > { %v2459_v2 = vadd.f32 %v2458_v60, %v2361_v45  ;;  %v5072_v60 = vld [vmem:[%s5906_s16 + $0x1c] sm:$0xf] }
 0x3f9   : > { %2805 = vmatmul.bf16.gmra.mxu0 %v2550_v61  ;;  %v4811_v61 = vld [vmem:[%s5906_s16 + $0x3c] sm:$0xf0] }
 0x3fa   : > { %v2491_v6 = vadd.f32 %v6119_v50, %v2459_v2  ;;  %v4814_v63 = vor.u32 %v5072_v60, %v4811_v61 }
 0x3fc   : > { %v2523_v9 = vmul.f32 0.2, %v2491_v6  ;;  %vm2507_vm8 = vcmp.gt.f32.partialorder %v2491_v6, 0.0 }
 0x3fe   : > { %v2539_v12 = vsel %vm2507_vm8, %v2491_v6, %v2523_v9  ;;  %v4815_v6 = vld [vmem:[%s5906_s16 + $0x84] sm:$0xf0] }
 0x3ff   : > { %v2460_v7 = vpop.f32.mrf.mxu2  ;;  %v2699_v4 = vpop.f32.mrf.mxu3 }
 0x400   : > { %v2461_v8 = vadd.f32 %v2460_v7, %v2363_v55  ;;  %v5253_v55 = vld [vmem:[#allocation8 + $0x180] sm:$0xff] }
 0x401   : > { %3029 = vmatpush.bf16.msrb.mxu1 %v5253_v55  ;;  %v4827_v55 = vld [vmem:[%s5906_s16 + $0x15c] sm:$0xf0] }
 0x402   : > { %v2492_v10 = vadd.f32 %v6119_v50, %v2461_v8 }
 0x404   : > { %v2524_v11 = vmul.f32 0.2, %v2492_v10  ;;  %vm2508_vm9 = vcmp.gt.f32.partialorder %v2492_v10, 0.0  ;;  %3030 = vmatmul.bf16.vlgmr.msrb.gmra.mxu1 %v4814_v63 }
 0x406   : > { %v2540_v13 = vsel %vm2508_vm9, %v2492_v10, %v2524_v11  ;;  %v6151_v10 = vld [vmem:[#allocation10 + $0x5] ss:$0 sm:$0xff]  ;;  %v5276_v11 = vld [vmem:[#allocation8 + $0x1f8] sm:$0xff] }
 0x407   : > { %v2463_v15 = vpop.f32.mrf.mxu2  ;;  %v2551_v16 = vpack.c.bf16 %v2540_v13, %v2539_v12  ;;  %v5268_v12 = vld [vmem:[#allocation7 + $0x1f8] sm:$0xff]  ;;  %3375 = vmatpush.bf16.msra.mxu3 %v5276_v11  ;;  %v4831_v11 = vld [vmem:[%s5906_s16 + $0x1a4] sm:$0xf0] }
 0x408   : > { %v2464_v19 = vadd.f32 %v2463_v15, %v2366_v5  ;;  %v5081_v5 = vld [vmem:[%s5906_s16 + $0x64] sm:$0xf]  ;;  %3472 = vmatpush.bf16.msra.mxu0 %v5268_v12 }
 0x409   : > { %2810 = vmatmul.bf16.gmra.mxu0 %v2551_v16  ;;  %v4818_v7 = vor.u32 %v5081_v5, %v4815_v6 }
 0x40a   : > { %v2493_v23 = vadd.f32 %v6119_v50, %v2464_v19  ;;  %v5090_v19 = vld [vmem:[%s5906_s16 + $0xac] sm:$0xf] }
 0x40c   : > { %v2525_v27 = vmul.f32 0.2, %v2493_v23  ;;  %vm2509_vm10 = vcmp.gt.f32.partialorder %v2493_v23, 0.0  ;;  %3473 = vmatpush.bf16.msra.mxu0 %v5267_v30 }
 0x40e   : > { %v2541_v31 = vsel %vm2509_vm10, %v2493_v23, %v2525_v27 }
 0x40f   : > { %v2465_v24 = vpop.f32.mrf.mxu2 }
 0x410   : > { %v2466_v25 = vadd.f32 %v2465_v24, %v2368_v14  ;;  %v4822_v24 = vor.u32 %v5090_v19, %v4819_v20 }
 0x412   : > { %v2494_v28 = vadd.f32 %v6119_v50, %v2466_v25 }
 0x414   : > { %v2526_v29 = vmul.f32 0.2, %v2494_v28  ;;  %vm2510_vm11 = vcmp.gt.f32.partialorder %v2494_v28, 0.0  ;;  %3035 = vmatmul.bf16.gmra.mxu1 %v4818_v7 }
 0x416   : > { %v2542_v32 = vsel %vm2510_vm11, %v2494_v28, %v2526_v29  ;;  %v5275_v29 = vld [vmem:[#allocation8 + $0x1f0] sm:$0xff] }
 0x417   : > { %v2468_v33 = vpop.f32.mrf.mxu2  ;;  %v2552_v34 = vpack.c.bf16 %v2542_v32, %v2541_v31  ;;  %3376 = vmatpush.bf16.msra.mxu3 %v5275_v29 }
 0x418   : > { %v2469_v22 = vadd.f32 %v2468_v33, %v2371_v26 }
 0x419   : > { %2815 = vmatmul.bf16.gmra.mxu0 %v2552_v34 }
 0x41a   : > { %v2495_v37 = vadd.f32 %v6119_v50, %v2469_v22 }
 0x41c   : > { %v2527_v40 = vmul.f32 0.2, %v2495_v37  ;;  %vm2511_vm12 = vcmp.gt.f32.partialorder %v2495_v37, 0.0 }
 0x41e   : > { %v2543_v44 = vsel %vm2511_vm12, %v2495_v37, %v2527_v40 }
 0x41f   : > { %v2470_v38 = vpop.f32.mrf.mxu2 }
 0x420   : > { %v2471_v39 = vadd.f32 %v2470_v38, %v2373_v36  ;;  %v5099_v36 = vld [vmem:[%s5906_s16 + $0xf4] sm:$0xf]  ;;  %v4823_v38 = vld [vmem:[%s5906_s16 + $0x114] sm:$0xf0] }
 0x422   : > { %v2496_v41 = vadd.f32 %v6119_v50, %v2471_v39 }
 0x424   : > { %v2528_v42 = vmul.f32 0.2, %v2496_v41  ;;  %vm2512_vm13 = vcmp.gt.f32.partialorder %v2496_v41, 0.0  ;;  %3040 = vmatmul.bf16.gmra.mxu1 %v4822_v24 }
 0x426   : > { %v2544_v45 = vsel %vm2512_vm13, %v2496_v41, %v2528_v42  ;;  %v4826_v41 = vor.u32 %v5099_v36, %v4823_v38  ;;  %v5263_v36 = vld [vmem:[#allocation7 + $0x1d0] sm:$0xff] }
 0x427   : > { %v2473_v46 = vpop.f32.mrf.mxu2  ;;  %v2553_v47 = vpack.c.bf16 %v2544_v45, %v2543_v44  ;;  %v5274_v45 = vld [vmem:[#allocation8 + $0x1e8] sm:$0xff] }
 0x428   : > { %v2474_v49 = vadd.f32 %v2473_v46, %v2376_v43  ;;  %v5266_v46 = vld [vmem:[#allocation7 + $0x1e8] sm:$0xff]  ;;  %3377 = vmatpush.bf16.msra.mxu3 %v5274_v45 }
 0x429   : > { %2820 = vmatmul.bf16.gmra.mxu0 %v2553_v47  ;;  %v5270_v45 = vld [vmem:[#allocation8 + $0x1c8] sm:$0xff] }
 0x42a   : > { %v2497_v52 = vadd.f32 %v6119_v50, %v2474_v49  ;;  %3474 = vmatpush.bf16.msra.mxu0 %v5266_v46  ;;  %v4839_v46 = vld [vmem:[%s5906_s16 + $0x234] sm:$0xf0] }
 0x42c   : > { %v2529_v56 = vmul.f32 0.2, %v2497_v52  ;;  %vm2513_vm14 = vcmp.gt.f32.partialorder %v2497_v52, 0.0 }
 0x42e   : > { %v2545_v0 = vsel %vm2513_vm14, %v2497_v52, %v2529_v56 }
 0x42f   : > { %v2475_v54 = vpop.f32.mrf.mxu2 }
 0x430   : > { %v2476_v59 = vadd.f32 %v2475_v54, %v2378_v53 }
 0x432   : > { %v2498_v57 = vadd.f32 %v6119_v50, %v2476_v59  ;;  %v2701_v50 = vpop.f32.mrf.mxu3  ;;  %v5108_v59 = vld [vmem:[%s5906_s16 + $0x13c] sm:$0xf] }
 0x434   : > { %v2530_v62 = vmul.f32 0.2, %v2498_v57  ;;  %vm2514_vm15 = vcmp.gt.f32.partialorder %v2498_v57, 0.0  ;;  %3045 = vmatmul.bf16.gmra.mxu1 %v4826_v41 }
 0x436   : > { %v2546_v2 = vsel %vm2514_vm15, %v2498_v57, %v2530_v62 }
 0x437   : > { %v2554_v3 = vpack.c.bf16 %v2546_v2, %v2545_v0  ;;  %v5273_v0 = vld [vmem:[#allocation8 + $0x1e0] sm:$0xff] }
 0x438   : > { %v5265_v2 = vld [vmem:[#allocation7 + $0x1e0] sm:$0xff]  ;;  %3378 = vmatpush.bf16.msra.mxu3 %v5273_v0 }
 0x439   : > { %2825 = vmatmul.bf16.gmra.mxu0 %v2554_v3 }
 0x43a   : > { %v2704_v16 = vpop.f32.mrf.mxu3  ;;  %3475 = vmatpush.bf16.msra.mxu0 %v5265_v2 }
 0x442   : > { %v2706_v28 = vpop.f32.mrf.mxu3 }
 0x446   : > { %v2791_v8 = vpop.f32.mrf.mxu0 }
 0x447   : > { %v2792_v9 = vadd.f32 %v2791_v8, %v2694_v48 }
 0x449   : > { %v2836_v13 = vadd.f32 %v6151_v10, %v2792_v9  ;;  %v5117_v9 = vld [vmem:[%s5906_s16 + $0x184] sm:$0xf] }
 0x44a   : > { %v2709_v37 = vpop.f32.mrf.mxu3 }
 0x44b   : > { %v2868_v17 = vmul.f32 0.2, %v2836_v13  ;;  %vm2852_vm0 = vcmp.gt.f32.partialorder %v2836_v13, 0.0 }
 0x44d   : > { %v2884_v21 = vsel %vm2852_vm0, %v2836_v13, %v2868_v17 }
 0x44e   : > { %v2793_v14 = vpop.f32.mrf.mxu0 }
 0x44f   : > { %v2794_v15 = vadd.f32 %v2793_v14, %v2696_v58  ;;  %v4830_v58 = vor.u32 %v5108_v59, %v4827_v55  ;;  %v4834_v14 = vor.u32 %v5117_v9, %v4831_v11 }
 0x451   : > { %v2837_v18 = vadd.f32 %v6151_v10, %v2794_v15  ;;  %3050 = vmatmul.bf16.gmra.mxu1 %v4830_v58 }
 0x452   : > { %v2711_v49 = vpop.f32.mrf.mxu3 }
 0x453   : > { %vm2853_vm1 = vcmp.gt.f32.partialorder %v2837_v18, 0.0  ;;  %v2869_v1 = vmul.f32 0.2, %v2837_v18 }
 0x455   : > { %v2885_v23 = vsel %vm2853_vm1, %v2837_v18, %v2869_v1  ;;  %v5272_v18 = vld [vmem:[#allocation8 + $0x1d8] sm:$0xff] }
 0x456   : > { %v2900_v25 = vpack.c.bf16 %v2885_v23, %v2884_v21  ;;  %v2796_v26 = vpop.f32.mrf.mxu0  ;;  %v5264_v1 = vld [vmem:[#allocation7 + $0x1d8] sm:$0xff]  ;;  %3379 = vmatpush.bf16.msra.mxu3 %v5272_v18 }
 0x457   : > { %v2797_v27 = vadd.f32 %v2796_v26, %v2699_v4  ;;  %3476 = vmatpush.bf16.msra.mxu0 %v5264_v1 }
 0x458   : > { %3127 = vmatmul.bf16.vlgmr.msrb.gmra.mxu2 %v2900_v25 }
 0x459   : > { %v2838_v31 = vadd.f32 %v6151_v10, %v2797_v27  ;;  %v5126_v27 = vld [vmem:[%s5906_s16 + $0x1cc] sm:$0xf] }
 0x45a   : > { %v2714_v62 = vpop.f32.mrf.mxu3 }
 0x45b   : > { %v2870_v34 = vmul.f32 0.2, %v2838_v31  ;;  %vm2854_vm2 = vcmp.gt.f32.partialorder %v2838_v31, 0.0  ;;  %3477 = vmatpush.bf16.msra.mxu0 %v5263_v36 }
 0x45d   : > { %v2886_v39 = vsel %vm2854_vm2, %v2838_v31, %v2870_v34 }
 0x45e   : > { %v2798_v32 = vpop.f32.mrf.mxu0 }
 0x45f   : > { %v2799_v33 = vadd.f32 %v2798_v32, %v2701_v50 }
 0x461   : > { %v2839_v35 = vadd.f32 %v6151_v10, %v2799_v33  ;;  %3055 = vmatmul.bf16.gmra.mxu1 %v4834_v14 }
 0x462   : > { %v2716_v8 = vpop.f32.mrf.mxu3 }
 0x463   : > { %v2871_v22 = vmul.f32 0.2, %v2839_v35  ;;  %vm2855_vm3 = vcmp.gt.f32.partialorder %v2839_v35, 0.0 }
 0x465   : > { %v2887_v40 = vsel %vm2855_vm3, %v2839_v35, %v2871_v22  ;;  %v5271_v22 = vld [vmem:[#allocation8 + $0x1d0] sm:$0xff] }
 0x466   : > { %v2801_v42 = vpop.f32.mrf.mxu0  ;;  %v2901_v43 = vpack.c.bf16 %v2887_v40, %v2886_v39  ;;  %3380 = vmatpush.bf16.msra.mxu3 %v5271_v22 }
 0x467   : > { %v2802_v44 = vadd.f32 %v2801_v42, %v2704_v16 }
 0x468   : > { %3132 = vmatmul.bf16.gmra.mxu2 %v2901_v43 }
 0x469   : > { %v2840_v47 = vadd.f32 %v6151_v10, %v2802_v44  ;;  %v5135_v44 = vld [vmem:[%s5906_s16 + $0x214] sm:$0xf] }
 0x46a   : > { %v2719_v19 = vpop.f32.mrf.mxu3  ;;  %3381 = vmatpush.bf16.msra.mxu3 %v5270_v45 }
 0x46b   : > { %v2872_v52 = vmul.f32 0.2, %v2840_v47  ;;  %vm2856_vm4 = vcmp.gt.f32.partialorder %v2840_v47, 0.0 }
 0x46d   : > { %v2888_v56 = vsel %vm2856_vm4, %v2840_v47, %v2872_v52 }
 0x46e   : > { %v2803_v48 = vpop.f32.mrf.mxu0 }
 0x46f   : > { %v2804_v51 = vadd.f32 %v2803_v48, %v2706_v28  ;;  %v4835_v28 = vld [vmem:[%s5906_s16 + $0x1ec] sm:$0xf0] }
 0x470   : > { %v4838_v31 = vor.u32 %v5126_v27, %v4835_v28  ;;  %v5095_v28 = vld [vmem:[%s5906_s16 + $0xd0] sm:$0xf0] }
 0x471   : > { %v2841_v53 = vadd.f32 %v6151_v10, %v2804_v51 }
 0x472   : > { %v2721_v32 = vpop.f32.mrf.mxu3  ;;  %3060 = vmatmul.bf16.gmra.mxu1 %v4838_v31  ;;  %v6187_v31 = vld [vmem:[#allocation10 + $0x6] ss:$0 sm:$0xff] }
 0x473   : > { %v2873_v54 = vmul.f32 0.2, %v2841_v53  ;;  %vm2857_vm5 = vcmp.gt.f32.partialorder %v2841_v53, 0.0 }
 0x475   : > { %v2889_v57 = vsel %vm2857_vm5, %v2841_v53, %v2873_v54  ;;  %v5262_v53 = vld [vmem:[#allocation7 + $0x1c8] sm:$0xff]  ;;  %v5269_v54 = vld [vmem:[#allocation8 + $0x1c0] sm:$0xff] }
 0x476   : > { %v2806_v60 = vpop.f32.mrf.mxu0  ;;  %v2902_v61 = vpack.c.bf16 %v2889_v57, %v2888_v56  ;;  %3478 = vmatpush.bf16.msra.mxu0 %v5262_v53  ;;  %3382 = vmatpush.bf16.msra.mxu3 %v5269_v54 }
 0x477   : > { %v2807_v63 = vadd.f32 %v2806_v60, %v2709_v37 }
 0x478   : > { %3137 = vmatmul.bf16.gmra.mxu2 %v2902_v61 }
 0x479   : > { %v2842_v3 = vadd.f32 %v6151_v10, %v2807_v63 }
 0x47a   : > { %v2724_v40 = vpop.f32.mrf.mxu3 }
 0x47b   : > { %v2874_v6 = vmul.f32 0.2, %v2842_v3  ;;  %vm2858_vm6 = vcmp.gt.f32.partialorder %v2842_v3, 0.0 }
 0x47d   : > { %v2890_v12 = vsel %vm2858_vm6, %v2842_v3, %v2874_v6  ;;  %v4909_v6 = vld [vmem:[%s5906_s16 + $0x20] sm:$0xf] }
 0x47e   : > { %v2808_v4 = vpop.f32.mrf.mxu0 }
 0x47f   : > { %v2809_v5 = vadd.f32 %v2808_v4, %v2711_v49  ;;  %v4842_v49 = vor.u32 %v5135_v44, %v4839_v46  ;;  %v5104_v44 = vld [vmem:[%s5906_s16 + $0x118] sm:$0xf0] }
 0x481   : > { %v2843_v7 = vadd.f32 %v6151_v10, %v2809_v5 }
 0x482   : > { %3065 = vmatmul.bf16.gmra.mxu1 %v4842_v49  ;;  %v2726_v55 = vpop.f32.mrf.mxu3 }
 0x483   : > { %v2875_v50 = vmul.f32 0.2, %v2843_v7  ;;  %vm2859_vm7 = vcmp.gt.f32.partialorder %v2843_v7, 0.0 }
 0x485   : > { %v2891_v13 = vsel %vm2859_vm7, %v2843_v7, %v2875_v50  ;;  %v5077_v7 = vld [vmem:[%s5906_s16 + $0x40] sm:$0xf0]  ;;  %v3031_v50 = vpop.f32.mrf.mxu1 }
 0x486   : > { %v2811_v15 = vpop.f32.mrf.mxu0  ;;  %v2903_v16 = vpack.c.bf16 %v2891_v13, %v2890_v12  ;;  %v4910_v9 = vor.u32 %v5077_v7, %v4909_v6 }
 0x487   : > { %v2812_v17 = vadd.f32 %v2811_v15, %v2714_v62 }
 0x488   : > { %3142 = vmatmul.bf16.gmra.mxu2 %v2903_v16  ;;  %3383 = vmatmul.bf16.vlgmr.msra.gmra.mxu3 %v4910_v9  ;;  %v5261_v16 = vld [vmem:[#allocation7 + $0x1c0] sm:$0xff] }
 0x489   : > { %v2844_v20 = vadd.f32 %v6151_v10, %v2812_v17  ;;  %3479 = vmatpush.bf16.msra.mxu0 %v5261_v16 }
 0x48a   : > { %v2729_v63 = vpop.f32.mrf.mxu3 }
 0x48b   : > { %v2876_v24 = vmul.f32 0.2, %v2844_v20  ;;  %vm2860_vm8 = vcmp.gt.f32.partialorder %v2844_v20, 0.0 }
 0x48d   : > { %v2892_v29 = vsel %vm2860_vm8, %v2844_v20, %v2876_v24  ;;  %v3033_v20 = vpop.f32.mrf.mxu1 }
 0x48e   : > { %v2813_v21 = vpop.f32.mrf.mxu0 }
 0x48f   : > { %v2814_v23 = vadd.f32 %v2813_v21, %v2716_v8  ;;  %v4913_v21 = vld [vmem:[%s5906_s16 + $0x68] sm:$0xf] }
 0x491   : > { %v2845_v25 = vadd.f32 %v6151_v10, %v2814_v23  ;;  %v5086_v23 = vld [vmem:[%s5906_s16 + $0x88] sm:$0xf0] }
 0x492   : > { %v2731_v11 = vpop.f32.mrf.mxu3  ;;  %v4914_v24 = vor.u32 %v5086_v23, %v4913_v21 }
 0x493   : > { %vm2861_vm9 = vcmp.gt.f32.partialorder %v2845_v25, 0.0  ;;  %v2877_v26 = vmul.f32 0.2, %v2845_v25 }
 0x495   : > { %v2893_v30 = vsel %vm2861_vm9, %v2845_v25, %v2877_v26  ;;  %v3036_v25 = vpop.f32.mrf.mxu1 }
 0x496   : > { %v2816_v33 = vpop.f32.mrf.mxu0  ;;  %v2904_v34 = vpack.c.bf16 %v2893_v30, %v2892_v29 }
 0x497   : > { %v2817_v35 = vadd.f32 %v2816_v33, %v2719_v19 }
 0x498   : > { %3147 = vmatmul.bf16.gmra.mxu2 %v2904_v34  ;;  %3388 = vmatmul.bf16.gmra.mxu3 %v4914_v24 }
 0x499   : > { %v2846_v37 = vadd.f32 %v6151_v10, %v2817_v35 }
 0x49b   : > { %v2878_v41 = vmul.f32 0.2, %v2846_v37  ;;  %vm2862_vm10 = vcmp.gt.f32.partialorder %v2846_v37, 0.0 }
 0x49d   : > { %v2894_v47 = vsel %vm2862_vm10, %v2846_v37, %v2878_v41  ;;  %v3038_v27 = vpop.f32.mrf.mxu1 }
 0x49e   : > { %v2818_v38 = vpop.f32.mrf.mxu0 }
 0x49f   : > { %v2819_v39 = vadd.f32 %v2818_v38, %v2721_v32  ;;  %v5284_v32 = vld [vmem:[#allocation11 + $0x38] sm:$0xff] }
 0x4a0   : > { %3666 = vmatpush.bf16.msra.mxu1 %v5284_v32  ;;  %v5131_v32 = vld [vmem:[%s5906_s16 + $0x1f0] sm:$0xf0] }
 0x4a1   : > { %v2847_v42 = vadd.f32 %v6151_v10, %v2819_v39 }
 0x4a3   : > { %vm2863_vm11 = vcmp.gt.f32.partialorder %v2847_v42, 0.0  ;;  %v2879_v43 = vmul.f32 0.2, %v2847_v42 }
 0x4a5   : > { %v2895_v48 = vsel %vm2863_vm11, %v2847_v42, %v2879_v43  ;;  %v3041_v22 = vpop.f32.mrf.mxu1  ;;  %v4921_v43 = vld [vmem:[%s5906_s16 + $0xf8] sm:$0xf] }
 0x4a6   : > { %v2821_v51 = vpop.f32.mrf.mxu0  ;;  %v2905_v52 = vpack.c.bf16 %v2895_v48, %v2894_v47  ;;  %v4922_v45 = vor.u32 %v5104_v44, %v4921_v43  ;;  %v5283_v48 = vld [vmem:[#allocation11 + $0x30] sm:$0xff] }
 0x4a7   : > { %v2822_v59 = vadd.f32 %v2821_v51, %v2724_v40  ;;  %3667 = vmatpush.bf16.msra.mxu1 %v5283_v48  ;;  %v5140_v48 = vld [vmem:[%s5906_s16 + $0x238] sm:$0xf0] }
 0x4a8   : > { %3152 = vmatmul.bf16.gmra.mxu2 %v2905_v52 }
 0x4a9   : > { %v2848_v56 = vadd.f32 %v6151_v10, %v2822_v59 }
 0x4ab   : > { %v2880_v60 = vmul.f32 0.2, %v2848_v56  ;;  %vm2864_vm12 = vcmp.gt.f32.partialorder %v2848_v56, 0.0 }
 0x4ad   : > { %v2896_v0 = vsel %vm2864_vm12, %v2848_v56, %v2880_v60  ;;  %v3043_v47 = vpop.f32.mrf.mxu1 }
 0x4ae   : > { %v2823_v57 = vpop.f32.mrf.mxu0 }
 0x4af   : > { %v2824_v58 = vadd.f32 %v2823_v57, %v2726_v55 }
 0x4b1   : > { %v2849_v61 = vadd.f32 %v6151_v10, %v2824_v58 }
 0x4b3   : > { %vm2865_vm13 = vcmp.gt.f32.partialorder %v2849_v61, 0.0  ;;  %v2881_v62 = vmul.f32 0.2, %v2849_v61 }
 0x4b5   : > { %v2897_v2 = vsel %vm2865_vm13, %v2849_v61, %v2881_v62  ;;  %v3046_v55 = vpop.f32.mrf.mxu1  ;;  %v4925_v61 = vld [vmem:[%s5906_s16 + $0x140] sm:$0xf]  ;;  %v5113_v62 = vld [vmem:[%s5906_s16 + $0x160] sm:$0xf0] }
 0x4b6   : > { %v2826_v3 = vpop.f32.mrf.mxu0  ;;  %v2906_v4 = vpack.c.bf16 %v2897_v2, %v2896_v0  ;;  %v5282_v2 = vld [vmem:[#allocation11 + $0x28] sm:$0xff] }
 0x4b7   : > { %v2827_v5 = vadd.f32 %v2826_v3, %v2729_v63  ;;  %v4926_v63 = vor.u32 %v5113_v62, %v4925_v61  ;;  %3668 = vmatpush.bf16.msra.mxu1 %v5282_v2 }
 0x4b8   : > { %3157 = vmatmul.bf16.gmra.mxu2 %v2906_v4 }
 0x4b9   : > { %v2850_v8 = vadd.f32 %v6151_v10, %v2827_v5 }
 0x4bb   : > { %v2882_v14 = vmul.f32 0.2, %v2850_v8  ;;  %vm2866_vm14 = vcmp.gt.f32.partialorder %v2850_v8, 0.0 }
 0x4bd   : > { %v2898_v18 = vsel %vm2866_vm14, %v2850_v8, %v2882_v14  ;;  %v3048_v5 = vpop.f32.mrf.mxu1  ;;  %v4929_v14 = vld [vmem:[%s5906_s16 + $0x188] sm:$0xf] }
 0x4be   : > { %v2828_v12 = vpop.f32.mrf.mxu0 }
 0x4bf   : > { %v2829_v13 = vadd.f32 %v2828_v12, %v2731_v11 }
 0x4c1   : > { %v2851_v15 = vadd.f32 %v6151_v10, %v2829_v13  ;;  %v4917_v10 = vld [vmem:[%s5906_s16 + $0xb0] sm:$0xf] }
 0x4c2   : > { %v4918_v29 = vor.u32 %v5095_v28, %v4917_v10 }
 0x4c3   : > { %vm2867_vm15 = vcmp.gt.f32.partialorder %v2851_v15, 0.0  ;;  %v2883_v17 = vmul.f32 0.2, %v2851_v15 }
 0x4c4   : > { %3393 = vmatmul.bf16.gmra.mxu3 %v4918_v29 }
 0x4c5   : > { %v2899_v1 = vsel %vm2867_vm15, %v2851_v15, %v2883_v17  ;;  %v5122_v15 = vld [vmem:[%s5906_s16 + $0x1a8] sm:$0xf0] }
 0x4c6   : > { %v2907_v19 = vpack.c.bf16 %v2899_v1, %v2898_v18  ;;  %v4930_v17 = vor.u32 %v5122_v15, %v4929_v14  ;;  %v5281_v1 = vld [vmem:[#allocation11 + $0x20] sm:$0xff] }
 0x4c7   : > { %3669 = vmatpush.bf16.msra.mxu1 %v5281_v1 }
 0x4c8   : > { %3162 = vmatmul.bf16.gmra.mxu2 %v2907_v19 }
 0x4ce   : > { %v3051_v16 = vpop.f32.mrf.mxu1 }
 0x4d4   : > { %3398 = vmatmul.bf16.gmra.mxu3 %v4922_v45 }
 0x4db   : > { %v3128_v26 = vpop.f32.mrf.mxu2 }
 0x4dc   : > { %v3129_v30 = vadd.f32 %v3128_v26, %v3031_v50 }
 0x4de   : > { %v3173_v33 = vadd.f32 %v6187_v31, %v3129_v30  ;;  %v4933_v30 = vld [vmem:[%s5906_s16 + $0x1d0] sm:$0xf] }
 0x4e0   : > { %v3205_v36 = vmul.f32 0.2, %v3173_v33  ;;  %vm3189_vm0 = vcmp.gt.f32.partialorder %v3173_v33, 0.0 }
 0x4e2   : > { %v3221_v39 = vsel %vm3189_vm0, %v3173_v33, %v3205_v36  ;;  %v4934_v33 = vor.u32 %v5131_v32, %v4933_v30 }
 0x4e3   : > { %v3130_v34 = vpop.f32.mrf.mxu2 }
 0x4e4   : > { %v3131_v35 = vadd.f32 %v3130_v34, %v3033_v20  ;;  %3403 = vmatmul.bf16.gmra.mxu3 %v4926_v63 }
 0x4e6   : > { %v3174_v37 = vadd.f32 %v6187_v31, %v3131_v35  ;;  %v5280_v35 = vld [vmem:[#allocation11 + $0x18] sm:$0xff] }
 0x4e7   : > { %3670 = vmatpush.bf16.msra.mxu1 %v5280_v35 }
 0x4e8   : > { %vm3190_vm1 = vcmp.gt.f32.partialorder %v3174_v37, 0.0  ;;  %v3206_v38 = vmul.f32 0.2, %v3174_v37 }
 0x4ea   : > { %v3222_v40 = vsel %vm3190_vm1, %v3174_v37, %v3206_v38 }
 0x4eb   : > { %v3237_v41 = vpack.c.bf16 %v3222_v40, %v3221_v39  ;;  %v3133_v42 = vpop.f32.mrf.mxu2 }
 0x4ec   : > { %v3134_v46 = vadd.f32 %v3133_v42, %v3036_v25  ;;  %v3053_v25 = vpop.f32.mrf.mxu1 }
 0x4ed   : > { %3480 = vmatmul.bf16.vlgmr.msra.gmra.mxu0 %v3237_v41 }
 0x4ee   : > { %v3175_v49 = vadd.f32 %v6187_v31, %v3134_v46 }
 0x4f0   : > { %v3207_v53 = vmul.f32 0.2, %v3175_v49  ;;  %vm3191_vm2 = vcmp.gt.f32.partialorder %v3175_v49, 0.0 }
 0x4f2   : > { %v3223_v56 = vsel %vm3191_vm2, %v3175_v49, %v3207_v53 }
 0x4f3   : > { %v3135_v51 = vpop.f32.mrf.mxu2 }
 0x4f4   : > { %v3136_v52 = vadd.f32 %v3135_v51, %v3038_v27  ;;  %3408 = vmatmul.bf16.gmra.mxu3 %v4930_v17  ;;  %v5277_v17 = vld [vmem:[#allocation11] sm:$0xff] }
 0x4f6   : > { %v3176_v54 = vadd.f32 %v6187_v31, %v3136_v52  ;;  %v5279_v52 = vld [vmem:[#allocation11 + $0x10] sm:$0xff] }
 0x4f7   : > { %3671 = vmatpush.bf16.msra.mxu1 %v5279_v52 }
 0x4f8   : > { %v3208_v59 = vmul.f32 0.2, %v3176_v54  ;;  %vm3192_vm3 = vcmp.gt.f32.partialorder %v3176_v54, 0.0 }
 0x4fa   : > { %v3224_v57 = vsel %vm3192_vm3, %v3176_v54, %v3208_v59 }
 0x4fb   : > { %v3138_v58 = vpop.f32.mrf.mxu2  ;;  %v3238_v60 = vpack.c.bf16 %v3224_v57, %v3223_v56 }
 0x4fc   : > { %v3139_v0 = vadd.f32 %v3138_v58, %v3041_v22  ;;  %v3056_v22 = vpop.f32.mrf.mxu1 }
 0x4fd   : > { %3485 = vmatmul.bf16.gmra.mxu0 %v3238_v60  ;;  %v5278_v60 = vld [vmem:[#allocation11 + $0x8] sm:$0xff] }
 0x4fe   : > { %v3177_v3 = vadd.f32 %v6187_v31, %v3139_v0  ;;  %3672 = vmatpush.bf16.msra.mxu1 %v5278_v60 }
 0x500   : > { %v3209_v7 = vmul.f32 0.2, %v3177_v3  ;;  %vm3193_vm4 = vcmp.gt.f32.partialorder %v3177_v3, 0.0 }
 0x502   : > { %v3225_v9 = vsel %vm3193_vm4, %v3177_v3, %v3209_v7  ;;  %3673 = vmatpush.bf16.msra.mxu1 %v5277_v17 }
 0x503   : > { %v3140_v4 = vpop.f32.mrf.mxu2 }
 0x504   : > { %v3141_v6 = vadd.f32 %v3140_v4, %v3043_v47  ;;  %3413 = vmatmul.bf16.gmra.mxu3 %v4934_v33  ;;  %v3058_v44 = vpop.f32.mrf.mxu1  ;;  %v4937_v47 = vld [vmem:[%s5906_s16 + $0x218] sm:$0xf] }
 0x505   : > { %v4938_v49 = vor.u32 %v5140_v48, %v4937_v47 }
 0x506   : > { %v3178_v8 = vadd.f32 %v6187_v31, %v3141_v6 }
 0x508   : > { %v3210_v50 = vmul.f32 0.2, %v3178_v8  ;;  %vm3194_vm5 = vcmp.gt.f32.partialorder %v3178_v8, 0.0 }
 0x50a   : > { %v3226_v11 = vsel %vm3194_vm5, %v3178_v8, %v3210_v50 }
 0x50b   : > { %v3143_v12 = vpop.f32.mrf.mxu2  ;;  %v3239_v13 = vpack.c.bf16 %v3226_v11, %v3225_v9  ;;  %v3384_v15 = vpop.f32.mrf.mxu3 }
 0x50c   : > { %v3144_v18 = vadd.f32 %v3143_v12, %v3046_v55  ;;  %v3061_v55 = vpop.f32.mrf.mxu1 }
 0x50d   : > { %3490 = vmatmul.bf16.gmra.mxu0 %v3239_v13 }
 0x50e   : > { %v3179_v19 = vadd.f32 %v6187_v31, %v3144_v18 }
 0x510   : > { %v3211_v23 = vmul.f32 0.2, %v3179_v19  ;;  %vm3195_vm6 = vcmp.gt.f32.partialorder %v3179_v19, 0.0 }
 0x512   : > { %v3227_v27 = vsel %vm3195_vm6, %v3179_v19, %v3211_v23 }
 0x513   : > { %v3145_v20 = vpop.f32.mrf.mxu2 }
 0x514   : > { %v3146_v21 = vadd.f32 %v3145_v20, %v3048_v5  ;;  %3418 = vmatmul.bf16.gmra.mxu3 %v4938_v49  ;;  %v3063_v3 = vpop.f32.mrf.mxu1 }
 0x516   : > { %v3180_v24 = vadd.f32 %v6187_v31, %v3146_v21 }
 0x518   : > { %v3212_v26 = vmul.f32 0.2, %v3180_v24  ;;  %vm3196_vm7 = vcmp.gt.f32.partialorder %v3180_v24, 0.0 }
 0x51a   : > { %v3228_v10 = vsel %vm3196_vm7, %v3180_v24, %v3212_v26  ;;  %v3386_v24 = vpop.f32.mrf.mxu3 }
 0x51b   : > { %v3148_v28 = vpop.f32.mrf.mxu2  ;;  %v3240_v29 = vpack.c.bf16 %v3228_v10, %v3227_v27 }
 0x51c   : > { %v3149_v34 = vadd.f32 %v3148_v28, %v3051_v16  ;;  %v3066_v9 = vpop.f32.mrf.mxu1 }
 0x51d   : > { %3495 = vmatmul.bf16.gmra.mxu0 %v3240_v29  ;;  %v5292_v29 = vld [vmem:[#allocation13 + $0x38] sm:$0xff] }
 0x51e   : > { %v3181_v36 = vadd.f32 %v6187_v31, %v3149_v34  ;;  %3839 = vmatpush.bf16.msra.mxu2 %v5292_v29  ;;  %v6215_v34 = vld [vmem:[#allocation10 + $0x7] ss:$0 sm:$0xff] }
 0x520   : > { %v3213_v39 = vmul.f32 0.2, %v3181_v36  ;;  %vm3197_vm8 = vcmp.gt.f32.partialorder %v3181_v36, 0.0 }
 0x522   : > { %v3229_v42 = vsel %vm3197_vm8, %v3181_v36, %v3213_v39  ;;  %v3389_v28 = vpop.f32.mrf.mxu3 }
 0x523   : > { %v3150_v37 = vpop.f32.mrf.mxu2 }
 0x524   : > { %v3151_v38 = vadd.f32 %v3150_v37, %v3053_v25  ;;  %v3068_v1 = vpop.f32.mrf.mxu1 }
 0x526   : > { %v3182_v40 = vadd.f32 %v6187_v31, %v3151_v38 }
 0x528   : > { %vm3198_vm9 = vcmp.gt.f32.partialorder %v3182_v40, 0.0  ;;  %v3214_v41 = vmul.f32 0.2, %v3182_v40 }
 0x52a   : > { %v3230_v43 = vsel %vm3198_vm9, %v3182_v40, %v3214_v41  ;;  %v3391_v32 = vpop.f32.mrf.mxu3  ;;  %v5291_v40 = vld [vmem:[#allocation13 + $0x30] sm:$0xff] }
 0x52b   : > { %v3153_v45 = vpop.f32.mrf.mxu2  ;;  %v3241_v46 = vpack.c.bf16 %v3230_v43, %v3229_v42  ;;  %3840 = vmatpush.bf16.msra.mxu2 %v5291_v40 }
 0x52c   : > { %v3154_v51 = vadd.f32 %v3153_v45, %v3056_v22 }
 0x52d   : > { %3500 = vmatmul.bf16.gmra.mxu0 %v3241_v46 }
 0x52e   : > { %v3183_v53 = vadd.f32 %v6187_v31, %v3154_v51 }
 0x530   : > { %v3215_v56 = vmul.f32 0.2, %v3183_v53  ;;  %vm3199_vm10 = vcmp.gt.f32.partialorder %v3183_v53, 0.0 }
 0x532   : > { %v3231_v61 = vsel %vm3199_vm10, %v3183_v53, %v3215_v56 }
 0x533   : > { %v3155_v54 = vpop.f32.mrf.mxu2 }
 0x534   : > { %v3156_v59 = vadd.f32 %v3155_v54, %v3058_v44  ;;  %v5290_v54 = vld [vmem:[#allocation13 + $0x28] sm:$0xff] }
 0x535   : > { %3841 = vmatpush.bf16.msra.mxu2 %v5290_v54 }
 0x536   : > { %v3184_v57 = vadd.f32 %v6187_v31, %v3156_v59 }
 0x538   : > { %vm3200_vm11 = vcmp.gt.f32.partialorder %v3184_v57, 0.0  ;;  %v3216_v58 = vmul.f32 0.2, %v3184_v57 }
 0x53a   : > { %v3232_v62 = vsel %vm3200_vm11, %v3184_v57, %v3216_v58 }
 0x53b   : > { %v3158_v63 = vpop.f32.mrf.mxu2  ;;  %v3242_v0 = vpack.c.bf16 %v3232_v62, %v3231_v61 }
 0x53c   : > { %v3159_v2 = vadd.f32 %v3158_v63, %v3061_v55 }
 0x53d   : > { %3505 = vmatmul.bf16.gmra.mxu0 %v3242_v0 }
 0x53e   : > { %v3185_v4 = vadd.f32 %v6187_v31, %v3159_v2 }
 0x540   : > { %v3217_v7 = vmul.f32 0.2, %v3185_v4  ;;  %vm3201_vm12 = vcmp.gt.f32.partialorder %v3185_v4, 0.0 }
 0x542   : > { %v3233_v11 = vsel %vm3201_vm12, %v3185_v4, %v3217_v7 }
 0x543   : > { %v3160_v5 = vpop.f32.mrf.mxu2 }
 0x544   : > { %v3161_v6 = vadd.f32 %v3160_v5, %v3063_v3  ;;  %v5289_v5 = vld [vmem:[#allocation13 + $0x20] sm:$0xff] }
 0x545   : > { %3842 = vmatpush.bf16.msra.mxu2 %v5289_v5 }
 0x546   : > { %v3186_v8 = vadd.f32 %v6187_v31, %v3161_v6 }
 0x547   : > { %v3394_v36 = vpop.f32.mrf.mxu3 }
 0x548   : > { %vm3202_vm13 = vcmp.gt.f32.partialorder %v3186_v8, 0.0  ;;  %v3218_v50 = vmul.f32 0.2, %v3186_v8 }
 0x54a   : > { %v3234_v12 = vsel %vm3202_vm13, %v3186_v8, %v3218_v50 }
 0x54b   : > { %v3163_v13 = vpop.f32.mrf.mxu2  ;;  %v3243_v14 = vpack.c.bf16 %v3234_v12, %v3233_v11 }
 0x54c   : > { %v3164_v16 = vadd.f32 %v3163_v13, %v3066_v9 }
 0x54d   : > { %3510 = vmatmul.bf16.gmra.mxu0 %v3243_v14 }
 0x54e   : > { %v3187_v18 = vadd.f32 %v6187_v31, %v3164_v16 }
 0x54f   : > { %v3396_v46 = vpop.f32.mrf.mxu3 }
 0x550   : > { %v3219_v21 = vmul.f32 0.2, %v3187_v18  ;;  %vm3203_vm14 = vcmp.gt.f32.partialorder %v3187_v18, 0.0 }
 0x552   : > { %v3235_v26 = vsel %vm3203_vm14, %v3187_v18, %v3219_v21 }
 0x553   : > { %v3165_v19 = vpop.f32.mrf.mxu2 }
 0x554   : > { %v3166_v20 = vadd.f32 %v3165_v19, %v3068_v1  ;;  %v5288_v1 = vld [vmem:[#allocation13 + $0x18] sm:$0xff] }
 0x555   : > { %3843 = vmatpush.bf16.msra.mxu2 %v5288_v1 }
 0x556   : > { %v3188_v23 = vadd.f32 %v6187_v31, %v3166_v20 }
 0x557   : > { %v3399_v59 = vpop.f32.mrf.mxu3 }
 0x558   : > { %vm3204_vm15 = vcmp.gt.f32.partialorder %v3188_v23, 0.0  ;;  %v3220_v25 = vmul.f32 0.2, %v3188_v23 }
 0x55a   : > { %v3236_v27 = vsel %vm3204_vm15, %v3188_v23, %v3220_v25 }
 0x55b   : > { %v3244_v10 = vpack.c.bf16 %v3236_v27, %v3235_v26 }
 0x55d   : > { %3515 = vmatmul.bf16.gmra.mxu0 %v3244_v10 }
 0x55f   : > { %v3401_v63 = vpop.f32.mrf.mxu3 }
 0x567   : > { %v3404_v9 = vpop.f32.mrf.mxu3 }
 0x56a   : > { %v3481_v30 = vpop.f32.mrf.mxu0 }
 0x56b   : > { %v3482_v33 = vadd.f32 %v3481_v30, %v3384_v15 }
 0x56d   : > { %v3526_v35 = vadd.f32 %v6215_v34, %v3482_v33 }
 0x56f   : > { %v3558_v37 = vmul.f32 0.2, %v3526_v35  ;;  %vm3542_vm0 = vcmp.gt.f32.partialorder %v3526_v35, 0.0  ;;  %v3406_v17 = vpop.f32.mrf.mxu3 }
 0x571   : > { %v3574_v41 = vsel %vm3542_vm0, %v3526_v35, %v3558_v37 }
 0x572   : > { %v3483_v22 = vpop.f32.mrf.mxu0 }
 0x573   : > { %v3484_v31 = vadd.f32 %v3483_v22, %v3386_v24 }
 0x575   : > { %v3527_v38 = vadd.f32 %v6215_v34, %v3484_v31 }
 0x577   : > { %vm3543_vm1 = vcmp.gt.f32.partialorder %v3527_v38, 0.0  ;;  %v3559_v39 = vmul.f32 0.2, %v3527_v38  ;;  %v3409_v25 = vpop.f32.mrf.mxu3 }
 0x579   : > { %v3575_v42 = vsel %vm3543_vm1, %v3527_v38, %v3559_v39 }
 0x57a   : > { %v3590_v43 = vpack.c.bf16 %v3575_v42, %v3574_v41  ;;  %v3486_v44 = vpop.f32.mrf.mxu0 }
 0x57b   : > { %v3487_v45 = vadd.f32 %v3486_v44, %v3389_v28 }
 0x57c   : > { %3674 = vmatmul.bf16.vlgmr.msra.gmra.mxu1 %v3590_v43 }
 0x57d   : > { %v3528_v47 = vadd.f32 %v6215_v34, %v3487_v45  ;;  %v5286_v45 = vld [vmem:[#allocation13 + $0x8] sm:$0xff] }
 0x57f   : > { %v3560_v51 = vmul.f32 0.2, %v3528_v47  ;;  %vm3544_vm2 = vcmp.gt.f32.partialorder %v3528_v47, 0.0  ;;  %v3411_v22 = vpop.f32.mrf.mxu3 }
 0x581   : > { %v3576_v55 = vsel %vm3544_vm2, %v3528_v47, %v3560_v51 }
 0x582   : > { %v3488_v48 = vpop.f32.mrf.mxu0 }
 0x583   : > { %v3489_v49 = vadd.f32 %v3488_v48, %v3391_v32  ;;  %v5287_v32 = vld [vmem:[#allocation13 + $0x10] sm:$0xff] }
 0x584   : > { %3844 = vmatpush.bf16.msra.mxu2 %v5287_v32 }
 0x585   : > { %v3529_v52 = vadd.f32 %v6215_v34, %v3489_v49 }
 0x587   : > { %vm3545_vm3 = vcmp.gt.f32.partialorder %v3529_v52, 0.0  ;;  %v3561_v53 = vmul.f32 0.2, %v3529_v52  ;;  %v3414_v41 = vpop.f32.mrf.mxu3 }
 0x588   : > { %3845 = vmatpush.bf16.msra.mxu2 %v5286_v45 }
 0x589   : > { %v3577_v56 = vsel %vm3545_vm3, %v3529_v52, %v3561_v53 }
 0x58a   : > { %v3491_v57 = vpop.f32.mrf.mxu0  ;;  %v3591_v58 = vpack.c.bf16 %v3577_v56, %v3576_v55 }
 0x58b   : > { %v3492_v60 = vadd.f32 %v3491_v57, %v3394_v36 }
 0x58c   : > { %3679 = vmatmul.bf16.gmra.mxu1 %v3591_v58 }
 0x58d   : > { %v3530_v61 = vadd.f32 %v6215_v34, %v3492_v60 }
 0x58f   : > { %v3562_v2 = vmul.f32 0.2, %v3530_v61  ;;  %vm3546_vm4 = vcmp.gt.f32.partialorder %v3530_v61, 0.0  ;;  %v3416_v52 = vpop.f32.mrf.mxu3 }
 0x591   : > { %v3578_v6 = vsel %vm3546_vm4, %v3530_v61, %v3562_v2  ;;  %v5285_v2 = vld [vmem:[#allocation13] sm:$0xff] }
 0x592   : > { %v3493_v62 = vpop.f32.mrf.mxu0  ;;  %3846 = vmatpush.bf16.msra.mxu2 %v5285_v2 }
 0x593   : > { %v3494_v0 = vadd.f32 %v3493_v62, %v3396_v46 }
 0x595   : > { %v3531_v3 = vadd.f32 %v6215_v34, %v3494_v0 }
 0x597   : > { %vm3547_vm5 = vcmp.gt.f32.partialorder %v3531_v3, 0.0  ;;  %v3563_v4 = vmul.f32 0.2, %v3531_v3  ;;  %v3419_v58 = vpop.f32.mrf.mxu3 }
 0x599   : > { %v3579_v7 = vsel %vm3547_vm5, %v3531_v3, %v3563_v4 }
 0x59a   : > { %v3496_v8 = vpop.f32.mrf.mxu0  ;;  %v3592_v50 = vpack.c.bf16 %v3579_v7, %v3578_v6 }
 0x59b   : > { %v3497_v11 = vadd.f32 %v3496_v8, %v3399_v59 }
 0x59c   : > { %3684 = vmatmul.bf16.gmra.mxu1 %v3592_v50 }
 0x59d   : > { %v3532_v12 = vadd.f32 %v6215_v34, %v3497_v11 }
 0x59f   : > { %v3564_v15 = vmul.f32 0.2, %v3532_v12  ;;  %vm3548_vm6 = vcmp.gt.f32.partialorder %v3532_v12, 0.0  ;;  %v3421_v4 = vpop.f32.mrf.mxu3 }
 0x5a1   : > { %v3580_v19 = vsel %vm3548_vm6, %v3532_v12, %v3564_v15 }
 0x5a2   : > { %v3498_v13 = vpop.f32.mrf.mxu0 }
 0x5a3   : > { %v3499_v14 = vadd.f32 %v3498_v13, %v3401_v63 }
 0x5a5   : > { %v3533_v16 = vadd.f32 %v6215_v34, %v3499_v14  ;;  %v6236_v14 = vld [vmem:[%s6355_s7] ss:$0 sm:$0xff] }
 0x5a7   : > { %vm3549_vm7 = vcmp.gt.f32.partialorder %v3533_v16, 0.0  ;;  %v3565_v18 = vmul.f32 0.2, %v3533_v16 }
 0x5a9   : > { %v3581_v20 = vsel %vm3549_vm7, %v3533_v16, %v3565_v18 }
 0x5aa   : > { %v3501_v21 = vpop.f32.mrf.mxu0  ;;  %v3593_v23 = vpack.c.bf16 %v3581_v20, %v3580_v19 }
 0x5ab   : > { %v3502_v24 = vadd.f32 %v3501_v21, %v3404_v9 }
 0x5ac   : > { %3689 = vmatmul.bf16.gmra.mxu1 %v3593_v23 }
 0x5ad   : > { %v3534_v26 = vadd.f32 %v6215_v34, %v3502_v24 }
 0x5af   : > { %v3566_v28 = vmul.f32 0.2, %v3534_v26  ;;  %vm3550_vm8 = vcmp.gt.f32.partialorder %v3534_v26, 0.0 }
 0x5b1   : > { %v3582_v33 = vsel %vm3550_vm8, %v3534_v26, %v3566_v28 }
 0x5b2   : > { %v3503_v27 = vpop.f32.mrf.mxu0 }
 0x5b3   : > { %v3504_v10 = vadd.f32 %v3503_v27, %v3406_v17 }
 0x5b5   : > { %v3535_v29 = vadd.f32 %v6215_v34, %v3504_v10 }
 0x5b7   : > { %vm3551_vm9 = vcmp.gt.f32.partialorder %v3535_v29, 0.0  ;;  %v3567_v30 = vmul.f32 0.2, %v3535_v29 }
 0x5b9   : > { %v3583_v35 = vsel %vm3551_vm9, %v3535_v29, %v3567_v30 }
 0x5ba   : > { %v3506_v31 = vpop.f32.mrf.mxu0  ;;  %v3594_v36 = vpack.c.bf16 %v3583_v35, %v3582_v33 }
 0x5bb   : > { %v3507_v37 = vadd.f32 %v3506_v31, %v3409_v25 }
 0x5bc   : > { %3694 = vmatmul.bf16.gmra.mxu1 %v3594_v36 }
 0x5bd   : > { %v3536_v38 = vadd.f32 %v6215_v34, %v3507_v37 }
 0x5bf   : > { %v3568_v42 = vmul.f32 0.2, %v3536_v38  ;;  %vm3552_vm10 = vcmp.gt.f32.partialorder %v3536_v38, 0.0 }
 0x5c1   : > { %v3584_v46 = vsel %vm3552_vm10, %v3536_v38, %v3568_v42 }
 0x5c2   : > { %v3508_v39 = vpop.f32.mrf.mxu0 }
 0x5c3   : > { %v3509_v40 = vadd.f32 %v3508_v39, %v3411_v22 }
 0x5c5   : > { %v3537_v43 = vadd.f32 %v6215_v34, %v3509_v40 }
 0x5c7   : > { %vm3553_vm11 = vcmp.gt.f32.partialorder %v3537_v43, 0.0  ;;  %v3569_v44 = vmul.f32 0.2, %v3537_v43 }
 0x5c9   : > { %v3585_v47 = vsel %vm3553_vm11, %v3537_v43, %v3569_v44 }
 0x5ca   : > { %v3511_v48 = vpop.f32.mrf.mxu0  ;;  %v3595_v49 = vpack.c.bf16 %v3585_v47, %v3584_v46 }
 0x5cb   : > { %v3512_v51 = vadd.f32 %v3511_v48, %v3414_v41 }
 0x5cc   : > { %3699 = vmatmul.bf16.gmra.mxu1 %v3595_v49 }
 0x5cd   : > { %v3538_v53 = vadd.f32 %v6215_v34, %v3512_v51 }
 0x5cf   : > { %v3570_v55 = vmul.f32 0.2, %v3538_v53  ;;  %vm3554_vm12 = vcmp.gt.f32.partialorder %v3538_v53, 0.0 }
 0x5d1   : > { %v3586_v60 = vsel %vm3554_vm12, %v3538_v53, %v3570_v55 }
 0x5d2   : > { %v3513_v54 = vpop.f32.mrf.mxu0 }
 0x5d3   : > { %v3514_v59 = vadd.f32 %v3513_v54, %v3416_v52 }
 0x5d5   : > { %v3539_v56 = vadd.f32 %v6215_v34, %v3514_v59 }
 0x5d7   : > { %vm3555_vm13 = vcmp.gt.f32.partialorder %v3539_v56, 0.0  ;;  %v3571_v57 = vmul.f32 0.2, %v3539_v56 }
 0x5d9   : > { %v3587_v61 = vsel %vm3555_vm13, %v3539_v56, %v3571_v57 }
 0x5da   : > { %v3516_v62 = vpop.f32.mrf.mxu0  ;;  %v3596_v63 = vpack.c.bf16 %v3587_v61, %v3586_v60 }
 0x5db   : > { %v3517_v0 = vadd.f32 %v3516_v62, %v3419_v58 }
 0x5dc   : > { %3704 = vmatmul.bf16.gmra.mxu1 %v3596_v63 }
 0x5dd   : > { %v3540_v3 = vadd.f32 %v6215_v34, %v3517_v0 }
 0x5df   : > { %v3572_v7 = vmul.f32 0.2, %v3540_v3  ;;  %vm3556_vm14 = vcmp.gt.f32.partialorder %v3540_v3, 0.0 }
 0x5e1   : > { %v3588_v9 = vsel %vm3556_vm14, %v3540_v3, %v3572_v7 }
 0x5e2   : > { %v3518_v5 = vpop.f32.mrf.mxu0 }
 0x5e3   : > { %v3519_v6 = vadd.f32 %v3518_v5, %v3421_v4 }
 0x5e5   : > { %v3541_v8 = vadd.f32 %v6215_v34, %v3519_v6 }
 0x5e7   : > { %vm3557_vm15 = vcmp.gt.f32.partialorder %v3541_v8, 0.0  ;;  %v3573_v50 = vmul.f32 0.2, %v3541_v8 }
 0x5e9   : > { %v3589_v11 = vsel %vm3557_vm15, %v3541_v8, %v3573_v50 }
 0x5ea   : > { %v3597_v12 = vpack.c.bf16 %v3589_v11, %v3588_v9 }
 0x5ec   : > { %3709 = vmatmul.bf16.gmra.mxu1 %v3597_v12 }
 0x5f9   : > { %v3675_v13 = vpop.f32.mrf.mxu1 }
 0x5fa   : > { %v3676_v15 = vadd.f32 %v6236_v14, %v3675_v13 }
 0x5fc   : > { %v3731_v17 = vmul.f32 0.2, %v3676_v15  ;;  %vm3715_vm0 = vcmp.gt.f32.partialorder %v3676_v15, 0.0 }
 0x5fe   : > { %v3747_v1 = vsel %vm3715_vm0, %v3676_v15, %v3731_v17 }
 0x601   : > { %v3677_v16 = vpop.f32.mrf.mxu1 }
 0x602   : > { %v3678_v18 = vadd.f32 %v6236_v14, %v3677_v16 }
 0x604   : > { %vm3716_vm1 = vcmp.gt.f32.partialorder %v3678_v18, 0.0  ;;  %v3732_v34 = vmul.f32 0.2, %v3678_v18 }
 0x606   : > { %v3748_v19 = vsel %vm3716_vm1, %v3678_v18, %v3732_v34 }
 0x607   : > { %v3763_v20 = vpack.c.bf16 %v3748_v19, %v3747_v1 }
 0x609   : > { %v3680_v21 = vpop.f32.mrf.mxu1  ;;  %3847 = vmatmul.bf16.vlgmr.msra.gmra.mxu2 %v3763_v20 }
 0x60a   : > { %v3681_v23 = vadd.f32 %v6236_v14, %v3680_v21  ;;  %v6257_v21 = vld [vmem:[%s6357_s9] ss:$0 sm:$0xff] }
 0x60c   : > { %v3733_v25 = vmul.f32 0.2, %v3681_v23  ;;  %vm3717_vm2 = vcmp.gt.f32.partialorder %v3681_v23, 0.0 }
 0x60e   : > { %v3749_v10 = vsel %vm3717_vm2, %v3681_v23, %v3733_v25  ;;  %v6263_v25 = vld [vmem:[%s6358_s10] ss:$0 sm:$0xff] }
 0x611   : > { %v3682_v24 = vpop.f32.mrf.mxu1 }
 0x612   : > { %v3683_v26 = vadd.f32 %v6236_v14, %v3682_v24 }
 0x614   : > { %vm3718_vm3 = vcmp.gt.f32.partialorder %v3683_v26, 0.0  ;;  %v3734_v27 = vmul.f32 0.2, %v3683_v26 }
 0x616   : > { %v3750_v28 = vsel %vm3718_vm3, %v3683_v26, %v3734_v27 }
 0x617   : > { %v3764_v29 = vpack.c.bf16 %v3750_v28, %v3749_v10 }
 0x619   : > { %v3685_v30 = vpop.f32.mrf.mxu1  ;;  %3852 = vmatmul.bf16.gmra.mxu2 %v3764_v29 }
 0x61a   : > { %v3686_v32 = vadd.f32 %v6236_v14, %v3685_v30 }
 0x61c   : > { %v3735_v35 = vmul.f32 0.2, %v3686_v32  ;;  %vm3719_vm4 = vcmp.gt.f32.partialorder %v3686_v32, 0.0 }
 0x61e   : > { %v3751_v36 = vsel %vm3719_vm4, %v3686_v32, %v3735_v35 }
 0x621   : > { %v3687_v33 = vpop.f32.mrf.mxu1 }
 0x622   : > { %v3688_v22 = vadd.f32 %v6236_v14, %v3687_v33 }
 0x624   : > { %vm3720_vm5 = vcmp.gt.f32.partialorder %v3688_v22, 0.0  ;;  %v3736_v31 = vmul.f32 0.2, %v3688_v22 }
 0x626   : > { %v3752_v37 = vsel %vm3720_vm5, %v3688_v22, %v3736_v31 }
 0x627   : > { %v3765_v38 = vpack.c.bf16 %v3752_v37, %v3751_v36 }
 0x629   : > { %v3690_v39 = vpop.f32.mrf.mxu1  ;;  %3857 = vmatmul.bf16.gmra.mxu2 %v3765_v38 }
 0x62a   : > { %v3691_v40 = vadd.f32 %v6236_v14, %v3690_v39 }
 0x62c   : > { %v3737_v42 = vmul.f32 0.2, %v3691_v40  ;;  %vm3721_vm6 = vcmp.gt.f32.partialorder %v3691_v40, 0.0 }
 0x62e   : > { %v3753_v45 = vsel %vm3721_vm6, %v3691_v40, %v3737_v42 }
 0x631   : > { %v3692_v41 = vpop.f32.mrf.mxu1 }
 0x632   : > { %v3693_v43 = vadd.f32 %v6236_v14, %v3692_v41 }
 0x634   : > { %vm3722_vm7 = vcmp.gt.f32.partialorder %v3693_v43, 0.0  ;;  %v3738_v44 = vmul.f32 0.2, %v3693_v43 }
 0x636   : > { %v3754_v46 = vsel %vm3722_vm7, %v3693_v43, %v3738_v44 }
 0x637   : > { %v3766_v47 = vpack.c.bf16 %v3754_v46, %v3753_v45 }
 0x639   : > { %v3695_v48 = vpop.f32.mrf.mxu1  ;;  %3862 = vmatmul.bf16.gmra.mxu2 %v3766_v47 }
 0x63a   : > { %v3696_v49 = vadd.f32 %v6236_v14, %v3695_v48 }
 0x63c   : > { %v3739_v52 = vmul.f32 0.2, %v3696_v49  ;;  %vm3723_vm8 = vcmp.gt.f32.partialorder %v3696_v49, 0.0 }
 0x63e   : > { %v3755_v59 = vsel %vm3723_vm8, %v3696_v49, %v3739_v52 }
 0x641   : > { %v3697_v51 = vpop.f32.mrf.mxu1 }
 0x642   : > { %v3698_v53 = vadd.f32 %v6236_v14, %v3697_v51 }
 0x644   : > { %vm3724_vm9 = vcmp.gt.f32.partialorder %v3698_v53, 0.0  ;;  %v3740_v54 = vmul.f32 0.2, %v3698_v53 }
 0x646   : > { %v3756_v55 = vsel %vm3724_vm9, %v3698_v53, %v3740_v54 }
 0x647   : > { %v3767_v56 = vpack.c.bf16 %v3756_v55, %v3755_v59 }
 0x649   : > { %v3700_v57 = vpop.f32.mrf.mxu1  ;;  %3867 = vmatmul.bf16.gmra.mxu2 %v3767_v56 }
 0x64a   : > { %v3701_v58 = vadd.f32 %v6236_v14, %v3700_v57 }
 0x64c   : > { %v3741_v61 = vmul.f32 0.2, %v3701_v58  ;;  %vm3725_vm10 = vcmp.gt.f32.partialorder %v3701_v58, 0.0 }
 0x64e   : > { %v3757_v0 = vsel %vm3725_vm10, %v3701_v58, %v3741_v61 }
 0x651   : > { %v3702_v60 = vpop.f32.mrf.mxu1 }
 0x652   : > { %v3703_v62 = vadd.f32 %v6236_v14, %v3702_v60 }
 0x654   : > { %vm3726_vm11 = vcmp.gt.f32.partialorder %v3703_v62, 0.0  ;;  %v3742_v63 = vmul.f32 0.2, %v3703_v62 }
 0x656   : > { %v3758_v2 = vsel %vm3726_vm11, %v3703_v62, %v3742_v63 }
 0x657   : > { %v3768_v3 = vpack.c.bf16 %v3758_v2, %v3757_v0 }
 0x659   : > { %v3705_v4 = vpop.f32.mrf.mxu1  ;;  %3872 = vmatmul.bf16.gmra.mxu2 %v3768_v3 }
 0x65a   : > { %v3706_v5 = vadd.f32 %v6236_v14, %v3705_v4 }
 0x65c   : > { %v3743_v7 = vmul.f32 0.2, %v3706_v5  ;;  %vm3727_vm12 = vcmp.gt.f32.partialorder %v3706_v5, 0.0 }
 0x65e   : > { %v3759_v9 = vsel %vm3727_vm12, %v3706_v5, %v3743_v7 }
 0x661   : > { %v3707_v6 = vpop.f32.mrf.mxu1 }
 0x662   : > { %v3708_v8 = vadd.f32 %v6236_v14, %v3707_v6 }
 0x664   : > { %vm3728_vm13 = vcmp.gt.f32.partialorder %v3708_v8, 0.0  ;;  %v3744_v50 = vmul.f32 0.2, %v3708_v8 }
 0x666   : > { %v3760_v11 = vsel %vm3728_vm13, %v3708_v8, %v3744_v50 }
 0x667   : > { %v3769_v12 = vpack.c.bf16 %v3760_v11, %v3759_v9 }
 0x669   : > { %v3710_v13 = vpop.f32.mrf.mxu1  ;;  %3877 = vmatmul.bf16.gmra.mxu2 %v3769_v12 }
 0x66a   : > { %v3711_v15 = vadd.f32 %v6236_v14, %v3710_v13 }
 0x66c   : > { %v3745_v17 = vmul.f32 0.2, %v3711_v15  ;;  %vm3729_vm14 = vcmp.gt.f32.partialorder %v3711_v15, 0.0 }
 0x66e   : > { %v3761_v1 = vsel %vm3729_vm14, %v3711_v15, %v3745_v17 }
 0x671   : > { %v3712_v16 = vpop.f32.mrf.mxu1 }
 0x672   : > { %v3713_v18 = vadd.f32 %v6236_v14, %v3712_v16 }
 0x674   : > { %vm3730_vm15 = vcmp.gt.f32.partialorder %v3713_v18, 0.0  ;;  %v3746_v34 = vmul.f32 0.2, %v3713_v18 }
 0x676   : > { %v3762_v19 = vsel %vm3730_vm15, %v3713_v18, %v3746_v34  ;;  %vm4008_vm15 = vcmask 7168  }
 0x677   : > { %v3770_v20 = vpack.c.bf16 %v3762_v19, %v3761_v1 }
 0x679   : > { %3882 = vmatmul.bf16.gmra.mxu2 %v3770_v20 }
 0x68c   : > { %v3848_v23 = vpop.f32.mrf.mxu2 }
 0x68d   : > { %v3849_v24 = vadd.f32 %v6257_v21, %v3848_v23 }
 0x68f   : > { %v3904_v14 = vmul.f32 0.2, %v3849_v24  ;;  %vm3888_vm0 = vcmp.gt.f32.partialorder %v3849_v24, 0.0 }
 0x691   : > { %v3920_v26 = vsel %vm3888_vm0, %v3849_v24, %v3904_v14 }
 0x692   : > { %v3940_v27 = vmul.f32 %v6263_v25, %v3920_v26 }
 0x694   : > { %v3850_v10 = vpop.f32.mrf.mxu2  ;;  %3956 = vadd.xlane.f32.xlu0 %v3940_v27 }
 0x695   : > { %v3851_v28 = vadd.f32 %v6257_v21, %v3850_v10 }
 0x697   : > { %v3905_v29 = vmul.f32 0.2, %v3851_v28  ;;  %vm3889_vm1 = vcmp.gt.f32.partialorder %v3851_v28, 0.0 }
 0x699   : > { %v3921_v30 = vsel %vm3889_vm1, %v3851_v28, %v3905_v29 }
 0x69a   : > { %v3941_v32 = vmul.f32 %v6263_v25, %v3921_v30 }
 0x69c   : > { %v3853_v33 = vpop.f32.mrf.mxu2  ;;  %3958 = vadd.xlane.f32.xlu0 %v3941_v32 }
 0x69d   : > { %v3854_v35 = vadd.f32 %v6257_v21, %v3853_v33 }
 0x69f   : > { %v3906_v22 = vmul.f32 0.2, %v3854_v35  ;;  %vm3890_vm2 = vcmp.gt.f32.partialorder %v3854_v35, 0.0 }
 0x6a1   : > { %v3922_v31 = vsel %vm3890_vm2, %v3854_v35, %v3906_v22 }
 0x6a2   : > { %v3942_v36 = vmul.f32 %v6263_v25, %v3922_v31 }
 0x6a4   : > { %v3855_v37 = vpop.f32.mrf.mxu2  ;;  %3960 = vadd.xlane.f32.xlu1 %v3942_v36  ;;  %v5438_v36 = vld [vmem:[#allocation2] ss:$0 sm:$0xff] }
 0x6a5   : > { %v3856_v38 = vadd.f32 %v6257_v21, %v3855_v37 }
 0x6a7   : > { %v3907_v39 = vmul.f32 0.2, %v3856_v38  ;;  %vm3891_vm3 = vcmp.gt.f32.partialorder %v3856_v38, 0.0 }
 0x6a9   : > { %v3923_v40 = vsel %vm3891_vm3, %v3856_v38, %v3907_v39 }
 0x6aa   : > { %v3943_v41 = vmul.f32 %v6263_v25, %v3923_v40 }
 0x6ac   : > { %v3858_v42 = vpop.f32.mrf.mxu2  ;;  %3962 = vadd.xlane.f32.xlu1 %v3943_v41 }
 0x6ad   : > { %v3859_v43 = vadd.f32 %v6257_v21, %v3858_v42 }
 0x6af   : > { %v3908_v44 = vmul.f32 0.2, %v3859_v43  ;;  %vm3892_vm4 = vcmp.gt.f32.partialorder %v3859_v43, 0.0 }
 0x6b1   : > { %v3924_v45 = vsel %vm3892_vm4, %v3859_v43, %v3908_v44 }
 0x6b2   : > { %v3944_v46 = vmul.f32 %v6263_v25, %v3924_v45 }
 0x6b4   : > { %v3860_v47 = vpop.f32.mrf.mxu2  ;;  %3964 = vadd.xlane.f32.xlu2 %v3944_v46 }
 0x6b5   : > { %v3861_v48 = vadd.f32 %v6257_v21, %v3860_v47 }
 0x6b7   : > { %v3909_v49 = vmul.f32 0.2, %v3861_v48  ;;  %vm3893_vm5 = vcmp.gt.f32.partialorder %v3861_v48, 0.0 }
 0x6b9   : > { %v3925_v51 = vsel %vm3893_vm5, %v3861_v48, %v3909_v49 }
 0x6ba   : > { %v3945_v52 = vmul.f32 %v6263_v25, %v3925_v51 }
 0x6bc   : > { %v3863_v53 = vpop.f32.mrf.mxu2  ;;  %3966 = vadd.xlane.f32.xlu2 %v3945_v52 }
 0x6bd   : > { %v3864_v54 = vadd.f32 %v6257_v21, %v3863_v53 }
 0x6bf   : > { %v3910_v59 = vmul.f32 0.2, %v3864_v54  ;;  %vm3894_vm6 = vcmp.gt.f32.partialorder %v3864_v54, 0.0 }
 0x6c1   : > { %v3926_v55 = vsel %vm3894_vm6, %v3864_v54, %v3910_v59 }
 0x6c2   : > { %v3946_v56 = vmul.f32 %v6263_v25, %v3926_v55 }
 0x6c4   : > { %v3865_v57 = vpop.f32.mrf.mxu2  ;;  %3968 = vadd.xlane.f32.xlu0 %v3946_v56 }
 0x6c5   : > { %v3866_v58 = vadd.f32 %v6257_v21, %v3865_v57 }
 0x6c7   : > { %v3911_v60 = vmul.f32 0.2, %v3866_v58  ;;  %vm3895_vm7 = vcmp.gt.f32.partialorder %v3866_v58, 0.0 }
 0x6c9   : > { %v3927_v61 = vsel %vm3895_vm7, %v3866_v58, %v3911_v60 }
 0x6ca   : > { %v3947_v62 = vmul.f32 %v6263_v25, %v3927_v61 }
 0x6cc   : > { %v3868_v63 = vpop.f32.mrf.mxu2  ;;  %3970 = vadd.xlane.f32.xlu1 %v3947_v62 }
 0x6cd   : > { %v3869_v0 = vadd.f32 %v6257_v21, %v3868_v63 }
 0x6cf   : > { %v3912_v2 = vmul.f32 0.2, %v3869_v0  ;;  %vm3896_vm8 = vcmp.gt.f32.partialorder %v3869_v0, 0.0 }
 0x6d1   : > { %v3928_v3 = vsel %vm3896_vm8, %v3869_v0, %v3912_v2 }
 0x6d2   : > { %v3948_v4 = vmul.f32 %v6263_v25, %v3928_v3 }
 0x6d4   : > { %v3870_v5 = vpop.f32.mrf.mxu2  ;;  %3972 = vadd.xlane.f32.xlu2 %v3948_v4 }
 0x6d5   : > { %v3871_v6 = vadd.f32 %v6257_v21, %v3870_v5 }
 0x6d7   : > { %v3913_v7 = vmul.f32 0.2, %v3871_v6  ;;  %vm3897_vm9 = vcmp.gt.f32.partialorder %v3871_v6, 0.0 }
 0x6d9   : > { %v3929_v8 = vsel %vm3897_vm9, %v3871_v6, %v3913_v7 }
 0x6da   : > { %v3949_v50 = vmul.f32 %v6263_v25, %v3929_v8 }
 0x6dc   : > { %v3873_v9 = vpop.f32.mrf.mxu2  ;;  %3974 = vadd.xlane.f32.xlu0 %v3949_v50 }
 0x6dd   : > { %v3874_v11 = vadd.f32 %v6257_v21, %v3873_v9 }
 0x6df   : > { %v3914_v12 = vmul.f32 0.2, %v3874_v11  ;;  %vm3898_vm10 = vcmp.gt.f32.partialorder %v3874_v11, 0.0 }
 0x6e1   : > { %v3930_v13 = vsel %vm3898_vm10, %v3874_v11, %v3914_v12 }
 0x6e2   : > { %v3950_v15 = vmul.f32 %v6263_v25, %v3930_v13 }
 0x6e4   : > { %v3875_v16 = vpop.f32.mrf.mxu2  ;;  %3976 = vadd.xlane.f32.xlu1 %v3950_v15 }
 0x6e5   : > { %v3876_v17 = vadd.f32 %v6257_v21, %v3875_v16 }
 0x6e7   : > { %v3915_v18 = vmul.f32 0.2, %v3876_v17  ;;  %vm3899_vm11 = vcmp.gt.f32.partialorder %v3876_v17, 0.0 }
 0x6e9   : > { %v3931_v34 = vsel %vm3899_vm11, %v3876_v17, %v3915_v18 }
 0x6ea   : > { %v3951_v1 = vmul.f32 %v6263_v25, %v3931_v34 }
 0x6ec   : > { %v3878_v19 = vpop.f32.mrf.mxu2  ;;  %3978 = vadd.xlane.f32.xlu2 %v3951_v1 }
 0x6ed   : > { %v3879_v20 = vadd.f32 %v6257_v21, %v3878_v19 }
 0x6ef   : > { %v3916_v23 = vmul.f32 0.2, %v3879_v20  ;;  %vm3900_vm12 = vcmp.gt.f32.partialorder %v3879_v20, 0.0 }
 0x6f1   : > { %v3932_v24 = vsel %vm3900_vm12, %v3879_v20, %v3916_v23 }
 0x6f2   : > { %v3952_v14 = vmul.f32 %v6263_v25, %v3932_v24 }
 0x6f4   : > { %v3880_v26 = vpop.f32.mrf.mxu2  ;;  %3980 = vadd.xlane.f32.xlu0 %v3952_v14 }
 0x6f5   : > { %v3881_v27 = vadd.f32 %v6257_v21, %v3880_v26 }
 0x6f7   : > { %v3917_v10 = vmul.f32 0.2, %v3881_v27  ;;  %vm3901_vm13 = vcmp.gt.f32.partialorder %v3881_v27, 0.0 }
 0x6f9   : > { %v3933_v28 = vsel %vm3901_vm13, %v3881_v27, %v3917_v10 }
 0x6fa   : > { %v3953_v29 = vmul.f32 %v6263_v25, %v3933_v28 }
 0x6fc   : > { %v3883_v30 = vpop.f32.mrf.mxu2  ;;  %3982 = vadd.xlane.f32.xlu1 %v3953_v29 }
 0x6fd   : > { %v3884_v32 = vadd.f32 %v6257_v21, %v3883_v30 }
 0x6ff   : > { %v3918_v33 = vmul.f32 0.2, %v3884_v32  ;;  %vm3902_vm14 = vcmp.gt.f32.partialorder %v3884_v32, 0.0 }
 0x701   : > { %v3934_v35 = vsel %vm3902_vm14, %v3884_v32, %v3918_v33 }
 0x702   : > { %v3954_v22 = vmul.f32 %v6263_v25, %v3934_v35 }
 0x704   : > { %v3885_v31 = vpop.f32.mrf.mxu2  ;;  %3984 = vadd.xlane.f32.xlu2 %v3954_v22 }
 0x705   : > { %v3886_v37 = vadd.f32 %v6257_v21, %v3885_v31 }
 0x707   : > { %v3919_v38 = vmul.f32 0.2, %v3886_v37  ;;  %v3957_v39 = vpop.xlane.xlu0 %3956  ;;  %vm3903_vm0 = vcmp.gt.f32.partialorder %v3886_v37, 0.0 }
 0x708   : > { %v3992_v40 = vadd.f32 %v5438_v36, %v3957_v39 }
 0x709   : > { %v3935_v41 = vsel %vm3903_vm0, %v3886_v37, %v3919_v38 }
 0x70a   : > { %4009 = vst.msk [vmem:[%s6300_s27] sm:$0xff] %vm4008_vm15, %v3992_v40  ;;  %v3955_v21 = vmul.f32 %v6263_v25, %v3935_v41 }
 0x70c   : > { %3986 = vadd.xlane.f32.xlu0 %v3955_v21 }
 0x70f   : > { %v3959_v42 = vpop.xlane.xlu0 %3958 }
 0x710   : > { %v3993_v43 = vadd.f32 %v5438_v36, %v3959_v42 }
 0x712   : > { %4010 = vst.msk [vmem:[%s6300_s27 + $0x8] sm:$0xff] %vm4008_vm15, %v3993_v43 }
 0x717   : > { %v3961_v44 = vpop.xlane.xlu1 %3960 }
 0x718   : > { %v3994_v45 = vadd.f32 %v5438_v36, %v3961_v44 }
 0x71a   : > { %4011 = vst.msk [vmem:[%s6300_s27 + $0x10] sm:$0xff] %vm4008_vm15, %v3994_v45 }
 0x71f   : > { %v3963_v46 = vpop.xlane.xlu1 %3962 }
 0x720   : > { %v3995_v47 = vadd.f32 %v5438_v36, %v3963_v46 }
 0x722   : > { %4012 = vst.msk [vmem:[%s6300_s27 + $0x18] sm:$0xff] %vm4008_vm15, %v3995_v47 }
 0x727   : > { %v3965_v48 = vpop.xlane.xlu2 %3964 }
 0x728   : > { %v3996_v49 = vadd.f32 %v5438_v36, %v3965_v48 }
 0x72a   : > { %4013 = vst.msk [vmem:[%s6300_s27 + $0x20] sm:$0xff] %vm4008_vm15, %v3996_v49 }
 0x72f   : > { %v3967_v25 = vpop.xlane.xlu2 %3966 }
 0x730   : > { %v3997_v51 = vadd.f32 %v5438_v36, %v3967_v25 }
 0x732   : > { %4014 = vst.msk [vmem:[%s6300_s27 + $0x28] sm:$0xff] %vm4008_vm15, %v3997_v51 }
 0x737   : > { %v3969_v52 = vpop.xlane.xlu0 %3968 }
 0x738   : > { %v3998_v53 = vadd.f32 %v5438_v36, %v3969_v52 }
 0x73a   : > { %4015 = vst.msk [vmem:[%s6300_s27 + $0x30] sm:$0xff] %vm4008_vm15, %v3998_v53 }
 0x73f   : > { %v3971_v54 = vpop.xlane.xlu1 %3970 }
 0x740   : > { %v3999_v59 = vadd.f32 %v5438_v36, %v3971_v54 }
 0x742   : > { %4016 = vst.msk [vmem:[%s6300_s27 + $0x38] sm:$0xff] %vm4008_vm15, %v3999_v59 }
 0x747   : > { %v3973_v55 = vpop.xlane.xlu2 %3972 }
 0x748   : > { %v4000_v56 = vadd.f32 %v5438_v36, %v3973_v55 }
 0x74a   : > { %4017 = vst.msk [vmem:[%s6300_s27 + $0x40] sm:$0xff] %vm4008_vm15, %v4000_v56 }
 0x74f   : > { %v3975_v57 = vpop.xlane.xlu0 %3974 }
 0x750   : > { %v4001_v58 = vadd.f32 %v5438_v36, %v3975_v57 }
 0x752   : > { %4018 = vst.msk [vmem:[%s6300_s27 + $0x48] sm:$0xff] %vm4008_vm15, %v4001_v58 }
 0x757   : > { %v3977_v60 = vpop.xlane.xlu1 %3976 }
 0x758   : > { %v4002_v61 = vadd.f32 %v5438_v36, %v3977_v60 }
 0x75a   : > { %4019 = vst.msk [vmem:[%s6300_s27 + $0x50] sm:$0xff] %vm4008_vm15, %v4002_v61 }
 0x75f   : > { %v3979_v62 = vpop.xlane.xlu2 %3978 }
 0x760   : > { %v4003_v63 = vadd.f32 %v5438_v36, %v3979_v62 }
 0x762   : > { %4020 = vst.msk [vmem:[%s6300_s27 + $0x58] sm:$0xff] %vm4008_vm15, %v4003_v63 }
 0x767   : > { %v3981_v0 = vpop.xlane.xlu0 %3980 }
 0x768   : > { %v4004_v2 = vadd.f32 %v5438_v36, %v3981_v0 }
 0x76a   : > { %4021 = vst.msk [vmem:[%s6300_s27 + $0x60] sm:$0xff] %vm4008_vm15, %v4004_v2 }
 0x76f   : > { %v3983_v3 = vpop.xlane.xlu1 %3982 }
 0x770   : > { %v4005_v4 = vadd.f32 %v5438_v36, %v3983_v3 }
 0x772   : > { %4022 = vst.msk [vmem:[%s6300_s27 + $0x68] sm:$0xff] %vm4008_vm15, %v4005_v4 }
 0x777   : > { %v3985_v5 = vpop.xlane.xlu2 %3984 }
 0x778   : > { %v4006_v6 = vadd.f32 %v5438_v36, %v3985_v5 }
 0x77a   : > { %4023 = vst.msk [vmem:[%s6300_s27 + $0x70] sm:$0xff] %vm4008_vm15, %v4006_v6 }
 0x77f   : > { %v3987_v7 = vpop.xlane.xlu0 %3986 }
 0x780   : > { %v4007_v8 = vadd.f32 %v5438_v36, %v3987_v7 }
 0x782   : > { %4024 = vst.msk [vmem:[%s6300_s27 + $0x78] sm:$0xff] %vm4008_vm15, %v4007_v8 }
 0x783 PF: > { %p27_p3 = scmp.ge.s32.totalorder %s5864_s28, 4   ;;  %s6376_s23 = smov %s5687_s24 }
 0x784   : > { %s6377_s24 = smov %s5691_s25  ;;  %s6378_s25 = smov %s5876_s18 }
 0x785   : > { %s6379_s26 = smov %s5864_s28  ;;  %29 = sbr.rel (!%p27_p3) target bundleno = 11 (0xb), region = 153 }
 0x78a   :  { %4047 = vsyncpa [#allocation4], 1 }
 0x78b   :  { %4049 = vsyncpa [#allocation4 + $0x1], 1 }
 0x78c   :  { %4050 = vsyncpa [#allocation6], 1 }
 0x78d   :  { %4051 = vsyncpa [#allocation9], 1 }
 0x78e   :  { %4052 = vsyncpa [#allocation12], 1 }

</bundles_post_ra>
